<compile_context>
chip_gen: v7x
topology: tpu7x:2x2x1
jax: 0.10.0
libtpu: 0.0.40
codegen_flags: <defaults>
</compile_context>

<pallas_src>
import functools

import jax
import jax.numpy as jnp
from jax.experimental import pallas as pl
from jax.experimental.pallas import tpu as pltpu

IN_DIM = 2800            # dimension=2 -> size=2800
K_PAD = 2816             # 22 * 128 (lane-aligned contraction dim)
H1, H2, H3 = 512, 256, 128
OUT_DIM = 28
OUT_PAD = 128            # lane-dense output width


def _round_up(n, m):
    return ((n + m - 1) // m) * m


def encoder_kernel(alpha_ref,                       # SMEM [4] PReLU slopes (f32)
                   x_ref,                           # [TILE_B, 2816] bf16
                   w1_ref, b1_ref,                  # [2816,512] bf16, [1,512] f32
                   w2_ref, b2_ref,                  # [512,256]  bf16, [1,256] f32
                   w3_ref, b3_ref,                  # [256,128]  bf16, [1,128] f32
                   w4_ref, b4_ref,                  # [128,128]  bf16, [1,128] f32
                   o_ref):                          # [TILE_B, 128] f32
    def prelu(h, a):
        return jnp.where(h >= 0.0, h, a * h)

    h = jnp.dot(x_ref[...], w1_ref[...], preferred_element_type=jnp.float32) + b1_ref[...]
    h = prelu(h, alpha_ref[0])
    h = jnp.dot(h.astype(w2_ref.dtype), w2_ref[...],
                preferred_element_type=jnp.float32) + b2_ref[...]
    h = prelu(h, alpha_ref[1])
    h = jnp.dot(h.astype(w3_ref.dtype), w3_ref[...],
                preferred_element_type=jnp.float32) + b3_ref[...]
    h = prelu(h, alpha_ref[2])
    h = jnp.dot(h.astype(w4_ref.dtype), w4_ref[...],
                preferred_element_type=jnp.float32) + b4_ref[...]
    o_ref[...] = h.astype(o_ref.dtype)


@functools.partial(jax.jit, static_argnames=("tile_b",))
def encoder_forward(x, kparams, tile_b=256):
    """x: [B, 2800] float32 -> [B, 28] float32 (kparams from prepare_params)."""
    (w1, b1, w2, b2, w3, b3, w4, b4, alphas) = kparams
    B = x.shape[0]

    # Batch tile: multiple of 16 (bf16 sublane packing); pad B so the grid divides.
    tb = min(tile_b, _round_up(B, 16))
    b_pad = _round_up(B, tb)
    num_tiles = b_pad // tb

    # Cast activations to bf16 and pad batch + contraction dims once, here.
    xk = jnp.pad(x.astype(jnp.bfloat16), ((0, b_pad - B), (0, K_PAD - IN_DIM)))

    cost = pl.CostEstimate(
        flops=2 * b_pad * (K_PAD * H1 + H1 * H2 + H2 * H3 + H3 * OUT_PAD),
        transcendentals=0,
        bytes_accessed=(xk.size * 2
                        + (w1.size + w2.size + w3.size + w4.size) * 2
                        + (b1.size + b2.size + b3.size + b4.size) * 4
                        + b_pad * OUT_PAD * 4),
    )

    def const(shape):  # weight/bias blocks: loaded once, VMEM-resident across grid
        return pl.BlockSpec(shape, lambda i: (0, 0))

    out = pl.pallas_call(
        encoder_kernel,
        out_shape=jax.ShapeDtypeStruct((b_pad, OUT_PAD), jnp.float32),
        grid=(num_tiles,),
        in_specs=[
            pl.BlockSpec(memory_space=pltpu.MemorySpace.SMEM),    # alphas [4]
            pl.BlockSpec((tb, K_PAD), lambda i: (i, 0)),          # x tile
            const((K_PAD, H1)), const((1, H1)),                   # layer 1
            const((H1, H2)), const((1, H2)),                      # layer 2
            const((H2, H3)), const((1, H3)),                      # layer 3
            const((H3, OUT_PAD)), const((1, OUT_PAD)),            # layer 4 (padded)
        ],
        out_specs=pl.BlockSpec((tb, OUT_PAD), lambda i: (i, 0)),
        compiler_params=pltpu.CompilerParams(
            dimension_semantics=("parallel",),      # shard batch tiles across TCs (v7x)
            vmem_limit_bytes=32 << 20,              # well under v7x's 64 MiB physical
        ),
        cost_estimate=cost,
    )(alphas, xk, w1, b1, w2, b2, w3, b3, w4, b4)

    return out[:B, :OUT_DIM]


def init_params(key, in_dim=IN_DIM):
    """Deterministic init mimicking PyTorch nn.Linear default (U[-1/sqrt(fan_in), +])."""
    dims = [in_dim, H1, H2, H3, OUT_DIM]
    params = []
    for i in range(4):
        fan_in, fan_out = dims[i], dims[i + 1]
        key, kw, kb = jax.random.split(key, 3)
        bound = 1.0 / (fan_in ** 0.5)
        w = jax.random.uniform(kw, (fan_in, fan_out), jnp.float32, -bound, bound)
        b = jax.random.uniform(kb, (1, fan_out), jnp.float32, -bound, bound)
        params += [w, b]
    alphas = jnp.full((4,), 0.25, dtype=jnp.float32)  # PReLU default init
    params.append(alphas)
    return tuple(params)


def prepare_params(params):
    """One-time kernel prep: pad K 2800->2816, pad last out 28->128, bf16 weights."""
    (w1, b1, w2, b2, w3, b3, w4, b4, alphas) = params
    w1p = jnp.pad(w1, ((0, K_PAD - IN_DIM), (0, 0)))
    w4p = jnp.pad(w4, ((0, 0), (0, OUT_PAD - OUT_DIM)))
    b4p = jnp.pad(b4, ((0, 0), (0, OUT_PAD - OUT_DIM)))
    bf = lambda t: t.astype(jnp.bfloat16)
    return (bf(w1p), b1, bf(w2), b2, bf(w3), b3, bf(w4p), b4p, alphas)


def encoder_reference(x, params, use_bf16=True):
    """Pure-JAX reference. use_bf16=True mirrors the kernel's exact compute path."""
    (w1, b1, w2, b2, w3, b3, w4, b4, alphas) = params
    cast = (lambda t: t.astype(jnp.bfloat16)) if use_bf16 else (lambda t: t)
    prelu = lambda h, a: jnp.where(h >= 0.0, h, a * h)
    h = prelu(jnp.dot(cast(x), cast(w1), preferred_element_type=jnp.float32) + b1, alphas[0])
    h = prelu(jnp.dot(cast(h), cast(w2), preferred_element_type=jnp.float32) + b2, alphas[1])
    h = prelu(jnp.dot(cast(h), cast(w3), preferred_element_type=jnp.float32) + b3, alphas[2])
    return jnp.dot(cast(h), cast(w4), preferred_element_type=jnp.float32) + b4


if __name__ == "__main__":
    key = jax.random.PRNGKey(0)
    kx, kp = jax.random.split(key)

    B = 8
    x = jax.random.normal(kx, (B, IN_DIM), dtype=jnp.float32)
    params = init_params(kp)
    kparams = prepare_params(params)

    out = encoder_forward(x, kparams)
    out = jax.block_until_ready(out)
    assert out.shape == (B, OUT_DIM)

    # Tight check vs a reference that follows the kernel's bf16/f32-accum path.
    ref_bf16 = encoder_reference(x, params, use_bf16=True)
    assert jnp.allclose(out, ref_bf16, atol=2e-2, rtol=2e-2), "mismatch vs bf16-path reference"
    # Loose sanity check vs the full-f32 reference (bf16 weight rounding only).
    ref_f32 = encoder_reference(x, params, use_bf16=False)
    assert jnp.allclose(out, ref_f32, atol=1e-1, rtol=1e-1), "mismatch vs f32 reference"

    print("KERNEL_OK")
</pallas_src>

<mosaic_0001>
module attributes {stable_mosaic.version = 11 : i64} {
  func.func @encoder_kernel(%arg0: i32, %arg1: memref<4xf32, #tpu.memory_space<smem>>, %arg2: memref<16x2816xbf16, #tpu.memory_space<vmem>>, %arg3: memref<2816x512xbf16, #tpu.memory_space<vmem>>, %arg4: memref<1x512xf32, #tpu.memory_space<vmem>>, %arg5: memref<512x256xbf16, #tpu.memory_space<vmem>>, %arg6: memref<1x256xf32, #tpu.memory_space<vmem>>, %arg7: memref<256x128xbf16, #tpu.memory_space<vmem>>, %arg8: memref<1x128xf32, #tpu.memory_space<vmem>>, %arg9: memref<128x128xbf16, #tpu.memory_space<vmem>>, %arg10: memref<1x128xf32, #tpu.memory_space<vmem>>, %arg11: memref<16x128xf32, #tpu.memory_space<vmem>>) attributes {dimension_semantics = [#tpu.dimension_semantics<parallel>], iteration_bounds = array<i64: 1>, scalar_prefetch = 0 : i64, scratch_operands = 0 : i64, tpu.core_type = #tpu.core_type<tc>, window_params = [{transform_indices = @transform_0, window_bounds = array<i64: 4>}, {transform_indices = @transform_1, window_bounds = array<i64: 16, 2816>}, {pipeline_mode = #tpu.pipeline_mode<synchronous>, transform_indices = @transform_2, window_bounds = array<i64: 2816, 512>}, {pipeline_mode = #tpu.pipeline_mode<synchronous>, transform_indices = @transform_3, window_bounds = array<i64: 1, 512>}, {pipeline_mode = #tpu.pipeline_mode<synchronous>, transform_indices = @transform_4, window_bounds = array<i64: 512, 256>}, {pipeline_mode = #tpu.pipeline_mode<synchronous>, transform_indices = @transform_5, window_bounds = array<i64: 1, 256>}, {pipeline_mode = #tpu.pipeline_mode<synchronous>, transform_indices = @transform_6, window_bounds = array<i64: 256, 128>}, {pipeline_mode = #tpu.pipeline_mode<synchronous>, transform_indices = @transform_7, window_bounds = array<i64: 1, 128>}, {pipeline_mode = #tpu.pipeline_mode<synchronous>, transform_indices = @transform_8, window_bounds = array<i64: 128, 128>}, {pipeline_mode = #tpu.pipeline_mode<synchronous>, transform_indices = @transform_9, window_bounds = array<i64: 1, 128>}, {transform_indices = @transform_10, window_bounds = array<i64: 16, 128>}]} {
    %c0 = arith.constant 0 : index
    %c0_0 = arith.constant 0 : index
    %0 = vector.load %arg2[%c0, %c0_0] : memref<16x2816xbf16, #tpu.memory_space<vmem>>, vector<16x2816xbf16>
    %c0_1 = arith.constant 0 : index
    %c0_2 = arith.constant 0 : index
    %1 = vector.load %arg3[%c0_1, %c0_2] : memref<2816x512xbf16, #tpu.memory_space<vmem>>, vector<2816x512xbf16>
    %cst = arith.constant dense<0.000000e+00> : vector<16x512xf32>
    %2 = tpu.matmul %0, %1, %cst {dimension_numbers = #tpu.dot_dimension_numbers<[1], [0], [0], [1], [0, 0, 1, 1], [], []>} : vector<16x2816xbf16>, vector<2816x512xbf16>, vector<16x512xf32> -> vector<16x512xf32>
    %c0_3 = arith.constant 0 : index
    %c0_4 = arith.constant 0 : index
    %3 = vector.load %arg4[%c0_3, %c0_4] : memref<1x512xf32, #tpu.memory_space<vmem>>, vector<1x512xf32>
    %4 = vector.broadcast %3 : vector<1x512xf32> to vector<16x512xf32>
    %5 = arith.addf %2, %4 : vector<16x512xf32>
    %c0_5 = arith.constant 0 : index
    %6 = memref.load %arg1[%c0_5] : memref<4xf32, #tpu.memory_space<smem>>
    %cst_6 = arith.constant 0.000000e+00 : f32
    %7 = vector.broadcast %cst_6 : f32 to vector<16x512xf32>
    %8 = arith.cmpf oge, %5, %7 : vector<16x512xf32>
    %9 = vector.broadcast %6 : f32 to vector<16x512xf32>
    %10 = arith.mulf %9, %5 : vector<16x512xf32>
    %11 = arith.select %8, %5, %10 : vector<16x512xi1>, vector<16x512xf32>
    %12 = arith.truncf %11 : vector<16x512xf32> to vector<16x512xbf16>
    %c0_7 = arith.constant 0 : index
    %c0_8 = arith.constant 0 : index
    %13 = vector.load %arg5[%c0_7, %c0_8] : memref<512x256xbf16, #tpu.memory_space<vmem>>, vector<512x256xbf16>
    %cst_9 = arith.constant dense<0.000000e+00> : vector<16x256xf32>
    %14 = tpu.matmul %12, %13, %cst_9 {dimension_numbers = #tpu.dot_dimension_numbers<[1], [0], [0], [1], [0, 0, 1, 1], [], []>} : vector<16x512xbf16>, vector<512x256xbf16>, vector<16x256xf32> -> vector<16x256xf32>
    %c0_10 = arith.constant 0 : index
    %c0_11 = arith.constant 0 : index
    %15 = vector.load %arg6[%c0_10, %c0_11] : memref<1x256xf32, #tpu.memory_space<vmem>>, vector<1x256xf32>
    %16 = vector.broadcast %15 : vector<1x256xf32> to vector<16x256xf32>
    %17 = arith.addf %14, %16 : vector<16x256xf32>
    %c1 = arith.constant 1 : index
    %18 = memref.load %arg1[%c1] : memref<4xf32, #tpu.memory_space<smem>>
    %cst_12 = arith.constant 0.000000e+00 : f32
    %19 = vector.broadcast %cst_12 : f32 to vector<16x256xf32>
    %20 = arith.cmpf oge, %17, %19 : vector<16x256xf32>
    %21 = vector.broadcast %18 : f32 to vector<16x256xf32>
    %22 = arith.mulf %21, %17 : vector<16x256xf32>
    %23 = arith.select %20, %17, %22 : vector<16x256xi1>, vector<16x256xf32>
    %24 = arith.truncf %23 : vector<16x256xf32> to vector<16x256xbf16>
    %c0_13 = arith.constant 0 : index
    %c0_14 = arith.constant 0 : index
    %25 = vector.load %arg7[%c0_13, %c0_14] : memref<256x128xbf16, #tpu.memory_space<vmem>>, vector<256x128xbf16>
    %cst_15 = arith.constant dense<0.000000e+00> : vector<16x128xf32>
    %26 = tpu.matmul %24, %25, %cst_15 {dimension_numbers = #tpu.dot_dimension_numbers<[1], [0], [0], [1], [0, 0, 1, 1], [], []>} : vector<16x256xbf16>, vector<256x128xbf16>, vector<16x128xf32> -> vector<16x128xf32>
    %c0_16 = arith.constant 0 : index
    %c0_17 = arith.constant 0 : index
    %27 = vector.load %arg8[%c0_16, %c0_17] : memref<1x128xf32, #tpu.memory_space<vmem>>, vector<1x128xf32>
    %28 = vector.broadcast %27 : vector<1x128xf32> to vector<16x128xf32>
    %29 = arith.addf %26, %28 : vector<16x128xf32>
    %c2 = arith.constant 2 : index
    %30 = memref.load %arg1[%c2] : memref<4xf32, #tpu.memory_space<smem>>
    %cst_18 = arith.constant 0.000000e+00 : f32
    %31 = vector.broadcast %cst_18 : f32 to vector<16x128xf32>
    %32 = arith.cmpf oge, %29, %31 : vector<16x128xf32>
    %33 = vector.broadcast %30 : f32 to vector<16x128xf32>
    %34 = arith.mulf %33, %29 : vector<16x128xf32>
    %35 = arith.select %32, %29, %34 : vector<16x128xi1>, vector<16x128xf32>
    %36 = arith.truncf %35 : vector<16x128xf32> to vector<16x128xbf16>
    %c0_19 = arith.constant 0 : index
    %c0_20 = arith.constant 0 : index
    %37 = vector.load %arg9[%c0_19, %c0_20] : memref<128x128xbf16, #tpu.memory_space<vmem>>, vector<128x128xbf16>
    %cst_21 = arith.constant dense<0.000000e+00> : vector<16x128xf32>
    %38 = tpu.matmul %36, %37, %cst_21 {dimension_numbers = #tpu.dot_dimension_numbers<[1], [0], [0], [1], [0, 0, 1, 1], [], []>} : vector<16x128xbf16>, vector<128x128xbf16>, vector<16x128xf32> -> vector<16x128xf32>
    %c0_22 = arith.constant 0 : index
    %c0_23 = arith.constant 0 : index
    %39 = vector.load %arg10[%c0_22, %c0_23] : memref<1x128xf32, #tpu.memory_space<vmem>>, vector<1x128xf32>
    %40 = vector.broadcast %39 : vector<1x128xf32> to vector<16x128xf32>
    %41 = arith.addf %38, %40 : vector<16x128xf32>
    %c0_24 = arith.constant 0 : index
    %c0_25 = arith.constant 0 : index
    %42 = vector.load %arg11[%c0_24, %c0_25] : memref<16x128xf32, #tpu.memory_space<vmem>>, vector<16x128xf32>
    tpu.vector_store %arg11[%c0_24, %c0_25], %41 {strides = array<i32>} : memref<16x128xf32, #tpu.memory_space<vmem>>, vector<16x128xf32>,
    return
  }
  func.func @transform_0(%arg0: i32) -> i32 {
    %c0_i32 = arith.constant 0 : i32
    %c0_i32_0 = arith.constant 0 : i32
    return %c0_i32 : i32
  }
  func.func @transform_1(%arg0: i32) -> (i32, i32) {
    %c0_i32 = arith.constant 0 : i32
    %c0_i32_0 = arith.constant 0 : i32
    return %arg0, %c0_i32 : i32, i32
  }
  func.func @transform_2(%arg0: i32) -> (i32, i32) {
    %c0_i32 = arith.constant 0 : i32
    %c0_i32_0 = arith.constant 0 : i32
    %c0_i32_1 = arith.constant 0 : i32
    return %c0_i32, %c0_i32_0 : i32, i32
  }
  func.func @transform_3(%arg0: i32) -> (i32, i32) {
    %c0_i32 = arith.constant 0 : i32
    %c0_i32_0 = arith.constant 0 : i32
    %c0_i32_1 = arith.constant 0 : i32
    return %c0_i32, %c0_i32_0 : i32, i32
  }
  func.func @transform_4(%arg0: i32) -> (i32, i32) {
    %c0_i32 = arith.constant 0 : i32
    %c0_i32_0 = arith.constant 0 : i32
    %c0_i32_1 = arith.constant 0 : i32
    return %c0_i32, %c0_i32_0 : i32, i32
  }
  func.func @transform_5(%arg0: i32) -> (i32, i32) {
    %c0_i32 = arith.constant 0 : i32
    %c0_i32_0 = arith.constant 0 : i32
    %c0_i32_1 = arith.constant 0 : i32
    return %c0_i32, %c0_i32_0 : i32, i32
  }
  func.func @transform_6(%arg0: i32) -> (i32, i32) {
    %c0_i32 = arith.constant 0 : i32
    %c0_i32_0 = arith.constant 0 : i32
    %c0_i32_1 = arith.constant 0 : i32
    return %c0_i32, %c0_i32_0 : i32, i32
  }
  func.func @transform_7(%arg0: i32) -> (i32, i32) {
    %c0_i32 = arith.constant 0 : i32
    %c0_i32_0 = arith.constant 0 : i32
    %c0_i32_1 = arith.constant 0 : i32
    return %c0_i32, %c0_i32_0 : i32, i32
  }
  func.func @transform_8(%arg0: i32) -> (i32, i32) {
    %c0_i32 = arith.constant 0 : i32
    %c0_i32_0 = arith.constant 0 : i32
    %c0_i32_1 = arith.constant 0 : i32
    return %c0_i32, %c0_i32_0 : i32, i32
  }
  func.func @transform_9(%arg0: i32) -> (i32, i32) {
    %c0_i32 = arith.constant 0 : i32
    %c0_i32_0 = arith.constant 0 : i32
    %c0_i32_1 = arith.constant 0 : i32
    return %c0_i32, %c0_i32_0 : i32, i32
  }
  func.func @transform_10(%arg0: i32) -> (i32, i32) {
    %c0_i32 = arith.constant 0 : i32
    %c0_i32_0 = arith.constant 0 : i32
    return %arg0, %c0_i32 : i32, i32
  }
}

</mosaic_0001>

<bundles_post_ra>
// kernel: encoder_forward.1
= control target key start
LH: loop header
LB: loop body
LE: loop exit
PB: predicated region body
PF: predicated region fallthrough
CT: control target
= control target key end

     0   :  { %15 = vsyncpa [#allocation4], 0  ;;  %s8974_s0 = inlined_call_operand.hbm [shape: f32[4], index: 0, kind: input, shape index: {}]   ;;  %s8975_s1 = inlined_call_operand.vmem [shape: bf16[16,2816], index: 1, kind: input, shape index: {}]   ;;  %s8976_s2 = inlined_call_operand.hbm [shape: bf16[2816,512], index: 2, kind: input, shape index: {}]   ;;  %s8977_s3 = inlined_call_operand.hbm [shape: f32[1,512], index: 3, kind: input, shape index: {}]   ;;  %s8978_s4 = inlined_call_operand.hbm [shape: bf16[512,256], index: 4, kind: input, shape index: {}]   ;;  %s8979_s5 = inlined_call_operand.hbm [shape: f32[1,256], index: 5, kind: input, shape index: {}]   ;;  %s8980_s6 = inlined_call_operand.hbm [shape: bf16[256,128], index: 6, kind: input, shape index: {}]   ;;  %s8981_s7 = inlined_call_operand.hbm [shape: f32[1,128], index: 7, kind: input, shape index: {}]   ;;  %s8982_s8 = inlined_call_operand.hbm [shape: bf16[128,128], index: 8, kind: input, shape index: {}]   ;;  %s8983_s9 = inlined_call_operand.hbm [shape: f32[1,128], index: 9, kind: input, shape index: {}]   ;;  %s8984_s10 = inlined_call_operand.vmem [shape: f32[16,128], index: 10, kind: output, shape index: {}]  }
   0x1   :  { %16 = vsyncpa [#allocation3], 0 }
   0x2   :  { %17 = vsyncpa [#allocation7], 0 }
   0x3   :  { %18 = vsyncpa [#allocation10], 0 }
   0x4   :  { %19 = vsyncpa [#allocation13], 0 }
   0x5   :  { %20 = vsyncpa [#allocation16], 0  ;;  %s8698_s13 = smov [#allocation6]   ;;  %s8699_s15 = smov [#allocation9]  }
   0x6   :  { %s49_s14 = sshll.u32 %s8698_s13, 4  ;;  %s71_s16 = sshll.u32 %s8699_s15, 4  ;;  %s50_s14 = int_to_ptr.vmem [resolvable:$true] %s49_s14  ;;  %s72_s16 = int_to_ptr.vmem [resolvable:$true] %s71_s16 }
   0x7   :  { %s8500_s19 = scalar_lea.hbm %s8977_s3, 64 }
   0x8   :  { %p8501_p0 = scmp.ne.s32.totalorder %s8977_s3, %s8500_s19  ;;  %p8504_p1 = scmp.lt.u32.totalorder %s8500_s19, %s8977_s3 }
   0xa   :  { %p8506_p2 = pnand %p8504_p1, %p8501_p0 }
   0xc   :  { %8509 = shalt.err (!%p8506_p2)
}
   0xd   :  { %s8510_s24 = scalar_lea.vmem %s50_s14, 64  ;;  %p8515_p4 = scmp.lt.s32.totalorder %s50_s14, %s50_s14 }
   0xe   :  { %p8511_p3 = scmp.ne.s32.totalorder %s50_s14, %s8510_s24  ;;  %p8516_p5 = scmp.lt.s32.totalorder %s8510_s24, %s8510_s24 }
  0x10   :  { %p8517_p6 = por %p8516_p5, %p8515_p4 }
  0x12   :  { %p8518_p7 = pnand %p8517_p6, %p8511_p3 }
  0x14   :  { %8521 = shalt.err (!%p8518_p7)
}
  0x15   :  { %52 = dma.hbm_to_vmem [thread:$0]  %s8977_s3, 64, %s50_s14, [#allocation7]  }
  0x16   :  { %s8522_s29 = scalar_lea.hbm %s8979_s5, 32 }
  0x17   :  { %p8523_p8 = scmp.ne.s32.totalorder %s8979_s5, %s8522_s29  ;;  %p8526_p9 = scmp.lt.u32.totalorder %s8522_s29, %s8979_s5 }
  0x19   :  { %p8528_p10 = pnand %p8526_p9, %p8523_p8 }
  0x1b   :  { %8531 = shalt.err (!%p8528_p10)
}
  0x1c   :  { %s8532_s15 = scalar_lea.vmem %s72_s16, 32  ;;  %p8537_p12 = scmp.lt.s32.totalorder %s72_s16, %s72_s16 }
  0x1d   :  { %p8533_p11 = scmp.ne.s32.totalorder %s72_s16, %s8532_s15  ;;  %p8538_p13 = scmp.lt.s32.totalorder %s8532_s15, %s8532_s15 }
  0x1f   :  { %p8539_p0 = por %p8538_p13, %p8537_p12 }
  0x21   :  { %p8540_p1 = pnand %p8539_p0, %p8533_p11 }
  0x23   :  { %8543 = shalt.err (!%p8540_p1)
}
  0x24   :  { %74 = dma.hbm_to_vmem [thread:$0]  %s8979_s5, 32, %s72_s16, [#allocation10]  }
  0x25   :  { %s8700_s17 = smov [#allocation12]   ;;  %s8701_s19 = smov [#allocation5]  }
  0x26   :  { %s93_s18 = sshll.u32 %s8700_s17, 4  ;;  %s36_s20 = sshll.u32 %s8701_s19, 4  ;;  %s94_s18 = int_to_ptr.vmem [resolvable:$true] %s93_s18  ;;  %s37_s20 = int_to_ptr.vmem [resolvable:$true] %s36_s20 }
  0x27   :  { %s8544_s23 = scalar_lea.hbm %s8981_s7, 16 }
  0x28   :  { %p8545_p2 = scmp.ne.s32.totalorder %s8981_s7, %s8544_s23  ;;  %p8548_p3 = scmp.lt.u32.totalorder %s8544_s23, %s8981_s7 }
  0x2a   :  { %p8550_p4 = pnand %p8548_p3, %p8545_p2 }
  0x2c   :  { %8553 = shalt.err (!%p8550_p4)
}
  0x2d   :  { %s8554_s5 = scalar_lea.vmem %s94_s18, 16  ;;  %s8558_s16 = scalar_lea.vmem %s94_s18, 32 }
  0x2e   :  { %p8555_p5 = scmp.ne.s32.totalorder %s94_s18, %s8554_s5  ;;  %p8559_p6 = scmp.lt.s32.totalorder %s94_s18, %s94_s18 }
  0x2f   :  { %p8560_p7 = scmp.lt.s32.totalorder %s8558_s16, %s8554_s5 }
  0x31   :  { %p8561_p8 = por %p8560_p7, %p8559_p6 }
  0x33   :  { %p8562_p9 = pnand %p8561_p8, %p8555_p5 }
  0x35   :  { %8565 = shalt.err (!%p8562_p9)
}
  0x36   :  { %96 = dma.hbm_to_vmem [thread:$0]  %s8981_s7, 16, %s94_s18, [#allocation13]  }
  0x37   :  { %s8566_s12 = scalar_lea.hbm %s8974_s0, 16 }
  0x38   :  { %p8567_p10 = scmp.ne.s32.totalorder %s8974_s0, %s8566_s12  ;;  %p8570_p11 = scmp.lt.u32.totalorder %s8566_s12, %s8974_s0 }
  0x3a   :  { %p8572_p12 = pnand %p8570_p11, %p8567_p10 }
  0x3c   :  { %8575 = shalt.err (!%p8572_p12)
}
  0x3d   :  { %s8702_s17 = smov [#allocation2]   ;;  %s8576_s22 = scalar_lea.hbm %s8976_s2, 90112 }
  0x3e   :  { %28 = dma.hbm_to_smem %s8974_s0, 16, %s8702_s17, [#allocation4]  }
  0x3f   :  { %p8577_p13 = scmp.ne.s32.totalorder %s8976_s2, %s8576_s22  ;;  %p8580_p0 = scmp.lt.u32.totalorder %s8576_s22, %s8976_s2 }
  0x41   :  { %p8582_p1 = pnand %p8580_p0, %p8577_p13 }
  0x43   :  { %8585 = shalt.err (!%p8582_p1)
}
  0x44   :  { %s8586_s27 = scalar_lea.vmem %s37_s20, 90112  ;;  %p8591_p3 = scmp.lt.s32.totalorder %s37_s20, %s37_s20 }
  0x45   :  { %p8587_p2 = scmp.ne.s32.totalorder %s37_s20, %s8586_s27  ;;  %p8592_p4 = scmp.lt.s32.totalorder %s8586_s27, %s8586_s27 }
  0x47   :  { %p8593_p5 = por %p8592_p4, %p8591_p3 }
  0x49   :  { %p8594_p6 = pnand %p8593_p5, %p8587_p2 }
  0x4b   :  { %8597 = shalt.err (!%p8594_p6)
}
  0x4c   :  { %s8703_s0 = smov 256   ;;  %s8704_s5 = smov 16  }
  0x4d   :  { %42 = dma.hbm_to_vmem [thread:$0]  %s8976_s2, 90112, %s37_s20, [#allocation3], %s8703_s0, %s8703_s0, %s8704_s5  }
  0x4e   :  { %s8705_s29 = smov [#allocation8]   ;;  %s8598_s13 = scalar_lea.hbm %s8978_s4, 8192 }
  0x4f   :  { %s58_s30 = sshll.u32 %s8705_s29, 4  ;;  %p8599_p7 = scmp.ne.s32.totalorder %s8978_s4, %s8598_s13  ;;  %s59_s30 = int_to_ptr.vmem [resolvable:$true] %s58_s30 }
  0x50   :  { %p8602_p8 = scmp.lt.u32.totalorder %s8598_s13, %s8978_s4 }
  0x52   :  { %p8604_p9 = pnand %p8602_p8, %p8599_p7 }
  0x54   :  { %8607 = shalt.err (!%p8604_p9)
}
  0x55   :  { %s8608_s19 = scalar_lea.vmem %s59_s30, 8192  ;;  %p8613_p11 = scmp.lt.s32.totalorder %s59_s30, %s59_s30 }
  0x56   :  { %p8609_p10 = scmp.ne.s32.totalorder %s59_s30, %s8608_s19  ;;  %p8614_p12 = scmp.lt.s32.totalorder %s8608_s19, %s8608_s19 }
  0x58   :  { %p8615_p13 = por %p8614_p12, %p8613_p11 }
  0x5a   :  { %p8616_p0 = pnand %p8615_p13, %p8609_p10 }
  0x5c   :  { %8619 = shalt.err (!%p8616_p0)
}
  0x5d   :  { %s8706_s2 = smov 128   ;;  %s8707_s20 = smov 8  }
  0x5e   :  { %64 = dma.hbm_to_vmem [thread:$0]  %s8978_s4, 8192, %s59_s30, [#allocation7], %s8706_s2, %s8706_s2, %s8707_s20  }
  0x5f   :  { %s8708_s18 = smov [#allocation11]   ;;  %s8620_s25 = scalar_lea.hbm %s8980_s6, 2048 }
  0x60   :  { %s80_s22 = sshll.u32 %s8708_s18, 4  ;;  %p8621_p1 = scmp.ne.s32.totalorder %s8980_s6, %s8620_s25  ;;  %s81_s22 = int_to_ptr.vmem [resolvable:$true] %s80_s22 }
  0x61   :  { %p8624_p2 = scmp.lt.u32.totalorder %s8620_s25, %s8980_s6 }
  0x63   :  { %p8626_p3 = pnand %p8624_p2, %p8621_p1 }
  0x65   :  { %8629 = shalt.err (!%p8626_p3)
}
  0x66   :  { %s8630_s16 = scalar_lea.vmem %s81_s22, 2048  ;;  %p8635_p5 = scmp.lt.s32.totalorder %s81_s22, %s81_s22 }
  0x67   :  { %p8631_p4 = scmp.ne.s32.totalorder %s81_s22, %s8630_s16  ;;  %p8636_p6 = scmp.lt.s32.totalorder %s8630_s16, %s8630_s16 }
  0x69   :  { %p8637_p7 = por %p8636_p6, %p8635_p5 }
  0x6b   :  { %p8638_p8 = pnand %p8637_p7, %p8631_p4 }
  0x6d   :  { %8641 = shalt.err (!%p8638_p8)
}
  0x6e   :  { %s8709_s4 = smov 64   ;;  %s8710_s28 = smov 4  }
  0x6f   :  { %86 = dma.hbm_to_vmem [thread:$0]  %s8980_s6, 2048, %s81_s22, [#allocation10], %s8709_s4, %s8709_s4, %s8710_s28  }
  0x70   :  { %s8711_s11 = smov [#allocation14]   ;;  %s8712_s13 = smov [#allocation15]  }
  0x71   :  { %s102_s12 = sshll.u32 %s8711_s11, 4  ;;  %s115_s15 = sshll.u32 %s8712_s13, 4  ;;  %s103_s12 = int_to_ptr.vmem [resolvable:$true] %s102_s12  ;;  %s116_s15 = int_to_ptr.vmem [resolvable:$true] %s115_s15 }
  0x72   :  { %s8642_s17 = scalar_lea.hbm %s8982_s8, 1024 }
  0x73   :  { %p8643_p9 = scmp.ne.s32.totalorder %s8982_s8, %s8642_s17  ;;  %p8646_p10 = scmp.lt.u32.totalorder %s8642_s17, %s8982_s8 }
  0x75   :  { %p8648_p11 = pnand %p8646_p10, %p8643_p9 }
  0x77   :  { %8651 = shalt.err (!%p8648_p11)
}
  0x78   :  { %s8652_s6 = scalar_lea.vmem %s103_s12, 1024  ;;  %p8657_p13 = scmp.lt.s32.totalorder %s103_s12, %s103_s12 }
  0x79   :  { %p8653_p12 = scmp.ne.s32.totalorder %s103_s12, %s8652_s6  ;;  %p8658_p0 = scmp.lt.s32.totalorder %s8652_s6, %s8652_s6 }
  0x7b   :  { %p8659_p1 = por %p8658_p0, %p8657_p13 }
  0x7d   :  { %p8660_p2 = pnand %p8659_p1, %p8653_p12 }
  0x7f   :  { %8663 = shalt.err (!%p8660_p2)
}
  0x80   :  { %108 = dma.hbm_to_vmem [thread:$0]  %s8982_s8, 1024, %s103_s12, [#allocation13], %s8709_s4, %s8709_s4, %s8710_s28  }
  0x81   :  { %s8664_s24 = scalar_lea.hbm %s8983_s9, 16 }
  0x82   :  { %p8665_p3 = scmp.ne.s32.totalorder %s8983_s9, %s8664_s24  ;;  %p8668_p4 = scmp.lt.u32.totalorder %s8664_s24, %s8983_s9 }
  0x84   :  { %p8670_p5 = pnand %p8668_p4, %p8665_p3 }
  0x86   :  { %8673 = shalt.err (!%p8670_p5)
}
  0x87   :  { %s8674_s5 = scalar_lea.vmem %s116_s15, 16  ;;  %s8678_s16 = scalar_lea.vmem %s116_s15, 32 }
  0x88   :  { %p8675_p6 = scmp.ne.s32.totalorder %s116_s15, %s8674_s5  ;;  %p8679_p7 = scmp.lt.s32.totalorder %s116_s15, %s116_s15 }
  0x89   :  { %p8680_p8 = scmp.lt.s32.totalorder %s8678_s16, %s8674_s5 }
  0x8b   :  { %p8681_p9 = por %p8680_p8, %p8679_p7 }
  0x8d   :  { %p8682_p10 = pnand %p8681_p9, %p8675_p6 }
  0x8f   :  { %8685 = shalt.err (!%p8682_p10)
}
  0x90   :  { %118 = dma.hbm_to_vmem [thread:$0]  %s8983_s9, 16, %s116_s15, [#allocation16]  }
  0x91   :  { %8686 = dma.done.wait [#allocation4], 16  }
  0x92   :  { %8687 = vsyncadd [#allocation4], 4294967280 }
  0x93   :  { %8688 = dma.done.wait [#allocation3], 90112  }
  0x94   :  { %8689 = vsyncadd [#allocation3], 4294877184 }
  0x95   :  { %8690 = dma.done.wait [#allocation7], 8256  }
  0x96   :  { %8691 = vsyncadd [#allocation7], 4294959040 }
  0x97   :  { %8692 = dma.done.wait [#allocation10], 2080  }
  0x98   :  { %8693 = vsyncadd [#allocation10], 4294965216 }
  0x99   :  { %8694 = dma.done.wait [#allocation13], 1040  }
  0x9a   :  { %8695 = vsyncadd [#allocation13], 4294966256 }
  0x9b   :  { %8696 = dma.done.wait [#allocation16], 16  }
  0x9c   :  { %8697 = vsyncadd [#allocation16], 4294967280 }
  0x9d   :  { %146 = sfence }
  0x9e   :  { %v7291_v0 = vld [vmem:[#allocation5 + $0x4] ss:$16 sps:$4 sm:$0xff]   ;;  %v7293_v1 = vld [vmem:[#allocation5 + $0xc] ss:$16 sps:$4 sm:$0xff]   ;;  %v7295_v2 = vld [vmem:[#allocation5] ss:$16 sps:$4 sm:$0xff]  }
  0x9f   :  { %4526 = vmatprep.subr.bf16.mxu0 %v7291_v0  ;;  %v7296_v3 = vld [vmem:[#allocation5 + $0x8] ss:$16 sps:$4 sm:$0xff]   ;;  %4999 = vmatprep.subr.bf16.mxu1 %v7293_v1  ;;  %v7297_v4 = vld [vmem:[#allocation5 + $0x24] ss:$16 sps:$4 sm:$0xff]   ;;  %v7299_v5 = vld [vmem:[#allocation5 + $0x2c] ss:$16 sps:$4 sm:$0xff]  }
  0xa0   :  { %4527 = vmatpush1.bf16.msra.mxu0 %v7295_v2  ;;  %5000 = vmatpush1.bf16.msra.mxu1 %v7296_v3  ;;  %v7301_v6 = vld [vmem:[#allocation5 + $0x20] ss:$16 sps:$4 sm:$0xff]   ;;  %v7302_v7 = vld [vmem:[#allocation5 + $0x28] ss:$16 sps:$4 sm:$0xff]   ;;  %v7303_v8 = vld [vmem:[#allocation5 + $0x44] ss:$16 sps:$4 sm:$0xff]  }
  0xa1   :  { %4528 = vmatprep.subr.bf16.mxu0 %v7297_v4  ;;  %5001 = vmatprep.subr.bf16.mxu1 %v7299_v5  ;;  %v7305_v9 = vld [vmem:[#allocation5 + $0x4c] ss:$16 sps:$4 sm:$0xff]   ;;  %v7307_v10 = vld [vmem:[#allocation5 + $0x40] ss:$16 sps:$4 sm:$0xff]   ;;  %v7308_v11 = vld [vmem:[#allocation5 + $0x48] ss:$16 sps:$4 sm:$0xff]  }
  0xa2   :  { %v7309_v12 = vld [vmem:[#allocation5 + $0x64] ss:$16 sps:$4 sm:$0xff]   ;;  %v7311_v13 = vld [vmem:[#allocation5 + $0x6c] ss:$16 sps:$4 sm:$0xff]   ;;  %v7313_v14 = vld [vmem:[#allocation5 + $0x60] ss:$16 sps:$4 sm:$0xff]  }
  0xa3   :  { %v7314_v15 = vld [vmem:[#allocation5 + $0x68] ss:$16 sps:$4 sm:$0xff]   ;;  %v7315_v16 = vld [vmem:[#allocation5 + $0x84] ss:$16 sps:$4 sm:$0xff]   ;;  %v7317_v17 = vld [vmem:[#allocation5 + $0x8c] ss:$16 sps:$4 sm:$0xff]  }
  0xa4   :  { %4529 = vmatpush1.bf16.msra.mxu0 %v7301_v6  ;;  %5002 = vmatpush1.bf16.msra.mxu1 %v7302_v7  ;;  %v7319_v18 = vld [vmem:[#allocation5 + $0x80] ss:$16 sps:$4 sm:$0xff]   ;;  %v7320_v19 = vld [vmem:[#allocation5 + $0x88] ss:$16 sps:$4 sm:$0xff]   ;;  %v7321_v20 = vld [vmem:[#allocation5 + $0xa4] ss:$16 sps:$4 sm:$0xff]  }
  0xa5   :  { %4530 = vmatprep.subr.bf16.mxu0 %v7303_v8  ;;  %5003 = vmatprep.subr.bf16.mxu1 %v7305_v9  ;;  %v7323_v21 = vld [vmem:[#allocation5 + $0xac] ss:$16 sps:$4 sm:$0xff]   ;;  %v7325_v22 = vld [vmem:[#allocation5 + $0xa0] ss:$16 sps:$4 sm:$0xff]   ;;  %v7326_v23 = vld [vmem:[#allocation5 + $0xa8] ss:$16 sps:$4 sm:$0xff]  }
  0xa6   :  { %v7327_v24 = vld [vmem:[#allocation5 + $0xc4] ss:$16 sps:$4 sm:$0xff]   ;;  %v7329_v25 = vld [vmem:[#allocation5 + $0xcc] ss:$16 sps:$4 sm:$0xff]   ;;  %v7331_v26 = vld [vmem:[#allocation5 + $0xc0] ss:$16 sps:$4 sm:$0xff]  }
  0xa7   :  { %v7332_v27 = vld [vmem:[#allocation5 + $0xc8] ss:$16 sps:$4 sm:$0xff]   ;;  %v7333_v28 = vld [vmem:[#allocation5 + $0xe4] ss:$16 sps:$4 sm:$0xff]   ;;  %v7335_v29 = vld [vmem:[#allocation5 + $0xec] ss:$16 sps:$4 sm:$0xff]  }
  0xa8   :  { %4531 = vmatpush1.bf16.msra.mxu0 %v7307_v10  ;;  %5004 = vmatpush1.bf16.msra.mxu1 %v7308_v11  ;;  %v7337_v30 = vld [vmem:[#allocation5 + $0xe0] ss:$16 sps:$4 sm:$0xff]   ;;  %v7338_v31 = vld [vmem:[#allocation5 + $0xe8] ss:$16 sps:$4 sm:$0xff]   ;;  %v7339_v32 = vld [vmem:[#allocation5 + $0x104] ss:$16 sps:$4 sm:$0xff]  }
  0xa9   :  { %4532 = vmatprep.subr.bf16.mxu0 %v7309_v12  ;;  %5005 = vmatprep.subr.bf16.mxu1 %v7311_v13  ;;  %v7341_v33 = vld [vmem:[#allocation5 + $0x10c] ss:$16 sps:$4 sm:$0xff]   ;;  %v7343_v34 = vld [vmem:[#allocation5 + $0x100] ss:$16 sps:$4 sm:$0xff]   ;;  %v7344_v35 = vld [vmem:[#allocation5 + $0x108] ss:$16 sps:$4 sm:$0xff]  }
  0xaa   :  { %v7345_v36 = vld [vmem:[#allocation5 + $0x124] ss:$16 sps:$4 sm:$0xff]   ;;  %v7347_v37 = vld [vmem:[#allocation5 + $0x12c] ss:$16 sps:$4 sm:$0xff]   ;;  %v7349_v38 = vld [vmem:[#allocation5 + $0x120] ss:$16 sps:$4 sm:$0xff]  }
  0xab   :  { %v7350_v39 = vld [vmem:[#allocation5 + $0x128] ss:$16 sps:$4 sm:$0xff]   ;;  %v7351_v40 = vld [vmem:[#allocation5 + $0x144] ss:$16 sps:$4 sm:$0xff]   ;;  %v7353_v41 = vld [vmem:[#allocation5 + $0x14c] ss:$16 sps:$4 sm:$0xff]  }
  0xac   :  { %4533 = vmatpush1.bf16.msra.mxu0 %v7313_v14  ;;  %5006 = vmatpush1.bf16.msra.mxu1 %v7314_v15  ;;  %v7355_v42 = vld [vmem:[#allocation5 + $0x140] ss:$16 sps:$4 sm:$0xff]   ;;  %v7356_v43 = vld [vmem:[#allocation5 + $0x148] ss:$16 sps:$4 sm:$0xff]   ;;  %v7357_v44 = vld [vmem:[#allocation5 + $0x164] ss:$16 sps:$4 sm:$0xff]  }
  0xad   :  { %4534 = vmatprep.subr.bf16.mxu0 %v7315_v16  ;;  %5007 = vmatprep.subr.bf16.mxu1 %v7317_v17  ;;  %v7359_v45 = vld [vmem:[#allocation5 + $0x16c] ss:$16 sps:$4 sm:$0xff]   ;;  %v7361_v46 = vld [vmem:[#allocation5 + $0x160] ss:$16 sps:$4 sm:$0xff]   ;;  %v7362_v47 = vld [vmem:[#allocation5 + $0x168] ss:$16 sps:$4 sm:$0xff]  }
  0xae   :  { %v7389_v48 = vld [vmem:[%s8975_s1 + $0x4] ss:$88 sps:$4 sm:$0xff]   ;;  %v7367_v51 = vld [vmem:[#allocation5 + $0x180] ss:$16 sps:$4 sm:$0xff]   ;;  %v7368_v52 = vld [vmem:[#allocation5 + $0x188] ss:$16 sps:$4 sm:$0xff]  }
  0xaf   :  { %v7363_v49 = vld [vmem:[#allocation5 + $0x184] ss:$16 sps:$4 sm:$0xff]   ;;  %v7365_v50 = vld [vmem:[#allocation5 + $0x18c] ss:$16 sps:$4 sm:$0xff]   ;;  %4558 = vmatprep.mubr.bf16.mxu0 %v7389_v48  ;;  %5031 = vmatprep.mubr.bf16.mxu1 %v7389_v48  ;;  %v7373_v55 = vld [vmem:[#allocation5 + $0x1a0] ss:$16 sps:$4 sm:$0xff]  }
  0xb0   :  { %4535 = vmatpush1.bf16.msra.mxu0 %v7319_v18  ;;  %5008 = vmatpush1.bf16.msra.mxu1 %v7320_v19  ;;  %v7369_v53 = vld [vmem:[#allocation5 + $0x1a4] ss:$16 sps:$4 sm:$0xff]   ;;  %v7371_v54 = vld [vmem:[#allocation5 + $0x1ac] ss:$16 sps:$4 sm:$0xff]   ;;  %v7374_v56 = vld [vmem:[#allocation5 + $0x1a8] ss:$16 sps:$4 sm:$0xff]  }
  0xb1   :  { %4536 = vmatprep.subr.bf16.mxu0 %v7321_v20  ;;  %5009 = vmatprep.subr.bf16.mxu1 %v7323_v21  ;;  %v7375_v57 = vld [vmem:[#allocation5 + $0x1c4] ss:$16 sps:$4 sm:$0xff]   ;;  %v7377_v58 = vld [vmem:[#allocation5 + $0x1cc] ss:$16 sps:$4 sm:$0xff]   ;;  %v7379_v59 = vld [vmem:[#allocation5 + $0x1c0] ss:$16 sps:$4 sm:$0xff]  }
  0xb2   :  { %v7380_v60 = vld [vmem:[#allocation5 + $0x1c8] ss:$16 sps:$4 sm:$0xff]   ;;  %v7381_v61 = vld [vmem:[#allocation5 + $0x1e4] ss:$16 sps:$4 sm:$0xff]   ;;  %v7383_v62 = vld [vmem:[#allocation5 + $0x1ec] ss:$16 sps:$4 sm:$0xff]  }
  0xb3   :  { %v7385_v63 = vld [vmem:[#allocation5 + $0x1e0] ss:$16 sps:$4 sm:$0xff]   ;;  %v7386_v0 = vld [vmem:[#allocation5 + $0x1e8] ss:$16 sps:$4 sm:$0xff]   ;;  %v7392_v1 = vld [vmem:[#allocation5 + $0x204] ss:$16 sps:$4 sm:$0xff]  }
  0xb4   :  { %4537 = vmatpush1.bf16.msra.mxu0 %v7325_v22  ;;  %5010 = vmatpush1.bf16.msra.mxu1 %v7326_v23  ;;  %v7395_v2 = vld [vmem:[#allocation5 + $0x20c] ss:$16 sps:$4 sm:$0xff]   ;;  %v7387_v3 = vld [vmem:[%s8975_s1] ss:$88 sps:$4 sm:$0xff]   ;;  %v7398_v6 = vld [vmem:[#allocation5 + $0x224] ss:$16 sps:$4 sm:$0xff]  }
  0xb5   :  { %4538 = vmatprep.subr.bf16.mxu0 %v7327_v24  ;;  %5011 = vmatprep.subr.bf16.mxu1 %v7329_v25  ;;  %v7390_v4 = vld [vmem:[#allocation5 + $0x200] ss:$16 sps:$4 sm:$0xff]   ;;  %v7393_v5 = vld [vmem:[#allocation5 + $0x208] ss:$16 sps:$4 sm:$0xff]   ;;  %v7401_v7 = vld [vmem:[#allocation5 + $0x22c] ss:$16 sps:$4 sm:$0xff]  }
  0xb6   :  { %v7396_v8 = vld [vmem:[#allocation5 + $0x220] ss:$16 sps:$4 sm:$0xff]   ;;  %v7399_v9 = vld [vmem:[#allocation5 + $0x228] ss:$16 sps:$4 sm:$0xff]   ;;  %v7404_v10 = vld [vmem:[#allocation5 + $0x244] ss:$16 sps:$4 sm:$0xff]  }
  0xb7   :  { %v7407_v11 = vld [vmem:[#allocation5 + $0x24c] ss:$16 sps:$4 sm:$0xff]   ;;  %v7402_v12 = vld [vmem:[#allocation5 + $0x240] ss:$16 sps:$4 sm:$0xff]   ;;  %v7405_v13 = vld [vmem:[#allocation5 + $0x248] ss:$16 sps:$4 sm:$0xff]  }
  0xb8   :  { %4539 = vmatpush1.bf16.msra.mxu0 %v7331_v26  ;;  %5012 = vmatpush1.bf16.msra.mxu1 %v7332_v27  ;;  %v7410_v14 = vld [vmem:[#allocation5 + $0x264] ss:$16 sps:$4 sm:$0xff]   ;;  %v7413_v15 = vld [vmem:[#allocation5 + $0x26c] ss:$16 sps:$4 sm:$0xff]   ;;  %v7408_v16 = vld [vmem:[#allocation5 + $0x260] ss:$16 sps:$4 sm:$0xff]  }
  0xb9   :  { %4540 = vmatprep.subr.bf16.mxu0 %v7333_v28  ;;  %5013 = vmatprep.subr.bf16.mxu1 %v7335_v29  ;;  %v7411_v17 = vld [vmem:[#allocation5 + $0x268] ss:$16 sps:$4 sm:$0xff]   ;;  %v7416_v18 = vld [vmem:[#allocation5 + $0x284] ss:$16 sps:$4 sm:$0xff]   ;;  %v7419_v19 = vld [vmem:[#allocation5 + $0x28c] ss:$16 sps:$4 sm:$0xff]  }
  0xba   :  { %v7414_v20 = vld [vmem:[#allocation5 + $0x280] ss:$16 sps:$4 sm:$0xff]   ;;  %v7417_v21 = vld [vmem:[#allocation5 + $0x288] ss:$16 sps:$4 sm:$0xff]   ;;  %v7422_v22 = vld [vmem:[#allocation5 + $0x2a4] ss:$16 sps:$4 sm:$0xff]  }
  0xbb   :  { %v7425_v23 = vld [vmem:[#allocation5 + $0x2ac] ss:$16 sps:$4 sm:$0xff]   ;;  %v7420_v24 = vld [vmem:[#allocation5 + $0x2a0] ss:$16 sps:$4 sm:$0xff]   ;;  %v7423_v25 = vld [vmem:[#allocation5 + $0x2a8] ss:$16 sps:$4 sm:$0xff]  }
  0xbc   :  { %4541 = vmatpush1.bf16.msra.mxu0 %v7337_v30  ;;  %5014 = vmatpush1.bf16.msra.mxu1 %v7338_v31  ;;  %v7428_v26 = vld [vmem:[#allocation5 + $0x2c4] ss:$16 sps:$4 sm:$0xff]   ;;  %v7431_v27 = vld [vmem:[#allocation5 + $0x2cc] ss:$16 sps:$4 sm:$0xff]   ;;  %v7426_v28 = vld [vmem:[#allocation5 + $0x2c0] ss:$16 sps:$4 sm:$0xff]  }
  0xbd   :  { %4542 = vmatprep.subr.bf16.mxu0 %v7339_v32  ;;  %5015 = vmatprep.subr.bf16.mxu1 %v7341_v33  ;;  %v7429_v29 = vld [vmem:[#allocation5 + $0x2c8] ss:$16 sps:$4 sm:$0xff]   ;;  %v7488_v30 = vld [vmem:[%s8975_s1 + $0xc] ss:$88 sps:$4 sm:$0xff]   ;;  %v7432_v33 = vld [vmem:[#allocation5 + $0x2e0] ss:$16 sps:$4 sm:$0xff]  }
  0xbe   :  { %v7434_v31 = vld [vmem:[#allocation5 + $0x2e4] ss:$16 sps:$4 sm:$0xff]   ;;  %v7437_v32 = vld [vmem:[#allocation5 + $0x2ec] ss:$16 sps:$4 sm:$0xff]   ;;  %s7099_s6 = sld [smem:[#allocation2 + $0x1]]  ;;  %vm8714_vm12 = vmmov 0  }
  0xbf   :  { %v7461_v48 = vld [vmem:[#allocation5 + $0x36c] ss:$16 sps:$4 sm:$0xff]   ;;  %s7117_s7 = sld [smem:[#allocation2 + $0x2]] }
  0xc0   :  { %4543 = vmatpush1.bf16.msra.mxu0 %v7343_v34  ;;  %5016 = vmatpush1.bf16.msra.mxu1 %v7344_v35  ;;  %v7435_v34 = vld [vmem:[#allocation5 + $0x2e8] ss:$16 sps:$4 sm:$0xff]   ;;  %v7440_v35 = vld [vmem:[#allocation5 + $0x304] ss:$16 sps:$4 sm:$0xff]  }
  0xc1   :  { %4544 = vmatprep.subr.bf16.mxu0 %v7345_v36  ;;  %5017 = vmatprep.subr.bf16.mxu1 %v7347_v37  ;;  %v7443_v36 = vld [vmem:[#allocation5 + $0x30c] ss:$16 sps:$4 sm:$0xff]   ;;  %v7438_v37 = vld [vmem:[#allocation5 + $0x300] ss:$16 sps:$4 sm:$0xff]  }
  0xc4   :  { %4545 = vmatpush1.bf16.msra.mxu0 %v7349_v38  ;;  %5018 = vmatpush1.bf16.msra.mxu1 %v7350_v39  ;;  %v7441_v38 = vld [vmem:[#allocation5 + $0x308] ss:$16 sps:$4 sm:$0xff]   ;;  %v7446_v39 = vld [vmem:[#allocation5 + $0x324] ss:$16 sps:$4 sm:$0xff]  }
  0xc5   :  { %4546 = vmatprep.subr.bf16.mxu0 %v7351_v40  ;;  %5019 = vmatprep.subr.bf16.mxu1 %v7353_v41  ;;  %v7449_v40 = vld [vmem:[#allocation5 + $0x32c] ss:$16 sps:$4 sm:$0xff]   ;;  %v7444_v41 = vld [vmem:[#allocation5 + $0x320] ss:$16 sps:$4 sm:$0xff]  }
  0xc8   :  { %4547 = vmatpush1.bf16.msra.mxu0 %v7355_v42  ;;  %5020 = vmatpush1.bf16.msra.mxu1 %v7356_v43  ;;  %v7447_v42 = vld [vmem:[#allocation5 + $0x328] ss:$16 sps:$4 sm:$0xff]   ;;  %v7452_v43 = vld [vmem:[#allocation5 + $0x344] ss:$16 sps:$4 sm:$0xff]  }
  0xc9   :  { %4548 = vmatprep.subr.bf16.mxu0 %v7357_v44  ;;  %5021 = vmatprep.subr.bf16.mxu1 %v7359_v45  ;;  %v7455_v44 = vld [vmem:[#allocation5 + $0x34c] ss:$16 sps:$4 sm:$0xff]   ;;  %v7450_v45 = vld [vmem:[#allocation5 + $0x340] ss:$16 sps:$4 sm:$0xff]  }
  0xcc   :  { %4549 = vmatpush1.bf16.msra.mxu0 %v7361_v46  ;;  %5022 = vmatpush1.bf16.msra.mxu1 %v7362_v47  ;;  %v7453_v46 = vld [vmem:[#allocation5 + $0x348] ss:$16 sps:$4 sm:$0xff]   ;;  %v7458_v47 = vld [vmem:[#allocation5 + $0x364] ss:$16 sps:$4 sm:$0xff]  }
  0xcd   :  { %4550 = vmatprep.subr.bf16.mxu0 %v7363_v49  ;;  %5023 = vmatprep.subr.bf16.mxu1 %v7365_v50  ;;  %v7456_v49 = vld [vmem:[#allocation5 + $0x360] ss:$16 sps:$4 sm:$0xff]   ;;  %v7459_v50 = vld [vmem:[#allocation5 + $0x368] ss:$16 sps:$4 sm:$0xff]  }
  0xd0   :  { %4551 = vmatpush1.bf16.msra.mxu0 %v7367_v51  ;;  %5024 = vmatpush1.bf16.msra.mxu1 %v7368_v52  ;;  %v7464_v51 = vld [vmem:[#allocation5 + $0x384] ss:$16 sps:$4 sm:$0xff]   ;;  %v7467_v52 = vld [vmem:[#allocation5 + $0x38c] ss:$16 sps:$4 sm:$0xff]  }
  0xd1   :  { %4552 = vmatprep.subr.bf16.mxu0 %v7369_v53  ;;  %5025 = vmatprep.subr.bf16.mxu1 %v7371_v54  ;;  %v7462_v53 = vld [vmem:[#allocation5 + $0x380] ss:$16 sps:$4 sm:$0xff]   ;;  %v7465_v54 = vld [vmem:[#allocation5 + $0x388] ss:$16 sps:$4 sm:$0xff]  }
  0xd4   :  { %4553 = vmatpush1.bf16.msra.mxu0 %v7373_v55  ;;  %5026 = vmatpush1.bf16.msra.mxu1 %v7374_v56  ;;  %v7470_v55 = vld [vmem:[#allocation5 + $0x3a4] ss:$16 sps:$4 sm:$0xff]   ;;  %v7473_v56 = vld [vmem:[#allocation5 + $0x3ac] ss:$16 sps:$4 sm:$0xff]  }
  0xd5   :  { %4554 = vmatprep.subr.bf16.mxu0 %v7375_v57  ;;  %5027 = vmatprep.subr.bf16.mxu1 %v7377_v58  ;;  %v7468_v57 = vld [vmem:[#allocation5 + $0x3a0] ss:$16 sps:$4 sm:$0xff]   ;;  %v7471_v58 = vld [vmem:[#allocation5 + $0x3a8] ss:$16 sps:$4 sm:$0xff]  }
  0xd8   :  { %4555 = vmatpush1.bf16.msra.mxu0 %v7379_v59  ;;  %5028 = vmatpush1.bf16.msra.mxu1 %v7380_v60  ;;  %v7476_v59 = vld [vmem:[#allocation5 + $0x3c4] ss:$16 sps:$4 sm:$0xff]   ;;  %v7479_v60 = vld [vmem:[#allocation5 + $0x3cc] ss:$16 sps:$4 sm:$0xff]  }
  0xd9   :  { %4556 = vmatprep.subr.bf16.mxu0 %v7381_v61  ;;  %5029 = vmatprep.subr.bf16.mxu1 %v7383_v62  ;;  %v7474_v61 = vld [vmem:[#allocation5 + $0x3c0] ss:$16 sps:$4 sm:$0xff]   ;;  %v7477_v62 = vld [vmem:[#allocation5 + $0x3c8] ss:$16 sps:$4 sm:$0xff]  }
  0xdc   :  { %4557 = vmatpush1.bf16.msra.mxu0 %v7385_v63  ;;  %5030 = vmatpush1.bf16.msra.mxu1 %v7386_v0  ;;  %v7482_v63 = vld [vmem:[#allocation5 + $0x3e4] ss:$16 sps:$4 sm:$0xff]   ;;  %v7485_v0 = vld [vmem:[#allocation5 + $0x3ec] ss:$16 sps:$4 sm:$0xff]  }
  0xdd   :  { %4569 = vmatprep.subr.bf16.mxu0 %v7392_v1  ;;  %5042 = vmatprep.subr.bf16.mxu1 %v7395_v2  ;;  %v7480_v1 = vld [vmem:[#allocation5 + $0x3e0] ss:$16 sps:$4 sm:$0xff]   ;;  %v7483_v2 = vld [vmem:[#allocation5 + $0x3e8] ss:$16 sps:$4 sm:$0xff]  }
  0xdf   :  { %4559 = vmatmul.mubr.bf16.vlgmr.msra.gmra.mrb[0].mxu0 %v7387_v3  ;;  %5032 = vmatmul.mubr.bf16.vlgmr.msra.gmra.mrb[0].mxu1 %v7387_v3  ;;  %v7491_v3 = vld [vmem:[#allocation5 + $0x404] ss:$16 sps:$4 sm:$0xff]  }
  0xe0   :  { %4570 = vmatpush1.bf16.msra.mxu0 %v7390_v4  ;;  %5043 = vmatpush1.bf16.msra.mxu1 %v7393_v5  ;;  %v7494_v4 = vld [vmem:[#allocation5 + $0x40c] ss:$16 sps:$4 sm:$0xff]   ;;  %v7486_v5 = vld [vmem:[%s8975_s1 + $0x8] ss:$88 sps:$4 sm:$0xff]  }
  0xe1   :  { %4571 = vmatprep.subr.bf16.mxu0 %v7398_v6  ;;  %5044 = vmatprep.subr.bf16.mxu1 %v7401_v7  ;;  %v7489_v6 = vld [vmem:[#allocation5 + $0x400] ss:$16 sps:$4 sm:$0xff]   ;;  %v7492_v7 = vld [vmem:[#allocation5 + $0x408] ss:$16 sps:$4 sm:$0xff]  }
  0xe2   :  { %4601 = vmatprep.mubr.bf16.mxu0 %v7488_v30  ;;  %5074 = vmatprep.mubr.bf16.mxu1 %v7488_v30  ;;  %v7530_v30 = vld [vmem:[#allocation5 + $0x4cc] ss:$16 sps:$4 sm:$0xff]  }
  0xe4   :  { %4572 = vmatpush1.bf16.msra.mxu0 %v7396_v8  ;;  %5045 = vmatpush1.bf16.msra.mxu1 %v7399_v9  ;;  %v7497_v8 = vld [vmem:[#allocation5 + $0x424] ss:$16 sps:$4 sm:$0xff]   ;;  %v7500_v9 = vld [vmem:[#allocation5 + $0x42c] ss:$16 sps:$4 sm:$0xff]  }
  0xe5   :  { %4573 = vmatprep.subr.bf16.mxu0 %v7404_v10  ;;  %5046 = vmatprep.subr.bf16.mxu1 %v7407_v11  ;;  %v7495_v10 = vld [vmem:[#allocation5 + $0x420] ss:$16 sps:$4 sm:$0xff]   ;;  %v7498_v11 = vld [vmem:[#allocation5 + $0x428] ss:$16 sps:$4 sm:$0xff]  }
  0xe8   :  { %4574 = vmatpush1.bf16.msra.mxu0 %v7402_v12  ;;  %5047 = vmatpush1.bf16.msra.mxu1 %v7405_v13  ;;  %v7587_v12 = vld [vmem:[%s8975_s1 + $0x14] ss:$88 sps:$4 sm:$0xff]  }
  0xe9   :  { %4575 = vmatprep.subr.bf16.mxu0 %v7410_v14  ;;  %5048 = vmatprep.subr.bf16.mxu1 %v7413_v15  ;;  %v7503_v13 = vld [vmem:[#allocation5 + $0x444] ss:$16 sps:$4 sm:$0xff]   ;;  %v7506_v14 = vld [vmem:[#allocation5 + $0x44c] ss:$16 sps:$4 sm:$0xff]   ;;  %v7501_v15 = vld [vmem:[#allocation5 + $0x440] ss:$16 sps:$4 sm:$0xff]  }
  0xec   :  { %4576 = vmatpush1.bf16.msra.mxu0 %v7408_v16  ;;  %5049 = vmatpush1.bf16.msra.mxu1 %v7411_v17  ;;  %v7504_v16 = vld [vmem:[#allocation5 + $0x448] ss:$16 sps:$4 sm:$0xff]   ;;  %v7509_v17 = vld [vmem:[#allocation5 + $0x464] ss:$16 sps:$4 sm:$0xff]  }
  0xed   :  { %4577 = vmatprep.subr.bf16.mxu0 %v7416_v18  ;;  %5050 = vmatprep.subr.bf16.mxu1 %v7419_v19  ;;  %v7512_v18 = vld [vmem:[#allocation5 + $0x46c] ss:$16 sps:$4 sm:$0xff]   ;;  %v7507_v19 = vld [vmem:[#allocation5 + $0x460] ss:$16 sps:$4 sm:$0xff]  }
  0xf0   :  { %4578 = vmatpush1.bf16.msra.mxu0 %v7414_v20  ;;  %5051 = vmatpush1.bf16.msra.mxu1 %v7417_v21  ;;  %v7510_v20 = vld [vmem:[#allocation5 + $0x468] ss:$16 sps:$4 sm:$0xff]   ;;  %v7515_v21 = vld [vmem:[#allocation5 + $0x484] ss:$16 sps:$4 sm:$0xff]  }
  0xf1   :  { %4579 = vmatprep.subr.bf16.mxu0 %v7422_v22  ;;  %5052 = vmatprep.subr.bf16.mxu1 %v7425_v23  ;;  %v7518_v22 = vld [vmem:[#allocation5 + $0x48c] ss:$16 sps:$4 sm:$0xff]   ;;  %v7513_v23 = vld [vmem:[#allocation5 + $0x480] ss:$16 sps:$4 sm:$0xff]  }
  0xf4   :  { %4580 = vmatpush1.bf16.msra.mxu0 %v7420_v24  ;;  %5053 = vmatpush1.bf16.msra.mxu1 %v7423_v25  ;;  %v7516_v24 = vld [vmem:[#allocation5 + $0x488] ss:$16 sps:$4 sm:$0xff]   ;;  %v7521_v25 = vld [vmem:[#allocation5 + $0x4a4] ss:$16 sps:$4 sm:$0xff]  }
  0xf5   :  { %4581 = vmatprep.subr.bf16.mxu0 %v7428_v26  ;;  %5054 = vmatprep.subr.bf16.mxu1 %v7431_v27  ;;  %v7524_v26 = vld [vmem:[#allocation5 + $0x4ac] ss:$16 sps:$4 sm:$0xff]   ;;  %v7519_v27 = vld [vmem:[#allocation5 + $0x4a0] ss:$16 sps:$4 sm:$0xff]  }
  0xf8   :  { %4582 = vmatpush1.bf16.msra.mxu0 %v7426_v28  ;;  %5055 = vmatpush1.bf16.msra.mxu1 %v7429_v29  ;;  %v7522_v28 = vld [vmem:[#allocation5 + $0x4a8] ss:$16 sps:$4 sm:$0xff]   ;;  %v7527_v29 = vld [vmem:[#allocation5 + $0x4c4] ss:$16 sps:$4 sm:$0xff]  }
  0xf9   :  { %4583 = vmatprep.subr.bf16.mxu0 %v7434_v31  ;;  %5056 = vmatprep.subr.bf16.mxu1 %v7437_v32  ;;  %v7525_v31 = vld [vmem:[#allocation5 + $0x4c0] ss:$16 sps:$4 sm:$0xff]   ;;  %v7528_v32 = vld [vmem:[#allocation5 + $0x4c8] ss:$16 sps:$4 sm:$0xff]  }
  0xfc   :  { %4584 = vmatpush1.bf16.msra.mxu0 %v7432_v33  ;;  %5057 = vmatpush1.bf16.msra.mxu1 %v7435_v34  ;;  %v7533_v33 = vld [vmem:[#allocation5 + $0x4e4] ss:$16 sps:$4 sm:$0xff]   ;;  %v7536_v34 = vld [vmem:[#allocation5 + $0x4ec] ss:$16 sps:$4 sm:$0xff]  }
  0xfd   :  { %4585 = vmatprep.subr.bf16.mxu0 %v7440_v35  ;;  %5058 = vmatprep.subr.bf16.mxu1 %v7443_v36  ;;  %v7531_v35 = vld [vmem:[#allocation5 + $0x4e0] ss:$16 sps:$4 sm:$0xff]   ;;  %v7534_v36 = vld [vmem:[#allocation5 + $0x4e8] ss:$16 sps:$4 sm:$0xff]  }
 0x100   :  { %4586 = vmatpush1.bf16.msra.mxu0 %v7438_v37  ;;  %5059 = vmatpush1.bf16.msra.mxu1 %v7441_v38  ;;  %v7539_v37 = vld [vmem:[#allocation5 + $0x504] ss:$16 sps:$4 sm:$0xff]   ;;  %v7542_v38 = vld [vmem:[#allocation5 + $0x50c] ss:$16 sps:$4 sm:$0xff]  }
 0x101   :  { %4587 = vmatprep.subr.bf16.mxu0 %v7446_v39  ;;  %5060 = vmatprep.subr.bf16.mxu1 %v7449_v40  ;;  %v7537_v39 = vld [vmem:[#allocation5 + $0x500] ss:$16 sps:$4 sm:$0xff]   ;;  %v7540_v40 = vld [vmem:[#allocation5 + $0x508] ss:$16 sps:$4 sm:$0xff]  }
 0x104   :  { %4588 = vmatpush1.bf16.msra.mxu0 %v7444_v41  ;;  %5061 = vmatpush1.bf16.msra.mxu1 %v7447_v42  ;;  %v7545_v41 = vld [vmem:[#allocation5 + $0x524] ss:$16 sps:$4 sm:$0xff]   ;;  %v7548_v42 = vld [vmem:[#allocation5 + $0x52c] ss:$16 sps:$4 sm:$0xff]  }
 0x105   :  { %4589 = vmatprep.subr.bf16.mxu0 %v7452_v43  ;;  %5062 = vmatprep.subr.bf16.mxu1 %v7455_v44  ;;  %v7543_v43 = vld [vmem:[#allocation5 + $0x520] ss:$16 sps:$4 sm:$0xff]   ;;  %v7546_v44 = vld [vmem:[#allocation5 + $0x528] ss:$16 sps:$4 sm:$0xff]  }
 0x108   :  { %4590 = vmatpush1.bf16.msra.mxu0 %v7450_v45  ;;  %5063 = vmatpush1.bf16.msra.mxu1 %v7453_v46  ;;  %v7551_v45 = vld [vmem:[#allocation5 + $0x544] ss:$16 sps:$4 sm:$0xff]   ;;  %v7554_v46 = vld [vmem:[#allocation5 + $0x54c] ss:$16 sps:$4 sm:$0xff]  }
 0x109   :  { %4591 = vmatprep.subr.bf16.mxu0 %v7458_v47  ;;  %5064 = vmatprep.subr.bf16.mxu1 %v7461_v48  ;;  %v7549_v47 = vld [vmem:[#allocation5 + $0x540] ss:$16 sps:$4 sm:$0xff]   ;;  %v7552_v48 = vld [vmem:[#allocation5 + $0x548] ss:$16 sps:$4 sm:$0xff]  }
 0x10c   :  { %4592 = vmatpush1.bf16.msra.mxu0 %v7456_v49  ;;  %5065 = vmatpush1.bf16.msra.mxu1 %v7459_v50  ;;  %v7557_v49 = vld [vmem:[#allocation5 + $0x564] ss:$16 sps:$4 sm:$0xff]   ;;  %v7560_v50 = vld [vmem:[#allocation5 + $0x56c] ss:$16 sps:$4 sm:$0xff]  }
 0x10d   :  { %4593 = vmatprep.subr.bf16.mxu0 %v7464_v51  ;;  %5066 = vmatprep.subr.bf16.mxu1 %v7467_v52  ;;  %v7555_v51 = vld [vmem:[#allocation5 + $0x560] ss:$16 sps:$4 sm:$0xff]   ;;  %v7558_v52 = vld [vmem:[#allocation5 + $0x568] ss:$16 sps:$4 sm:$0xff]  }
 0x110   :  { %4594 = vmatpush1.bf16.msra.mxu0 %v7462_v53  ;;  %5067 = vmatpush1.bf16.msra.mxu1 %v7465_v54  ;;  %v7563_v53 = vld [vmem:[#allocation5 + $0x584] ss:$16 sps:$4 sm:$0xff]   ;;  %v7566_v54 = vld [vmem:[#allocation5 + $0x58c] ss:$16 sps:$4 sm:$0xff]  }
 0x111   :  { %4595 = vmatprep.subr.bf16.mxu0 %v7470_v55  ;;  %5068 = vmatprep.subr.bf16.mxu1 %v7473_v56  ;;  %v7561_v55 = vld [vmem:[#allocation5 + $0x580] ss:$16 sps:$4 sm:$0xff]   ;;  %v7564_v56 = vld [vmem:[#allocation5 + $0x588] ss:$16 sps:$4 sm:$0xff]  }
 0x114   :  { %4596 = vmatpush1.bf16.msra.mxu0 %v7468_v57  ;;  %5069 = vmatpush1.bf16.msra.mxu1 %v7471_v58  ;;  %v7569_v57 = vld [vmem:[#allocation5 + $0x5a4] ss:$16 sps:$4 sm:$0xff]   ;;  %v7572_v58 = vld [vmem:[#allocation5 + $0x5ac] ss:$16 sps:$4 sm:$0xff]  }
 0x115   :  { %4597 = vmatprep.subr.bf16.mxu0 %v7476_v59  ;;  %5070 = vmatprep.subr.bf16.mxu1 %v7479_v60  ;;  %v7567_v59 = vld [vmem:[#allocation5 + $0x5a0] ss:$16 sps:$4 sm:$0xff]   ;;  %v7570_v60 = vld [vmem:[#allocation5 + $0x5a8] ss:$16 sps:$4 sm:$0xff]  }
 0x118   :  { %4598 = vmatpush1.bf16.msra.mxu0 %v7474_v61  ;;  %5071 = vmatpush1.bf16.msra.mxu1 %v7477_v62  ;;  %v7575_v61 = vld [vmem:[#allocation5 + $0x5c4] ss:$16 sps:$4 sm:$0xff]   ;;  %v7578_v62 = vld [vmem:[#allocation5 + $0x5cc] ss:$16 sps:$4 sm:$0xff]  }
 0x119   :  { %4599 = vmatprep.subr.bf16.mxu0 %v7482_v63  ;;  %5072 = vmatprep.subr.bf16.mxu1 %v7485_v0  ;;  %v7573_v63 = vld [vmem:[#allocation5 + $0x5c0] ss:$16 sps:$4 sm:$0xff]   ;;  %v7576_v0 = vld [vmem:[#allocation5 + $0x5c8] ss:$16 sps:$4 sm:$0xff]  }
 0x11c   :  { %4600 = vmatpush1.bf16.msra.mxu0 %v7480_v1  ;;  %5073 = vmatpush1.bf16.msra.mxu1 %v7483_v2  ;;  %v7581_v1 = vld [vmem:[#allocation5 + $0x5e4] ss:$16 sps:$4 sm:$0xff]   ;;  %v7584_v2 = vld [vmem:[#allocation5 + $0x5ec] ss:$16 sps:$4 sm:$0xff]  }
 0x11d   :  { %4612 = vmatprep.subr.bf16.mxu0 %v7491_v3  ;;  %5085 = vmatprep.subr.bf16.mxu1 %v7494_v4  ;;  %v7579_v3 = vld [vmem:[#allocation5 + $0x5e0] ss:$16 sps:$4 sm:$0xff]   ;;  %v7582_v4 = vld [vmem:[#allocation5 + $0x5e8] ss:$16 sps:$4 sm:$0xff]  }
 0x11f   :  { %4602 = vmatmul.mubr.bf16.vlgmr.msra.gmra.mrb[0].mxu0 %v7486_v5  ;;  %5075 = vmatmul.mubr.bf16.vlgmr.msra.gmra.mrb[0].mxu1 %v7486_v5  ;;  %v7590_v5 = vld [vmem:[#allocation5 + $0x604] ss:$16 sps:$4 sm:$0xff]  }
 0x120   :  { %4613 = vmatpush1.bf16.msra.mxu0 %v7489_v6  ;;  %5086 = vmatpush1.bf16.msra.mxu1 %v7492_v7  ;;  %v7593_v6 = vld [vmem:[#allocation5 + $0x60c] ss:$16 sps:$4 sm:$0xff]   ;;  %v7585_v7 = vld [vmem:[%s8975_s1 + $0x10] ss:$88 sps:$4 sm:$0xff]  }
 0x121   :  { %4614 = vmatprep.subr.bf16.mxu0 %v7497_v8  ;;  %5087 = vmatprep.subr.bf16.mxu1 %v7500_v9  ;;  %v7588_v8 = vld [vmem:[#allocation5 + $0x600] ss:$16 sps:$4 sm:$0xff]   ;;  %v7591_v9 = vld [vmem:[#allocation5 + $0x608] ss:$16 sps:$4 sm:$0xff]  }
 0x122   :  { %4644 = vmatprep.mubr.bf16.mxu0 %v7587_v12  ;;  %5117 = vmatprep.mubr.bf16.mxu1 %v7587_v12  ;;  %v7686_v12 = vld [vmem:[%s8975_s1 + $0x1c] ss:$88 sps:$4 sm:$0xff]  }
 0x124   :  { %4615 = vmatpush1.bf16.msra.mxu0 %v7495_v10  ;;  %5088 = vmatpush1.bf16.msra.mxu1 %v7498_v11  ;;  %v7596_v10 = vld [vmem:[#allocation5 + $0x624] ss:$16 sps:$4 sm:$0xff]   ;;  %v7599_v11 = vld [vmem:[#allocation5 + $0x62c] ss:$16 sps:$4 sm:$0xff]  }
 0x125   :  { %4616 = vmatprep.subr.bf16.mxu0 %v7503_v13  ;;  %5089 = vmatprep.subr.bf16.mxu1 %v7506_v14  ;;  %v7594_v13 = vld [vmem:[#allocation5 + $0x620] ss:$16 sps:$4 sm:$0xff]   ;;  %v7597_v14 = vld [vmem:[#allocation5 + $0x628] ss:$16 sps:$4 sm:$0xff]  }
 0x128   :  { %4617 = vmatpush1.bf16.msra.mxu0 %v7501_v15  ;;  %5090 = vmatpush1.bf16.msra.mxu1 %v7504_v16  ;;  %v7602_v15 = vld [vmem:[#allocation5 + $0x644] ss:$16 sps:$4 sm:$0xff]   ;;  %v7605_v16 = vld [vmem:[#allocation5 + $0x64c] ss:$16 sps:$4 sm:$0xff]  }
 0x129   :  { %4618 = vmatprep.subr.bf16.mxu0 %v7509_v17  ;;  %5091 = vmatprep.subr.bf16.mxu1 %v7512_v18  ;;  %v7600_v17 = vld [vmem:[#allocation5 + $0x640] ss:$16 sps:$4 sm:$0xff]   ;;  %v7603_v18 = vld [vmem:[#allocation5 + $0x648] ss:$16 sps:$4 sm:$0xff]  }
 0x12c   :  { %4619 = vmatpush1.bf16.msra.mxu0 %v7507_v19  ;;  %5092 = vmatpush1.bf16.msra.mxu1 %v7510_v20  ;;  %v7608_v19 = vld [vmem:[#allocation5 + $0x664] ss:$16 sps:$4 sm:$0xff]   ;;  %v7611_v20 = vld [vmem:[#allocation5 + $0x66c] ss:$16 sps:$4 sm:$0xff]  }
 0x12d   :  { %4620 = vmatprep.subr.bf16.mxu0 %v7515_v21  ;;  %5093 = vmatprep.subr.bf16.mxu1 %v7518_v22  ;;  %v7606_v21 = vld [vmem:[#allocation5 + $0x660] ss:$16 sps:$4 sm:$0xff]   ;;  %v7609_v22 = vld [vmem:[#allocation5 + $0x668] ss:$16 sps:$4 sm:$0xff]  }
 0x130   :  { %4621 = vmatpush1.bf16.msra.mxu0 %v7513_v23  ;;  %5094 = vmatpush1.bf16.msra.mxu1 %v7516_v24  ;;  %v7614_v23 = vld [vmem:[#allocation5 + $0x684] ss:$16 sps:$4 sm:$0xff]   ;;  %v7617_v24 = vld [vmem:[#allocation5 + $0x68c] ss:$16 sps:$4 sm:$0xff]  }
 0x131   :  { %4622 = vmatprep.subr.bf16.mxu0 %v7521_v25  ;;  %5095 = vmatprep.subr.bf16.mxu1 %v7524_v26  ;;  %v7612_v25 = vld [vmem:[#allocation5 + $0x680] ss:$16 sps:$4 sm:$0xff]   ;;  %v7615_v26 = vld [vmem:[#allocation5 + $0x688] ss:$16 sps:$4 sm:$0xff]  }
 0x134   :  { %4623 = vmatpush1.bf16.msra.mxu0 %v7519_v27  ;;  %5096 = vmatpush1.bf16.msra.mxu1 %v7522_v28  ;;  %v7620_v27 = vld [vmem:[#allocation5 + $0x6a4] ss:$16 sps:$4 sm:$0xff]   ;;  %v7623_v28 = vld [vmem:[#allocation5 + $0x6ac] ss:$16 sps:$4 sm:$0xff]  }
 0x135   :  { %4624 = vmatprep.subr.bf16.mxu0 %v7527_v29  ;;  %5097 = vmatprep.subr.bf16.mxu1 %v7530_v30  ;;  %v7618_v29 = vld [vmem:[#allocation5 + $0x6a0] ss:$16 sps:$4 sm:$0xff]   ;;  %v7621_v30 = vld [vmem:[#allocation5 + $0x6a8] ss:$16 sps:$4 sm:$0xff]  }
 0x138   :  { %4625 = vmatpush1.bf16.msra.mxu0 %v7525_v31  ;;  %5098 = vmatpush1.bf16.msra.mxu1 %v7528_v32  ;;  %v7626_v31 = vld [vmem:[#allocation5 + $0x6c4] ss:$16 sps:$4 sm:$0xff]   ;;  %v7629_v32 = vld [vmem:[#allocation5 + $0x6cc] ss:$16 sps:$4 sm:$0xff]  }
 0x139   :  { %4626 = vmatprep.subr.bf16.mxu0 %v7533_v33  ;;  %5099 = vmatprep.subr.bf16.mxu1 %v7536_v34  ;;  %v7624_v33 = vld [vmem:[#allocation5 + $0x6c0] ss:$16 sps:$4 sm:$0xff]   ;;  %v7627_v34 = vld [vmem:[#allocation5 + $0x6c8] ss:$16 sps:$4 sm:$0xff]  }
 0x13c   :  { %4627 = vmatpush1.bf16.msra.mxu0 %v7531_v35  ;;  %5100 = vmatpush1.bf16.msra.mxu1 %v7534_v36  ;;  %v7632_v35 = vld [vmem:[#allocation5 + $0x6e4] ss:$16 sps:$4 sm:$0xff]   ;;  %v7635_v36 = vld [vmem:[#allocation5 + $0x6ec] ss:$16 sps:$4 sm:$0xff]  }
 0x13d   :  { %4628 = vmatprep.subr.bf16.mxu0 %v7539_v37  ;;  %5101 = vmatprep.subr.bf16.mxu1 %v7542_v38  ;;  %v7630_v37 = vld [vmem:[#allocation5 + $0x6e0] ss:$16 sps:$4 sm:$0xff]   ;;  %v7633_v38 = vld [vmem:[#allocation5 + $0x6e8] ss:$16 sps:$4 sm:$0xff]  }
 0x140   :  { %4629 = vmatpush1.bf16.msra.mxu0 %v7537_v39  ;;  %5102 = vmatpush1.bf16.msra.mxu1 %v7540_v40  ;;  %v7638_v39 = vld [vmem:[#allocation5 + $0x704] ss:$16 sps:$4 sm:$0xff]   ;;  %v7641_v40 = vld [vmem:[#allocation5 + $0x70c] ss:$16 sps:$4 sm:$0xff]  }
 0x141   :  { %4630 = vmatprep.subr.bf16.mxu0 %v7545_v41  ;;  %5103 = vmatprep.subr.bf16.mxu1 %v7548_v42  ;;  %v7636_v41 = vld [vmem:[#allocation5 + $0x700] ss:$16 sps:$4 sm:$0xff]   ;;  %v7639_v42 = vld [vmem:[#allocation5 + $0x708] ss:$16 sps:$4 sm:$0xff]  }
 0x144   :  { %4631 = vmatpush1.bf16.msra.mxu0 %v7543_v43  ;;  %5104 = vmatpush1.bf16.msra.mxu1 %v7546_v44  ;;  %v7644_v43 = vld [vmem:[#allocation5 + $0x724] ss:$16 sps:$4 sm:$0xff]   ;;  %v7647_v44 = vld [vmem:[#allocation5 + $0x72c] ss:$16 sps:$4 sm:$0xff]  }
 0x145   :  { %4632 = vmatprep.subr.bf16.mxu0 %v7551_v45  ;;  %5105 = vmatprep.subr.bf16.mxu1 %v7554_v46  ;;  %v7642_v45 = vld [vmem:[#allocation5 + $0x720] ss:$16 sps:$4 sm:$0xff]   ;;  %v7645_v46 = vld [vmem:[#allocation5 + $0x728] ss:$16 sps:$4 sm:$0xff]  }
 0x148   :  { %4633 = vmatpush1.bf16.msra.mxu0 %v7549_v47  ;;  %5106 = vmatpush1.bf16.msra.mxu1 %v7552_v48  ;;  %v7650_v47 = vld [vmem:[#allocation5 + $0x744] ss:$16 sps:$4 sm:$0xff]   ;;  %v7653_v48 = vld [vmem:[#allocation5 + $0x74c] ss:$16 sps:$4 sm:$0xff]  }
 0x149   :  { %4634 = vmatprep.subr.bf16.mxu0 %v7557_v49  ;;  %5107 = vmatprep.subr.bf16.mxu1 %v7560_v50  ;;  %v7648_v49 = vld [vmem:[#allocation5 + $0x740] ss:$16 sps:$4 sm:$0xff]   ;;  %v7651_v50 = vld [vmem:[#allocation5 + $0x748] ss:$16 sps:$4 sm:$0xff]  }
 0x14c   :  { %4635 = vmatpush1.bf16.msra.mxu0 %v7555_v51  ;;  %5108 = vmatpush1.bf16.msra.mxu1 %v7558_v52  ;;  %v7656_v51 = vld [vmem:[#allocation5 + $0x764] ss:$16 sps:$4 sm:$0xff]   ;;  %v7659_v52 = vld [vmem:[#allocation5 + $0x76c] ss:$16 sps:$4 sm:$0xff]  }
 0x14d   :  { %4636 = vmatprep.subr.bf16.mxu0 %v7563_v53  ;;  %5109 = vmatprep.subr.bf16.mxu1 %v7566_v54  ;;  %v7654_v53 = vld [vmem:[#allocation5 + $0x760] ss:$16 sps:$4 sm:$0xff]   ;;  %v7657_v54 = vld [vmem:[#allocation5 + $0x768] ss:$16 sps:$4 sm:$0xff]  }
 0x150   :  { %4637 = vmatpush1.bf16.msra.mxu0 %v7561_v55  ;;  %5110 = vmatpush1.bf16.msra.mxu1 %v7564_v56  ;;  %v7662_v55 = vld [vmem:[#allocation5 + $0x784] ss:$16 sps:$4 sm:$0xff]   ;;  %v7665_v56 = vld [vmem:[#allocation5 + $0x78c] ss:$16 sps:$4 sm:$0xff]  }
 0x151   :  { %4638 = vmatprep.subr.bf16.mxu0 %v7569_v57  ;;  %5111 = vmatprep.subr.bf16.mxu1 %v7572_v58  ;;  %v7660_v57 = vld [vmem:[#allocation5 + $0x780] ss:$16 sps:$4 sm:$0xff]   ;;  %v7663_v58 = vld [vmem:[#allocation5 + $0x788] ss:$16 sps:$4 sm:$0xff]  }
 0x154   :  { %4639 = vmatpush1.bf16.msra.mxu0 %v7567_v59  ;;  %5112 = vmatpush1.bf16.msra.mxu1 %v7570_v60  ;;  %v7668_v59 = vld [vmem:[#allocation5 + $0x7a4] ss:$16 sps:$4 sm:$0xff]   ;;  %v7671_v60 = vld [vmem:[#allocation5 + $0x7ac] ss:$16 sps:$4 sm:$0xff]  }
 0x155   :  { %4640 = vmatprep.subr.bf16.mxu0 %v7575_v61  ;;  %5113 = vmatprep.subr.bf16.mxu1 %v7578_v62  ;;  %v7666_v61 = vld [vmem:[#allocation5 + $0x7a0] ss:$16 sps:$4 sm:$0xff]   ;;  %v7669_v62 = vld [vmem:[#allocation5 + $0x7a8] ss:$16 sps:$4 sm:$0xff]  }
 0x158   :  { %4641 = vmatpush1.bf16.msra.mxu0 %v7573_v63  ;;  %5114 = vmatpush1.bf16.msra.mxu1 %v7576_v0  ;;  %v7674_v63 = vld [vmem:[#allocation5 + $0x7c4] ss:$16 sps:$4 sm:$0xff]   ;;  %v7677_v0 = vld [vmem:[#allocation5 + $0x7cc] ss:$16 sps:$4 sm:$0xff]  }
 0x159   :  { %4642 = vmatprep.subr.bf16.mxu0 %v7581_v1  ;;  %5115 = vmatprep.subr.bf16.mxu1 %v7584_v2  ;;  %v7672_v1 = vld [vmem:[#allocation5 + $0x7c0] ss:$16 sps:$4 sm:$0xff]   ;;  %v7675_v2 = vld [vmem:[#allocation5 + $0x7c8] ss:$16 sps:$4 sm:$0xff]  }
 0x15c   :  { %4643 = vmatpush1.bf16.msra.mxu0 %v7579_v3  ;;  %5116 = vmatpush1.bf16.msra.mxu1 %v7582_v4  ;;  %v7680_v3 = vld [vmem:[#allocation5 + $0x7e4] ss:$16 sps:$4 sm:$0xff]   ;;  %v7683_v4 = vld [vmem:[#allocation5 + $0x7ec] ss:$16 sps:$4 sm:$0xff]  }
 0x15d   :  { %4655 = vmatprep.subr.bf16.mxu0 %v7590_v5  ;;  %5128 = vmatprep.subr.bf16.mxu1 %v7593_v6  ;;  %v7678_v5 = vld [vmem:[#allocation5 + $0x7e0] ss:$16 sps:$4 sm:$0xff]   ;;  %v7681_v6 = vld [vmem:[#allocation5 + $0x7e8] ss:$16 sps:$4 sm:$0xff]  }
 0x15f   :  { %4645 = vmatmul.mubr.bf16.vlgmr.msra.gmra.mrb[0].mxu0 %v7585_v7  ;;  %5118 = vmatmul.mubr.bf16.vlgmr.msra.gmra.mrb[0].mxu1 %v7585_v7  ;;  %v7689_v7 = vld [vmem:[#allocation5 + $0x804] ss:$16 sps:$4 sm:$0xff]  }
 0x160   :  { %4656 = vmatpush1.bf16.msra.mxu0 %v7588_v8  ;;  %5129 = vmatpush1.bf16.msra.mxu1 %v7591_v9  ;;  %v7692_v8 = vld [vmem:[#allocation5 + $0x80c] ss:$16 sps:$4 sm:$0xff]   ;;  %v7684_v9 = vld [vmem:[%s8975_s1 + $0x18] ss:$88 sps:$4 sm:$0xff]  }
 0x161   :  { %4657 = vmatprep.subr.bf16.mxu0 %v7596_v10  ;;  %5130 = vmatprep.subr.bf16.mxu1 %v7599_v11  ;;  %v7687_v10 = vld [vmem:[#allocation5 + $0x800] ss:$16 sps:$4 sm:$0xff]   ;;  %v7690_v11 = vld [vmem:[#allocation5 + $0x808] ss:$16 sps:$4 sm:$0xff]  }
 0x162   :  { %4687 = vmatprep.mubr.bf16.mxu0 %v7686_v12  ;;  %5160 = vmatprep.mubr.bf16.mxu1 %v7686_v12  ;;  %v7695_v12 = vld [vmem:[#allocation5 + $0x824] ss:$16 sps:$4 sm:$0xff]  }
 0x164   :  { %4658 = vmatpush1.bf16.msra.mxu0 %v7594_v13  ;;  %5131 = vmatpush1.bf16.msra.mxu1 %v7597_v14  ;;  %v7698_v13 = vld [vmem:[#allocation5 + $0x82c] ss:$16 sps:$4 sm:$0xff]  }
 0x165   :  { %4659 = vmatprep.subr.bf16.mxu0 %v7602_v15  ;;  %5132 = vmatprep.subr.bf16.mxu1 %v7605_v16  ;;  %v7785_v14 = vld [vmem:[%s8975_s1 + $0x24] ss:$88 sps:$4 sm:$0xff]   ;;  %v7693_v15 = vld [vmem:[#allocation5 + $0x820] ss:$16 sps:$4 sm:$0xff]   ;;  %v7696_v16 = vld [vmem:[#allocation5 + $0x828] ss:$16 sps:$4 sm:$0xff]  }
 0x168   :  { %4660 = vmatpush1.bf16.msra.mxu0 %v7600_v17  ;;  %5133 = vmatpush1.bf16.msra.mxu1 %v7603_v18  ;;  %v7701_v17 = vld [vmem:[#allocation5 + $0x844] ss:$16 sps:$4 sm:$0xff]   ;;  %v7704_v18 = vld [vmem:[#allocation5 + $0x84c] ss:$16 sps:$4 sm:$0xff]  }
 0x169   :  { %4661 = vmatprep.subr.bf16.mxu0 %v7608_v19  ;;  %5134 = vmatprep.subr.bf16.mxu1 %v7611_v20  ;;  %v7699_v19 = vld [vmem:[#allocation5 + $0x840] ss:$16 sps:$4 sm:$0xff]   ;;  %v7702_v20 = vld [vmem:[#allocation5 + $0x848] ss:$16 sps:$4 sm:$0xff]  }
 0x16c   :  { %4662 = vmatpush1.bf16.msra.mxu0 %v7606_v21  ;;  %5135 = vmatpush1.bf16.msra.mxu1 %v7609_v22  ;;  %v7707_v21 = vld [vmem:[#allocation5 + $0x864] ss:$16 sps:$4 sm:$0xff]   ;;  %v7710_v22 = vld [vmem:[#allocation5 + $0x86c] ss:$16 sps:$4 sm:$0xff]  }
 0x16d   :  { %4663 = vmatprep.subr.bf16.mxu0 %v7614_v23  ;;  %5136 = vmatprep.subr.bf16.mxu1 %v7617_v24  ;;  %v7705_v23 = vld [vmem:[#allocation5 + $0x860] ss:$16 sps:$4 sm:$0xff]   ;;  %v7708_v24 = vld [vmem:[#allocation5 + $0x868] ss:$16 sps:$4 sm:$0xff]  }
 0x170   :  { %4664 = vmatpush1.bf16.msra.mxu0 %v7612_v25  ;;  %5137 = vmatpush1.bf16.msra.mxu1 %v7615_v26  ;;  %v7713_v25 = vld [vmem:[#allocation5 + $0x884] ss:$16 sps:$4 sm:$0xff]   ;;  %v7716_v26 = vld [vmem:[#allocation5 + $0x88c] ss:$16 sps:$4 sm:$0xff]  }
 0x171   :  { %4665 = vmatprep.subr.bf16.mxu0 %v7620_v27  ;;  %5138 = vmatprep.subr.bf16.mxu1 %v7623_v28  ;;  %v7711_v27 = vld [vmem:[#allocation5 + $0x880] ss:$16 sps:$4 sm:$0xff]   ;;  %v7714_v28 = vld [vmem:[#allocation5 + $0x888] ss:$16 sps:$4 sm:$0xff]  }
 0x174   :  { %4666 = vmatpush1.bf16.msra.mxu0 %v7618_v29  ;;  %5139 = vmatpush1.bf16.msra.mxu1 %v7621_v30  ;;  %v7719_v29 = vld [vmem:[#allocation5 + $0x8a4] ss:$16 sps:$4 sm:$0xff]   ;;  %v7722_v30 = vld [vmem:[#allocation5 + $0x8ac] ss:$16 sps:$4 sm:$0xff]  }
 0x175   :  { %4667 = vmatprep.subr.bf16.mxu0 %v7626_v31  ;;  %5140 = vmatprep.subr.bf16.mxu1 %v7629_v32  ;;  %v7717_v31 = vld [vmem:[#allocation5 + $0x8a0] ss:$16 sps:$4 sm:$0xff]   ;;  %v7720_v32 = vld [vmem:[#allocation5 + $0x8a8] ss:$16 sps:$4 sm:$0xff]  }
 0x178   :  { %4668 = vmatpush1.bf16.msra.mxu0 %v7624_v33  ;;  %5141 = vmatpush1.bf16.msra.mxu1 %v7627_v34  ;;  %v7725_v33 = vld [vmem:[#allocation5 + $0x8c4] ss:$16 sps:$4 sm:$0xff]   ;;  %v7728_v34 = vld [vmem:[#allocation5 + $0x8cc] ss:$16 sps:$4 sm:$0xff]  }
 0x179   :  { %4669 = vmatprep.subr.bf16.mxu0 %v7632_v35  ;;  %5142 = vmatprep.subr.bf16.mxu1 %v7635_v36  ;;  %v7723_v35 = vld [vmem:[#allocation5 + $0x8c0] ss:$16 sps:$4 sm:$0xff]   ;;  %v7726_v36 = vld [vmem:[#allocation5 + $0x8c8] ss:$16 sps:$4 sm:$0xff]  }
 0x17c   :  { %4670 = vmatpush1.bf16.msra.mxu0 %v7630_v37  ;;  %5143 = vmatpush1.bf16.msra.mxu1 %v7633_v38  ;;  %v7731_v37 = vld [vmem:[#allocation5 + $0x8e4] ss:$16 sps:$4 sm:$0xff]   ;;  %v7734_v38 = vld [vmem:[#allocation5 + $0x8ec] ss:$16 sps:$4 sm:$0xff]  }
 0x17d   :  { %4671 = vmatprep.subr.bf16.mxu0 %v7638_v39  ;;  %5144 = vmatprep.subr.bf16.mxu1 %v7641_v40  ;;  %v7729_v39 = vld [vmem:[#allocation5 + $0x8e0] ss:$16 sps:$4 sm:$0xff]   ;;  %v7732_v40 = vld [vmem:[#allocation5 + $0x8e8] ss:$16 sps:$4 sm:$0xff]  }
 0x180   :  { %4672 = vmatpush1.bf16.msra.mxu0 %v7636_v41  ;;  %5145 = vmatpush1.bf16.msra.mxu1 %v7639_v42  ;;  %v7737_v41 = vld [vmem:[#allocation5 + $0x904] ss:$16 sps:$4 sm:$0xff]   ;;  %v7740_v42 = vld [vmem:[#allocation5 + $0x90c] ss:$16 sps:$4 sm:$0xff]  }
 0x181   :  { %4673 = vmatprep.subr.bf16.mxu0 %v7644_v43  ;;  %5146 = vmatprep.subr.bf16.mxu1 %v7647_v44  ;;  %v7735_v43 = vld [vmem:[#allocation5 + $0x900] ss:$16 sps:$4 sm:$0xff]   ;;  %v7738_v44 = vld [vmem:[#allocation5 + $0x908] ss:$16 sps:$4 sm:$0xff]  }
 0x184   :  { %4674 = vmatpush1.bf16.msra.mxu0 %v7642_v45  ;;  %5147 = vmatpush1.bf16.msra.mxu1 %v7645_v46  ;;  %v7743_v45 = vld [vmem:[#allocation5 + $0x924] ss:$16 sps:$4 sm:$0xff]   ;;  %v7746_v46 = vld [vmem:[#allocation5 + $0x92c] ss:$16 sps:$4 sm:$0xff]  }
 0x185   :  { %4675 = vmatprep.subr.bf16.mxu0 %v7650_v47  ;;  %5148 = vmatprep.subr.bf16.mxu1 %v7653_v48  ;;  %v7741_v47 = vld [vmem:[#allocation5 + $0x920] ss:$16 sps:$4 sm:$0xff]   ;;  %v7744_v48 = vld [vmem:[#allocation5 + $0x928] ss:$16 sps:$4 sm:$0xff]  }
 0x188   :  { %4676 = vmatpush1.bf16.msra.mxu0 %v7648_v49  ;;  %5149 = vmatpush1.bf16.msra.mxu1 %v7651_v50  ;;  %v7749_v49 = vld [vmem:[#allocation5 + $0x944] ss:$16 sps:$4 sm:$0xff]   ;;  %v7752_v50 = vld [vmem:[#allocation5 + $0x94c] ss:$16 sps:$4 sm:$0xff]  }
 0x189   :  { %4677 = vmatprep.subr.bf16.mxu0 %v7656_v51  ;;  %5150 = vmatprep.subr.bf16.mxu1 %v7659_v52  ;;  %v7747_v51 = vld [vmem:[#allocation5 + $0x940] ss:$16 sps:$4 sm:$0xff]   ;;  %v7750_v52 = vld [vmem:[#allocation5 + $0x948] ss:$16 sps:$4 sm:$0xff]  }
 0x18c   :  { %4678 = vmatpush1.bf16.msra.mxu0 %v7654_v53  ;;  %5151 = vmatpush1.bf16.msra.mxu1 %v7657_v54  ;;  %v7755_v53 = vld [vmem:[#allocation5 + $0x964] ss:$16 sps:$4 sm:$0xff]   ;;  %v7758_v54 = vld [vmem:[#allocation5 + $0x96c] ss:$16 sps:$4 sm:$0xff]  }
 0x18d   :  { %4679 = vmatprep.subr.bf16.mxu0 %v7662_v55  ;;  %5152 = vmatprep.subr.bf16.mxu1 %v7665_v56  ;;  %v7753_v55 = vld [vmem:[#allocation5 + $0x960] ss:$16 sps:$4 sm:$0xff]   ;;  %v7756_v56 = vld [vmem:[#allocation5 + $0x968] ss:$16 sps:$4 sm:$0xff]  }
 0x190   :  { %4680 = vmatpush1.bf16.msra.mxu0 %v7660_v57  ;;  %5153 = vmatpush1.bf16.msra.mxu1 %v7663_v58  ;;  %v7761_v57 = vld [vmem:[#allocation5 + $0x984] ss:$16 sps:$4 sm:$0xff]   ;;  %v7764_v58 = vld [vmem:[#allocation5 + $0x98c] ss:$16 sps:$4 sm:$0xff]  }
 0x191   :  { %4681 = vmatprep.subr.bf16.mxu0 %v7668_v59  ;;  %5154 = vmatprep.subr.bf16.mxu1 %v7671_v60  ;;  %v7759_v59 = vld [vmem:[#allocation5 + $0x980] ss:$16 sps:$4 sm:$0xff]   ;;  %v7762_v60 = vld [vmem:[#allocation5 + $0x988] ss:$16 sps:$4 sm:$0xff]  }
 0x194   :  { %4682 = vmatpush1.bf16.msra.mxu0 %v7666_v61  ;;  %5155 = vmatpush1.bf16.msra.mxu1 %v7669_v62  ;;  %v7767_v61 = vld [vmem:[#allocation5 + $0x9a4] ss:$16 sps:$4 sm:$0xff]   ;;  %v7770_v62 = vld [vmem:[#allocation5 + $0x9ac] ss:$16 sps:$4 sm:$0xff]  }
 0x195   :  { %4683 = vmatprep.subr.bf16.mxu0 %v7674_v63  ;;  %5156 = vmatprep.subr.bf16.mxu1 %v7677_v0  ;;  %v7765_v63 = vld [vmem:[#allocation5 + $0x9a0] ss:$16 sps:$4 sm:$0xff]   ;;  %v7768_v0 = vld [vmem:[#allocation5 + $0x9a8] ss:$16 sps:$4 sm:$0xff]  }
 0x198   :  { %4684 = vmatpush1.bf16.msra.mxu0 %v7672_v1  ;;  %5157 = vmatpush1.bf16.msra.mxu1 %v7675_v2  ;;  %v7773_v1 = vld [vmem:[#allocation5 + $0x9c4] ss:$16 sps:$4 sm:$0xff]   ;;  %v7776_v2 = vld [vmem:[#allocation5 + $0x9cc] ss:$16 sps:$4 sm:$0xff]  }
 0x199   :  { %4685 = vmatprep.subr.bf16.mxu0 %v7680_v3  ;;  %5158 = vmatprep.subr.bf16.mxu1 %v7683_v4  ;;  %v7771_v3 = vld [vmem:[#allocation5 + $0x9c0] ss:$16 sps:$4 sm:$0xff]   ;;  %v7774_v4 = vld [vmem:[#allocation5 + $0x9c8] ss:$16 sps:$4 sm:$0xff]  }
 0x19c   :  { %4686 = vmatpush1.bf16.msra.mxu0 %v7678_v5  ;;  %5159 = vmatpush1.bf16.msra.mxu1 %v7681_v6  ;;  %v7779_v5 = vld [vmem:[#allocation5 + $0x9e4] ss:$16 sps:$4 sm:$0xff]   ;;  %v7782_v6 = vld [vmem:[#allocation5 + $0x9ec] ss:$16 sps:$4 sm:$0xff]  }
 0x19d   :  { %4698 = vmatprep.subr.bf16.mxu0 %v7689_v7  ;;  %5171 = vmatprep.subr.bf16.mxu1 %v7692_v8  ;;  %v7777_v7 = vld [vmem:[#allocation5 + $0x9e0] ss:$16 sps:$4 sm:$0xff]   ;;  %v7780_v8 = vld [vmem:[#allocation5 + $0x9e8] ss:$16 sps:$4 sm:$0xff]  }
 0x19f   :  { %4688 = vmatmul.mubr.bf16.vlgmr.msra.gmra.mrb[0].mxu0 %v7684_v9  ;;  %5161 = vmatmul.mubr.bf16.vlgmr.msra.gmra.mrb[0].mxu1 %v7684_v9  ;;  %v7783_v9 = vld [vmem:[%s8975_s1 + $0x20] ss:$88 sps:$4 sm:$0xff]  }
 0x1a0   :  { %4699 = vmatpush1.bf16.msra.mxu0 %v7687_v10  ;;  %5172 = vmatpush1.bf16.msra.mxu1 %v7690_v11  ;;  %v7788_v10 = vld [vmem:[#allocation5 + $0xa04] ss:$16 sps:$4 sm:$0xff]   ;;  %v7791_v11 = vld [vmem:[#allocation5 + $0xa0c] ss:$16 sps:$4 sm:$0xff]  }
 0x1a1   :  { %4700 = vmatprep.subr.bf16.mxu0 %v7695_v12  ;;  %5173 = vmatprep.subr.bf16.mxu1 %v7698_v13  ;;  %v7786_v12 = vld [vmem:[#allocation5 + $0xa00] ss:$16 sps:$4 sm:$0xff]   ;;  %v7789_v13 = vld [vmem:[#allocation5 + $0xa08] ss:$16 sps:$4 sm:$0xff]  }
 0x1a2   :  { %4730 = vmatprep.mubr.bf16.mxu0 %v7785_v14  ;;  %5203 = vmatprep.mubr.bf16.mxu1 %v7785_v14  ;;  %v7794_v14 = vld [vmem:[#allocation5 + $0xa24] ss:$16 sps:$4 sm:$0xff]  }
 0x1a4   :  { %4701 = vmatpush1.bf16.msra.mxu0 %v7693_v15  ;;  %5174 = vmatpush1.bf16.msra.mxu1 %v7696_v16  ;;  %v7797_v15 = vld [vmem:[#allocation5 + $0xa2c] ss:$16 sps:$4 sm:$0xff]  }
 0x1a5   :  { %4702 = vmatprep.subr.bf16.mxu0 %v7701_v17  ;;  %5175 = vmatprep.subr.bf16.mxu1 %v7704_v18  ;;  %v7884_v16 = vld [vmem:[%s8975_s1 + $0x2c] ss:$88 sps:$4 sm:$0xff]   ;;  %v7792_v17 = vld [vmem:[#allocation5 + $0xa20] ss:$16 sps:$4 sm:$0xff]   ;;  %v7795_v18 = vld [vmem:[#allocation5 + $0xa28] ss:$16 sps:$4 sm:$0xff]  }
 0x1a8   :  { %4703 = vmatpush1.bf16.msra.mxu0 %v7699_v19  ;;  %5176 = vmatpush1.bf16.msra.mxu1 %v7702_v20  ;;  %v7800_v19 = vld [vmem:[#allocation5 + $0xa44] ss:$16 sps:$4 sm:$0xff]   ;;  %v7803_v20 = vld [vmem:[#allocation5 + $0xa4c] ss:$16 sps:$4 sm:$0xff]  }
 0x1a9   :  { %4704 = vmatprep.subr.bf16.mxu0 %v7707_v21  ;;  %5177 = vmatprep.subr.bf16.mxu1 %v7710_v22  ;;  %v7798_v21 = vld [vmem:[#allocation5 + $0xa40] ss:$16 sps:$4 sm:$0xff]   ;;  %v7801_v22 = vld [vmem:[#allocation5 + $0xa48] ss:$16 sps:$4 sm:$0xff]  }
 0x1ac   :  { %4705 = vmatpush1.bf16.msra.mxu0 %v7705_v23  ;;  %5178 = vmatpush1.bf16.msra.mxu1 %v7708_v24  ;;  %v7806_v23 = vld [vmem:[#allocation5 + $0xa64] ss:$16 sps:$4 sm:$0xff]   ;;  %v7809_v24 = vld [vmem:[#allocation5 + $0xa6c] ss:$16 sps:$4 sm:$0xff]  }
 0x1ad   :  { %4706 = vmatprep.subr.bf16.mxu0 %v7713_v25  ;;  %5179 = vmatprep.subr.bf16.mxu1 %v7716_v26  ;;  %v7804_v25 = vld [vmem:[#allocation5 + $0xa60] ss:$16 sps:$4 sm:$0xff]   ;;  %v7807_v26 = vld [vmem:[#allocation5 + $0xa68] ss:$16 sps:$4 sm:$0xff]  }
 0x1b0   :  { %4707 = vmatpush1.bf16.msra.mxu0 %v7711_v27  ;;  %5180 = vmatpush1.bf16.msra.mxu1 %v7714_v28  ;;  %v7812_v27 = vld [vmem:[#allocation5 + $0xa84] ss:$16 sps:$4 sm:$0xff]   ;;  %v7815_v28 = vld [vmem:[#allocation5 + $0xa8c] ss:$16 sps:$4 sm:$0xff]  }
 0x1b1   :  { %4708 = vmatprep.subr.bf16.mxu0 %v7719_v29  ;;  %5181 = vmatprep.subr.bf16.mxu1 %v7722_v30  ;;  %v7810_v29 = vld [vmem:[#allocation5 + $0xa80] ss:$16 sps:$4 sm:$0xff]   ;;  %v7813_v30 = vld [vmem:[#allocation5 + $0xa88] ss:$16 sps:$4 sm:$0xff]  }
 0x1b4   :  { %4709 = vmatpush1.bf16.msra.mxu0 %v7717_v31  ;;  %5182 = vmatpush1.bf16.msra.mxu1 %v7720_v32  ;;  %v7818_v31 = vld [vmem:[#allocation5 + $0xaa4] ss:$16 sps:$4 sm:$0xff]   ;;  %v7821_v32 = vld [vmem:[#allocation5 + $0xaac] ss:$16 sps:$4 sm:$0xff]  }
 0x1b5   :  { %4710 = vmatprep.subr.bf16.mxu0 %v7725_v33  ;;  %5183 = vmatprep.subr.bf16.mxu1 %v7728_v34  ;;  %v7816_v33 = vld [vmem:[#allocation5 + $0xaa0] ss:$16 sps:$4 sm:$0xff]   ;;  %v7819_v34 = vld [vmem:[#allocation5 + $0xaa8] ss:$16 sps:$4 sm:$0xff]  }
 0x1b8   :  { %4711 = vmatpush1.bf16.msra.mxu0 %v7723_v35  ;;  %5184 = vmatpush1.bf16.msra.mxu1 %v7726_v36  ;;  %v7824_v35 = vld [vmem:[#allocation5 + $0xac4] ss:$16 sps:$4 sm:$0xff]   ;;  %v7827_v36 = vld [vmem:[#allocation5 + $0xacc] ss:$16 sps:$4 sm:$0xff]  }
 0x1b9   :  { %4712 = vmatprep.subr.bf16.mxu0 %v7731_v37  ;;  %5185 = vmatprep.subr.bf16.mxu1 %v7734_v38  ;;  %v7822_v37 = vld [vmem:[#allocation5 + $0xac0] ss:$16 sps:$4 sm:$0xff]   ;;  %v7825_v38 = vld [vmem:[#allocation5 + $0xac8] ss:$16 sps:$4 sm:$0xff]  }
 0x1bc   :  { %4713 = vmatpush1.bf16.msra.mxu0 %v7729_v39  ;;  %5186 = vmatpush1.bf16.msra.mxu1 %v7732_v40  ;;  %v7830_v39 = vld [vmem:[#allocation5 + $0xae4] ss:$16 sps:$4 sm:$0xff]   ;;  %v7833_v40 = vld [vmem:[#allocation5 + $0xaec] ss:$16 sps:$4 sm:$0xff]  }
 0x1bd   :  { %4714 = vmatprep.subr.bf16.mxu0 %v7737_v41  ;;  %5187 = vmatprep.subr.bf16.mxu1 %v7740_v42  ;;  %v7828_v41 = vld [vmem:[#allocation5 + $0xae0] ss:$16 sps:$4 sm:$0xff]   ;;  %v7831_v42 = vld [vmem:[#allocation5 + $0xae8] ss:$16 sps:$4 sm:$0xff]  }
 0x1c0   :  { %4715 = vmatpush1.bf16.msra.mxu0 %v7735_v43  ;;  %5188 = vmatpush1.bf16.msra.mxu1 %v7738_v44  ;;  %v7836_v43 = vld [vmem:[#allocation5 + $0xb04] ss:$16 sps:$4 sm:$0xff]   ;;  %v7839_v44 = vld [vmem:[#allocation5 + $0xb0c] ss:$16 sps:$4 sm:$0xff]  }
 0x1c1   :  { %4716 = vmatprep.subr.bf16.mxu0 %v7743_v45  ;;  %5189 = vmatprep.subr.bf16.mxu1 %v7746_v46  ;;  %v7834_v45 = vld [vmem:[#allocation5 + $0xb00] ss:$16 sps:$4 sm:$0xff]   ;;  %v7837_v46 = vld [vmem:[#allocation5 + $0xb08] ss:$16 sps:$4 sm:$0xff]  }
 0x1c4   :  { %4717 = vmatpush1.bf16.msra.mxu0 %v7741_v47  ;;  %5190 = vmatpush1.bf16.msra.mxu1 %v7744_v48  ;;  %v7842_v47 = vld [vmem:[#allocation5 + $0xb24] ss:$16 sps:$4 sm:$0xff]   ;;  %v7845_v48 = vld [vmem:[#allocation5 + $0xb2c] ss:$16 sps:$4 sm:$0xff]  }
 0x1c5   :  { %4718 = vmatprep.subr.bf16.mxu0 %v7749_v49  ;;  %5191 = vmatprep.subr.bf16.mxu1 %v7752_v50  ;;  %v7840_v49 = vld [vmem:[#allocation5 + $0xb20] ss:$16 sps:$4 sm:$0xff]   ;;  %v7843_v50 = vld [vmem:[#allocation5 + $0xb28] ss:$16 sps:$4 sm:$0xff]  }
 0x1c8   :  { %4719 = vmatpush1.bf16.msra.mxu0 %v7747_v51  ;;  %5192 = vmatpush1.bf16.msra.mxu1 %v7750_v52  ;;  %v7848_v51 = vld [vmem:[#allocation5 + $0xb44] ss:$16 sps:$4 sm:$0xff]   ;;  %v7851_v52 = vld [vmem:[#allocation5 + $0xb4c] ss:$16 sps:$4 sm:$0xff]  }
 0x1c9   :  { %4720 = vmatprep.subr.bf16.mxu0 %v7755_v53  ;;  %5193 = vmatprep.subr.bf16.mxu1 %v7758_v54  ;;  %v7846_v53 = vld [vmem:[#allocation5 + $0xb40] ss:$16 sps:$4 sm:$0xff]   ;;  %v7849_v54 = vld [vmem:[#allocation5 + $0xb48] ss:$16 sps:$4 sm:$0xff]  }
 0x1cc   :  { %4721 = vmatpush1.bf16.msra.mxu0 %v7753_v55  ;;  %5194 = vmatpush1.bf16.msra.mxu1 %v7756_v56  ;;  %v7854_v55 = vld [vmem:[#allocation5 + $0xb64] ss:$16 sps:$4 sm:$0xff]   ;;  %v7857_v56 = vld [vmem:[#allocation5 + $0xb6c] ss:$16 sps:$4 sm:$0xff]  }
 0x1cd   :  { %4722 = vmatprep.subr.bf16.mxu0 %v7761_v57  ;;  %5195 = vmatprep.subr.bf16.mxu1 %v7764_v58  ;;  %v7852_v57 = vld [vmem:[#allocation5 + $0xb60] ss:$16 sps:$4 sm:$0xff]   ;;  %v7855_v58 = vld [vmem:[#allocation5 + $0xb68] ss:$16 sps:$4 sm:$0xff]  }
 0x1d0   :  { %4723 = vmatpush1.bf16.msra.mxu0 %v7759_v59  ;;  %5196 = vmatpush1.bf16.msra.mxu1 %v7762_v60  ;;  %v7860_v59 = vld [vmem:[#allocation5 + $0xb84] ss:$16 sps:$4 sm:$0xff]   ;;  %v7863_v60 = vld [vmem:[#allocation5 + $0xb8c] ss:$16 sps:$4 sm:$0xff]  }
 0x1d1   :  { %4724 = vmatprep.subr.bf16.mxu0 %v7767_v61  ;;  %5197 = vmatprep.subr.bf16.mxu1 %v7770_v62  ;;  %v7858_v61 = vld [vmem:[#allocation5 + $0xb80] ss:$16 sps:$4 sm:$0xff]   ;;  %v7861_v62 = vld [vmem:[#allocation5 + $0xb88] ss:$16 sps:$4 sm:$0xff]  }
 0x1d4   :  { %4725 = vmatpush1.bf16.msra.mxu0 %v7765_v63  ;;  %5198 = vmatpush1.bf16.msra.mxu1 %v7768_v0  ;;  %v7866_v63 = vld [vmem:[#allocation5 + $0xba4] ss:$16 sps:$4 sm:$0xff]   ;;  %v7869_v0 = vld [vmem:[#allocation5 + $0xbac] ss:$16 sps:$4 sm:$0xff]  }
 0x1d5   :  { %4726 = vmatprep.subr.bf16.mxu0 %v7773_v1  ;;  %5199 = vmatprep.subr.bf16.mxu1 %v7776_v2  ;;  %v7864_v1 = vld [vmem:[#allocation5 + $0xba0] ss:$16 sps:$4 sm:$0xff]   ;;  %v7867_v2 = vld [vmem:[#allocation5 + $0xba8] ss:$16 sps:$4 sm:$0xff]  }
 0x1d8   :  { %4727 = vmatpush1.bf16.msra.mxu0 %v7771_v3  ;;  %5200 = vmatpush1.bf16.msra.mxu1 %v7774_v4  ;;  %v7872_v3 = vld [vmem:[#allocation5 + $0xbc4] ss:$16 sps:$4 sm:$0xff]   ;;  %v7875_v4 = vld [vmem:[#allocation5 + $0xbcc] ss:$16 sps:$4 sm:$0xff]  }
 0x1d9   :  { %4728 = vmatprep.subr.bf16.mxu0 %v7779_v5  ;;  %5201 = vmatprep.subr.bf16.mxu1 %v7782_v6  ;;  %v7870_v5 = vld [vmem:[#allocation5 + $0xbc0] ss:$16 sps:$4 sm:$0xff]   ;;  %v7873_v6 = vld [vmem:[#allocation5 + $0xbc8] ss:$16 sps:$4 sm:$0xff]  }
 0x1dc   :  { %4729 = vmatpush1.bf16.msra.mxu0 %v7777_v7  ;;  %5202 = vmatpush1.bf16.msra.mxu1 %v7780_v8  ;;  %v7878_v7 = vld [vmem:[#allocation5 + $0xbe4] ss:$16 sps:$4 sm:$0xff]   ;;  %v7881_v8 = vld [vmem:[#allocation5 + $0xbec] ss:$16 sps:$4 sm:$0xff]  }
 0x1dd   :  { %4741 = vmatprep.subr.bf16.mxu0 %v7788_v10  ;;  %5214 = vmatprep.subr.bf16.mxu1 %v7791_v11  ;;  %v7879_v10 = vld [vmem:[#allocation5 + $0xbe8] ss:$16 sps:$4 sm:$0xff]  }
 0x1de   :  { %v7882_v11 = vld [vmem:[%s8975_s1 + $0x28] ss:$88 sps:$4 sm:$0xff]  }
 0x1df   :  { %4731 = vmatmul.mubr.bf16.vlgmr.msra.gmra.mrb[0].mxu0 %v7783_v9  ;;  %5204 = vmatmul.mubr.bf16.vlgmr.msra.gmra.mrb[0].mxu1 %v7783_v9  ;;  %v7876_v9 = vld [vmem:[#allocation5 + $0xbe0] ss:$16 sps:$4 sm:$0xff]  }
 0x1e0   :  { %4742 = vmatpush1.bf16.msra.mxu0 %v7786_v12  ;;  %5215 = vmatpush1.bf16.msra.mxu1 %v7789_v13  ;;  %v7887_v12 = vld [vmem:[#allocation5 + $0xc04] ss:$16 sps:$4 sm:$0xff]   ;;  %v7890_v13 = vld [vmem:[#allocation5 + $0xc0c] ss:$16 sps:$4 sm:$0xff]  }
 0x1e1   :  { %4743 = vmatprep.subr.bf16.mxu0 %v7794_v14  ;;  %5216 = vmatprep.subr.bf16.mxu1 %v7797_v15  ;;  %v7885_v14 = vld [vmem:[#allocation5 + $0xc00] ss:$16 sps:$4 sm:$0xff]   ;;  %v7888_v15 = vld [vmem:[#allocation5 + $0xc08] ss:$16 sps:$4 sm:$0xff]  }
 0x1e2   :  { %4773 = vmatprep.mubr.bf16.mxu0 %v7884_v16  ;;  %5246 = vmatprep.mubr.bf16.mxu1 %v7884_v16  ;;  %v7893_v16 = vld [vmem:[#allocation5 + $0xc24] ss:$16 sps:$4 sm:$0xff]  }
 0x1e4   :  { %4744 = vmatpush1.bf16.msra.mxu0 %v7792_v17  ;;  %5217 = vmatpush1.bf16.msra.mxu1 %v7795_v18  ;;  %v7896_v17 = vld [vmem:[#allocation5 + $0xc2c] ss:$16 sps:$4 sm:$0xff]  }
 0x1e5   :  { %4745 = vmatprep.subr.bf16.mxu0 %v7800_v19  ;;  %5218 = vmatprep.subr.bf16.mxu1 %v7803_v20  ;;  %v7983_v18 = vld [vmem:[%s8975_s1 + $0x34] ss:$88 sps:$4 sm:$0xff]   ;;  %v7891_v19 = vld [vmem:[#allocation5 + $0xc20] ss:$16 sps:$4 sm:$0xff]   ;;  %v7894_v20 = vld [vmem:[#allocation5 + $0xc28] ss:$16 sps:$4 sm:$0xff]  }
 0x1e8   :  { %4746 = vmatpush1.bf16.msra.mxu0 %v7798_v21  ;;  %5219 = vmatpush1.bf16.msra.mxu1 %v7801_v22  ;;  %v7899_v21 = vld [vmem:[#allocation5 + $0xc44] ss:$16 sps:$4 sm:$0xff]   ;;  %v7902_v22 = vld [vmem:[#allocation5 + $0xc4c] ss:$16 sps:$4 sm:$0xff]  }
 0x1e9   :  { %4747 = vmatprep.subr.bf16.mxu0 %v7806_v23  ;;  %5220 = vmatprep.subr.bf16.mxu1 %v7809_v24  ;;  %v7897_v23 = vld [vmem:[#allocation5 + $0xc40] ss:$16 sps:$4 sm:$0xff]   ;;  %v7900_v24 = vld [vmem:[#allocation5 + $0xc48] ss:$16 sps:$4 sm:$0xff]  }
 0x1ec   :  { %4748 = vmatpush1.bf16.msra.mxu0 %v7804_v25  ;;  %5221 = vmatpush1.bf16.msra.mxu1 %v7807_v26  ;;  %v7905_v25 = vld [vmem:[#allocation5 + $0xc64] ss:$16 sps:$4 sm:$0xff]   ;;  %v7908_v26 = vld [vmem:[#allocation5 + $0xc6c] ss:$16 sps:$4 sm:$0xff]  }
 0x1ed   :  { %4749 = vmatprep.subr.bf16.mxu0 %v7812_v27  ;;  %5222 = vmatprep.subr.bf16.mxu1 %v7815_v28  ;;  %v7903_v27 = vld [vmem:[#allocation5 + $0xc60] ss:$16 sps:$4 sm:$0xff]   ;;  %v7906_v28 = vld [vmem:[#allocation5 + $0xc68] ss:$16 sps:$4 sm:$0xff]  }
 0x1f0   :  { %4750 = vmatpush1.bf16.msra.mxu0 %v7810_v29  ;;  %5223 = vmatpush1.bf16.msra.mxu1 %v7813_v30  ;;  %v7911_v29 = vld [vmem:[#allocation5 + $0xc84] ss:$16 sps:$4 sm:$0xff]   ;;  %v7914_v30 = vld [vmem:[#allocation5 + $0xc8c] ss:$16 sps:$4 sm:$0xff]  }
 0x1f1   :  { %4751 = vmatprep.subr.bf16.mxu0 %v7818_v31  ;;  %5224 = vmatprep.subr.bf16.mxu1 %v7821_v32  ;;  %v7909_v31 = vld [vmem:[#allocation5 + $0xc80] ss:$16 sps:$4 sm:$0xff]   ;;  %v7912_v32 = vld [vmem:[#allocation5 + $0xc88] ss:$16 sps:$4 sm:$0xff]  }
 0x1f4   :  { %4752 = vmatpush1.bf16.msra.mxu0 %v7816_v33  ;;  %5225 = vmatpush1.bf16.msra.mxu1 %v7819_v34  ;;  %v7917_v33 = vld [vmem:[#allocation5 + $0xca4] ss:$16 sps:$4 sm:$0xff]   ;;  %v7920_v34 = vld [vmem:[#allocation5 + $0xcac] ss:$16 sps:$4 sm:$0xff]  }
 0x1f5   :  { %4753 = vmatprep.subr.bf16.mxu0 %v7824_v35  ;;  %5226 = vmatprep.subr.bf16.mxu1 %v7827_v36  ;;  %v7915_v35 = vld [vmem:[#allocation5 + $0xca0] ss:$16 sps:$4 sm:$0xff]   ;;  %v7918_v36 = vld [vmem:[#allocation5 + $0xca8] ss:$16 sps:$4 sm:$0xff]  }
 0x1f8   :  { %4754 = vmatpush1.bf16.msra.mxu0 %v7822_v37  ;;  %5227 = vmatpush1.bf16.msra.mxu1 %v7825_v38  ;;  %v7923_v37 = vld [vmem:[#allocation5 + $0xcc4] ss:$16 sps:$4 sm:$0xff]   ;;  %v7926_v38 = vld [vmem:[#allocation5 + $0xccc] ss:$16 sps:$4 sm:$0xff]  }
 0x1f9   :  { %4755 = vmatprep.subr.bf16.mxu0 %v7830_v39  ;;  %5228 = vmatprep.subr.bf16.mxu1 %v7833_v40  ;;  %v7921_v39 = vld [vmem:[#allocation5 + $0xcc0] ss:$16 sps:$4 sm:$0xff]   ;;  %v7924_v40 = vld [vmem:[#allocation5 + $0xcc8] ss:$16 sps:$4 sm:$0xff]  }
 0x1fc   :  { %4756 = vmatpush1.bf16.msra.mxu0 %v7828_v41  ;;  %5229 = vmatpush1.bf16.msra.mxu1 %v7831_v42  ;;  %v7929_v41 = vld [vmem:[#allocation5 + $0xce4] ss:$16 sps:$4 sm:$0xff]   ;;  %v7932_v42 = vld [vmem:[#allocation5 + $0xcec] ss:$16 sps:$4 sm:$0xff]  }
 0x1fd   :  { %4757 = vmatprep.subr.bf16.mxu0 %v7836_v43  ;;  %5230 = vmatprep.subr.bf16.mxu1 %v7839_v44  ;;  %v7927_v43 = vld [vmem:[#allocation5 + $0xce0] ss:$16 sps:$4 sm:$0xff]   ;;  %v7930_v44 = vld [vmem:[#allocation5 + $0xce8] ss:$16 sps:$4 sm:$0xff]  }
 0x200   :  { %4758 = vmatpush1.bf16.msra.mxu0 %v7834_v45  ;;  %5231 = vmatpush1.bf16.msra.mxu1 %v7837_v46  ;;  %v7935_v45 = vld [vmem:[#allocation5 + $0xd04] ss:$16 sps:$4 sm:$0xff]   ;;  %v7938_v46 = vld [vmem:[#allocation5 + $0xd0c] ss:$16 sps:$4 sm:$0xff]  }
 0x201   :  { %4759 = vmatprep.subr.bf16.mxu0 %v7842_v47  ;;  %5232 = vmatprep.subr.bf16.mxu1 %v7845_v48  ;;  %v7933_v47 = vld [vmem:[#allocation5 + $0xd00] ss:$16 sps:$4 sm:$0xff]   ;;  %v7936_v48 = vld [vmem:[#allocation5 + $0xd08] ss:$16 sps:$4 sm:$0xff]  }
 0x204   :  { %4760 = vmatpush1.bf16.msra.mxu0 %v7840_v49  ;;  %5233 = vmatpush1.bf16.msra.mxu1 %v7843_v50  ;;  %v7941_v49 = vld [vmem:[#allocation5 + $0xd24] ss:$16 sps:$4 sm:$0xff]   ;;  %v7944_v50 = vld [vmem:[#allocation5 + $0xd2c] ss:$16 sps:$4 sm:$0xff]  }
 0x205   :  { %4761 = vmatprep.subr.bf16.mxu0 %v7848_v51  ;;  %5234 = vmatprep.subr.bf16.mxu1 %v7851_v52  ;;  %v7939_v51 = vld [vmem:[#allocation5 + $0xd20] ss:$16 sps:$4 sm:$0xff]   ;;  %v7942_v52 = vld [vmem:[#allocation5 + $0xd28] ss:$16 sps:$4 sm:$0xff]  }
 0x208   :  { %4762 = vmatpush1.bf16.msra.mxu0 %v7846_v53  ;;  %5235 = vmatpush1.bf16.msra.mxu1 %v7849_v54  ;;  %v7947_v53 = vld [vmem:[#allocation5 + $0xd44] ss:$16 sps:$4 sm:$0xff]   ;;  %v7950_v54 = vld [vmem:[#allocation5 + $0xd4c] ss:$16 sps:$4 sm:$0xff]  }
 0x209   :  { %4763 = vmatprep.subr.bf16.mxu0 %v7854_v55  ;;  %5236 = vmatprep.subr.bf16.mxu1 %v7857_v56  ;;  %v7945_v55 = vld [vmem:[#allocation5 + $0xd40] ss:$16 sps:$4 sm:$0xff]   ;;  %v7948_v56 = vld [vmem:[#allocation5 + $0xd48] ss:$16 sps:$4 sm:$0xff]  }
 0x20c   :  { %4764 = vmatpush1.bf16.msra.mxu0 %v7852_v57  ;;  %5237 = vmatpush1.bf16.msra.mxu1 %v7855_v58  ;;  %v7953_v57 = vld [vmem:[#allocation5 + $0xd64] ss:$16 sps:$4 sm:$0xff]   ;;  %v7956_v58 = vld [vmem:[#allocation5 + $0xd6c] ss:$16 sps:$4 sm:$0xff]  }
 0x20d   :  { %4765 = vmatprep.subr.bf16.mxu0 %v7860_v59  ;;  %5238 = vmatprep.subr.bf16.mxu1 %v7863_v60  ;;  %v7951_v59 = vld [vmem:[#allocation5 + $0xd60] ss:$16 sps:$4 sm:$0xff]   ;;  %v7954_v60 = vld [vmem:[#allocation5 + $0xd68] ss:$16 sps:$4 sm:$0xff]  }
 0x210   :  { %4766 = vmatpush1.bf16.msra.mxu0 %v7858_v61  ;;  %5239 = vmatpush1.bf16.msra.mxu1 %v7861_v62  ;;  %v7959_v61 = vld [vmem:[#allocation5 + $0xd84] ss:$16 sps:$4 sm:$0xff]   ;;  %v7962_v62 = vld [vmem:[#allocation5 + $0xd8c] ss:$16 sps:$4 sm:$0xff]  }
 0x211   :  { %4767 = vmatprep.subr.bf16.mxu0 %v7866_v63  ;;  %5240 = vmatprep.subr.bf16.mxu1 %v7869_v0  ;;  %v7957_v63 = vld [vmem:[#allocation5 + $0xd80] ss:$16 sps:$4 sm:$0xff]   ;;  %v7960_v0 = vld [vmem:[#allocation5 + $0xd88] ss:$16 sps:$4 sm:$0xff]  }
 0x214   :  { %4768 = vmatpush1.bf16.msra.mxu0 %v7864_v1  ;;  %5241 = vmatpush1.bf16.msra.mxu1 %v7867_v2  ;;  %v7965_v1 = vld [vmem:[#allocation5 + $0xda4] ss:$16 sps:$4 sm:$0xff]   ;;  %v7968_v2 = vld [vmem:[#allocation5 + $0xdac] ss:$16 sps:$4 sm:$0xff]  }
 0x215   :  { %4769 = vmatprep.subr.bf16.mxu0 %v7872_v3  ;;  %5242 = vmatprep.subr.bf16.mxu1 %v7875_v4  ;;  %v7963_v3 = vld [vmem:[#allocation5 + $0xda0] ss:$16 sps:$4 sm:$0xff]   ;;  %v7966_v4 = vld [vmem:[#allocation5 + $0xda8] ss:$16 sps:$4 sm:$0xff]  }
 0x218   :  { %4770 = vmatpush1.bf16.msra.mxu0 %v7870_v5  ;;  %5243 = vmatpush1.bf16.msra.mxu1 %v7873_v6  ;;  %v7971_v5 = vld [vmem:[#allocation5 + $0xdc4] ss:$16 sps:$4 sm:$0xff]   ;;  %v7974_v6 = vld [vmem:[#allocation5 + $0xdcc] ss:$16 sps:$4 sm:$0xff]  }
 0x219   :  { %4771 = vmatprep.subr.bf16.mxu0 %v7878_v7  ;;  %5244 = vmatprep.subr.bf16.mxu1 %v7881_v8  ;;  %v7969_v7 = vld [vmem:[#allocation5 + $0xdc0] ss:$16 sps:$4 sm:$0xff]   ;;  %v7972_v8 = vld [vmem:[#allocation5 + $0xdc8] ss:$16 sps:$4 sm:$0xff]  }
 0x21c   :  { %4772 = vmatpush1.bf16.msra.mxu0 %v7876_v9  ;;  %5245 = vmatpush1.bf16.msra.mxu1 %v7879_v10  ;;  %v7977_v9 = vld [vmem:[#allocation5 + $0xde4] ss:$16 sps:$4 sm:$0xff]   ;;  %v7980_v10 = vld [vmem:[#allocation5 + $0xdec] ss:$16 sps:$4 sm:$0xff]  }
 0x21d   :  { %4784 = vmatprep.subr.bf16.mxu0 %v7887_v12  ;;  %5257 = vmatprep.subr.bf16.mxu1 %v7890_v13  ;;  %v7978_v12 = vld [vmem:[#allocation5 + $0xde8] ss:$16 sps:$4 sm:$0xff]  }
 0x21e   :  { %v7981_v13 = vld [vmem:[%s8975_s1 + $0x30] ss:$88 sps:$4 sm:$0xff]  }
 0x21f   :  { %4774 = vmatmul.mubr.bf16.vlgmr.msra.gmra.mrb[0].mxu0 %v7882_v11  ;;  %5247 = vmatmul.mubr.bf16.vlgmr.msra.gmra.mrb[0].mxu1 %v7882_v11  ;;  %v7975_v11 = vld [vmem:[#allocation5 + $0xde0] ss:$16 sps:$4 sm:$0xff]  }
 0x220   :  { %4785 = vmatpush1.bf16.msra.mxu0 %v7885_v14  ;;  %5258 = vmatpush1.bf16.msra.mxu1 %v7888_v15  ;;  %v7986_v14 = vld [vmem:[#allocation5 + $0xe04] ss:$16 sps:$4 sm:$0xff]   ;;  %v7989_v15 = vld [vmem:[#allocation5 + $0xe0c] ss:$16 sps:$4 sm:$0xff]  }
 0x221   :  { %4786 = vmatprep.subr.bf16.mxu0 %v7893_v16  ;;  %5259 = vmatprep.subr.bf16.mxu1 %v7896_v17  ;;  %v7984_v16 = vld [vmem:[#allocation5 + $0xe00] ss:$16 sps:$4 sm:$0xff]   ;;  %v7987_v17 = vld [vmem:[#allocation5 + $0xe08] ss:$16 sps:$4 sm:$0xff]  }
 0x222   :  { %4816 = vmatprep.mubr.bf16.mxu0 %v7983_v18  ;;  %5289 = vmatprep.mubr.bf16.mxu1 %v7983_v18  ;;  %v7992_v18 = vld [vmem:[#allocation5 + $0xe24] ss:$16 sps:$4 sm:$0xff]  }
 0x224   :  { %4787 = vmatpush1.bf16.msra.mxu0 %v7891_v19  ;;  %5260 = vmatpush1.bf16.msra.mxu1 %v7894_v20  ;;  %v7995_v19 = vld [vmem:[#allocation5 + $0xe2c] ss:$16 sps:$4 sm:$0xff]  }
 0x225   :  { %4788 = vmatprep.subr.bf16.mxu0 %v7899_v21  ;;  %5261 = vmatprep.subr.bf16.mxu1 %v7902_v22  ;;  %v8082_v20 = vld [vmem:[%s8975_s1 + $0x3c] ss:$88 sps:$4 sm:$0xff]   ;;  %v7990_v21 = vld [vmem:[#allocation5 + $0xe20] ss:$16 sps:$4 sm:$0xff]   ;;  %v7993_v22 = vld [vmem:[#allocation5 + $0xe28] ss:$16 sps:$4 sm:$0xff]  }
 0x228   :  { %4789 = vmatpush1.bf16.msra.mxu0 %v7897_v23  ;;  %5262 = vmatpush1.bf16.msra.mxu1 %v7900_v24  ;;  %v7998_v23 = vld [vmem:[#allocation5 + $0xe44] ss:$16 sps:$4 sm:$0xff]   ;;  %v8001_v24 = vld [vmem:[#allocation5 + $0xe4c] ss:$16 sps:$4 sm:$0xff]  }
 0x229   :  { %4790 = vmatprep.subr.bf16.mxu0 %v7905_v25  ;;  %5263 = vmatprep.subr.bf16.mxu1 %v7908_v26  ;;  %v7996_v25 = vld [vmem:[#allocation5 + $0xe40] ss:$16 sps:$4 sm:$0xff]   ;;  %v7999_v26 = vld [vmem:[#allocation5 + $0xe48] ss:$16 sps:$4 sm:$0xff]  }
 0x22c   :  { %4791 = vmatpush1.bf16.msra.mxu0 %v7903_v27  ;;  %5264 = vmatpush1.bf16.msra.mxu1 %v7906_v28  ;;  %v8004_v27 = vld [vmem:[#allocation5 + $0xe64] ss:$16 sps:$4 sm:$0xff]   ;;  %v8007_v28 = vld [vmem:[#allocation5 + $0xe6c] ss:$16 sps:$4 sm:$0xff]  }
 0x22d   :  { %4792 = vmatprep.subr.bf16.mxu0 %v7911_v29  ;;  %5265 = vmatprep.subr.bf16.mxu1 %v7914_v30  ;;  %v8002_v29 = vld [vmem:[#allocation5 + $0xe60] ss:$16 sps:$4 sm:$0xff]   ;;  %v8005_v30 = vld [vmem:[#allocation5 + $0xe68] ss:$16 sps:$4 sm:$0xff]  }
 0x230   :  { %4793 = vmatpush1.bf16.msra.mxu0 %v7909_v31  ;;  %5266 = vmatpush1.bf16.msra.mxu1 %v7912_v32  ;;  %v8010_v31 = vld [vmem:[#allocation5 + $0xe84] ss:$16 sps:$4 sm:$0xff]   ;;  %v8013_v32 = vld [vmem:[#allocation5 + $0xe8c] ss:$16 sps:$4 sm:$0xff]  }
 0x231   :  { %4794 = vmatprep.subr.bf16.mxu0 %v7917_v33  ;;  %5267 = vmatprep.subr.bf16.mxu1 %v7920_v34  ;;  %v8008_v33 = vld [vmem:[#allocation5 + $0xe80] ss:$16 sps:$4 sm:$0xff]   ;;  %v8011_v34 = vld [vmem:[#allocation5 + $0xe88] ss:$16 sps:$4 sm:$0xff]  }
 0x234   :  { %4795 = vmatpush1.bf16.msra.mxu0 %v7915_v35  ;;  %5268 = vmatpush1.bf16.msra.mxu1 %v7918_v36  ;;  %v8016_v35 = vld [vmem:[#allocation5 + $0xea4] ss:$16 sps:$4 sm:$0xff]   ;;  %v8019_v36 = vld [vmem:[#allocation5 + $0xeac] ss:$16 sps:$4 sm:$0xff]  }
 0x235   :  { %4796 = vmatprep.subr.bf16.mxu0 %v7923_v37  ;;  %5269 = vmatprep.subr.bf16.mxu1 %v7926_v38  ;;  %v8014_v37 = vld [vmem:[#allocation5 + $0xea0] ss:$16 sps:$4 sm:$0xff]   ;;  %v8017_v38 = vld [vmem:[#allocation5 + $0xea8] ss:$16 sps:$4 sm:$0xff]  }
 0x238   :  { %4797 = vmatpush1.bf16.msra.mxu0 %v7921_v39  ;;  %5270 = vmatpush1.bf16.msra.mxu1 %v7924_v40  ;;  %v8022_v39 = vld [vmem:[#allocation5 + $0xec4] ss:$16 sps:$4 sm:$0xff]   ;;  %v8025_v40 = vld [vmem:[#allocation5 + $0xecc] ss:$16 sps:$4 sm:$0xff]  }
 0x239   :  { %4798 = vmatprep.subr.bf16.mxu0 %v7929_v41  ;;  %5271 = vmatprep.subr.bf16.mxu1 %v7932_v42  ;;  %v8020_v41 = vld [vmem:[#allocation5 + $0xec0] ss:$16 sps:$4 sm:$0xff]   ;;  %v8023_v42 = vld [vmem:[#allocation5 + $0xec8] ss:$16 sps:$4 sm:$0xff]  }
 0x23c   :  { %4799 = vmatpush1.bf16.msra.mxu0 %v7927_v43  ;;  %5272 = vmatpush1.bf16.msra.mxu1 %v7930_v44  ;;  %v8028_v43 = vld [vmem:[#allocation5 + $0xee4] ss:$16 sps:$4 sm:$0xff]   ;;  %v8031_v44 = vld [vmem:[#allocation5 + $0xeec] ss:$16 sps:$4 sm:$0xff]  }
 0x23d   :  { %4800 = vmatprep.subr.bf16.mxu0 %v7935_v45  ;;  %5273 = vmatprep.subr.bf16.mxu1 %v7938_v46  ;;  %v8026_v45 = vld [vmem:[#allocation5 + $0xee0] ss:$16 sps:$4 sm:$0xff]   ;;  %v8029_v46 = vld [vmem:[#allocation5 + $0xee8] ss:$16 sps:$4 sm:$0xff]  }
 0x240   :  { %4801 = vmatpush1.bf16.msra.mxu0 %v7933_v47  ;;  %5274 = vmatpush1.bf16.msra.mxu1 %v7936_v48  ;;  %v8034_v47 = vld [vmem:[#allocation5 + $0xf04] ss:$16 sps:$4 sm:$0xff]   ;;  %v8037_v48 = vld [vmem:[#allocation5 + $0xf0c] ss:$16 sps:$4 sm:$0xff]  }
 0x241   :  { %4802 = vmatprep.subr.bf16.mxu0 %v7941_v49  ;;  %5275 = vmatprep.subr.bf16.mxu1 %v7944_v50  ;;  %v8032_v49 = vld [vmem:[#allocation5 + $0xf00] ss:$16 sps:$4 sm:$0xff]   ;;  %v8035_v50 = vld [vmem:[#allocation5 + $0xf08] ss:$16 sps:$4 sm:$0xff]  }
 0x244   :  { %4803 = vmatpush1.bf16.msra.mxu0 %v7939_v51  ;;  %5276 = vmatpush1.bf16.msra.mxu1 %v7942_v52  ;;  %v8040_v51 = vld [vmem:[#allocation5 + $0xf24] ss:$16 sps:$4 sm:$0xff]   ;;  %v8043_v52 = vld [vmem:[#allocation5 + $0xf2c] ss:$16 sps:$4 sm:$0xff]  }
 0x245   :  { %4804 = vmatprep.subr.bf16.mxu0 %v7947_v53  ;;  %5277 = vmatprep.subr.bf16.mxu1 %v7950_v54  ;;  %v8038_v53 = vld [vmem:[#allocation5 + $0xf20] ss:$16 sps:$4 sm:$0xff]   ;;  %v8041_v54 = vld [vmem:[#allocation5 + $0xf28] ss:$16 sps:$4 sm:$0xff]  }
 0x248   :  { %4805 = vmatpush1.bf16.msra.mxu0 %v7945_v55  ;;  %5278 = vmatpush1.bf16.msra.mxu1 %v7948_v56  ;;  %v8046_v55 = vld [vmem:[#allocation5 + $0xf44] ss:$16 sps:$4 sm:$0xff]   ;;  %v8049_v56 = vld [vmem:[#allocation5 + $0xf4c] ss:$16 sps:$4 sm:$0xff]  }
 0x249   :  { %4806 = vmatprep.subr.bf16.mxu0 %v7953_v57  ;;  %5279 = vmatprep.subr.bf16.mxu1 %v7956_v58  ;;  %v8044_v57 = vld [vmem:[#allocation5 + $0xf40] ss:$16 sps:$4 sm:$0xff]   ;;  %v8047_v58 = vld [vmem:[#allocation5 + $0xf48] ss:$16 sps:$4 sm:$0xff]  }
 0x24c   :  { %4807 = vmatpush1.bf16.msra.mxu0 %v7951_v59  ;;  %5280 = vmatpush1.bf16.msra.mxu1 %v7954_v60  ;;  %v8052_v59 = vld [vmem:[#allocation5 + $0xf64] ss:$16 sps:$4 sm:$0xff]   ;;  %v8055_v60 = vld [vmem:[#allocation5 + $0xf6c] ss:$16 sps:$4 sm:$0xff]  }
 0x24d   :  { %4808 = vmatprep.subr.bf16.mxu0 %v7959_v61  ;;  %5281 = vmatprep.subr.bf16.mxu1 %v7962_v62  ;;  %v8050_v61 = vld [vmem:[#allocation5 + $0xf60] ss:$16 sps:$4 sm:$0xff]   ;;  %v8053_v62 = vld [vmem:[#allocation5 + $0xf68] ss:$16 sps:$4 sm:$0xff]  }
 0x250   :  { %4809 = vmatpush1.bf16.msra.mxu0 %v7957_v63  ;;  %5282 = vmatpush1.bf16.msra.mxu1 %v7960_v0  ;;  %v8058_v63 = vld [vmem:[#allocation5 + $0xf84] ss:$16 sps:$4 sm:$0xff]   ;;  %v8061_v0 = vld [vmem:[#allocation5 + $0xf8c] ss:$16 sps:$4 sm:$0xff]  }
 0x251   :  { %4810 = vmatprep.subr.bf16.mxu0 %v7965_v1  ;;  %5283 = vmatprep.subr.bf16.mxu1 %v7968_v2  ;;  %v8056_v1 = vld [vmem:[#allocation5 + $0xf80] ss:$16 sps:$4 sm:$0xff]   ;;  %v8059_v2 = vld [vmem:[#allocation5 + $0xf88] ss:$16 sps:$4 sm:$0xff]  }
 0x254   :  { %4811 = vmatpush1.bf16.msra.mxu0 %v7963_v3  ;;  %5284 = vmatpush1.bf16.msra.mxu1 %v7966_v4  ;;  %v8064_v3 = vld [vmem:[#allocation5 + $0xfa4] ss:$16 sps:$4 sm:$0xff]   ;;  %v8067_v4 = vld [vmem:[#allocation5 + $0xfac] ss:$16 sps:$4 sm:$0xff]  }
 0x255   :  { %4812 = vmatprep.subr.bf16.mxu0 %v7971_v5  ;;  %5285 = vmatprep.subr.bf16.mxu1 %v7974_v6  ;;  %v8062_v5 = vld [vmem:[#allocation5 + $0xfa0] ss:$16 sps:$4 sm:$0xff]   ;;  %v8065_v6 = vld [vmem:[#allocation5 + $0xfa8] ss:$16 sps:$4 sm:$0xff]  }
 0x258   :  { %4813 = vmatpush1.bf16.msra.mxu0 %v7969_v7  ;;  %5286 = vmatpush1.bf16.msra.mxu1 %v7972_v8  ;;  %v8070_v7 = vld [vmem:[#allocation5 + $0xfc4] ss:$16 sps:$4 sm:$0xff]   ;;  %v8073_v8 = vld [vmem:[#allocation5 + $0xfcc] ss:$16 sps:$4 sm:$0xff]  }
 0x259   :  { %4814 = vmatprep.subr.bf16.mxu0 %v7977_v9  ;;  %5287 = vmatprep.subr.bf16.mxu1 %v7980_v10  ;;  %v8068_v9 = vld [vmem:[#allocation5 + $0xfc0] ss:$16 sps:$4 sm:$0xff]   ;;  %v8071_v10 = vld [vmem:[#allocation5 + $0xfc8] ss:$16 sps:$4 sm:$0xff]  }
 0x25c   :  { %4815 = vmatpush1.bf16.msra.mxu0 %v7975_v11  ;;  %5288 = vmatpush1.bf16.msra.mxu1 %v7978_v12  ;;  %v8076_v11 = vld [vmem:[#allocation5 + $0xfe4] ss:$16 sps:$4 sm:$0xff]   ;;  %v8079_v12 = vld [vmem:[#allocation5 + $0xfec] ss:$16 sps:$4 sm:$0xff]  }
 0x25d   :  { %4827 = vmatprep.subr.bf16.mxu0 %v7986_v14  ;;  %5300 = vmatprep.subr.bf16.mxu1 %v7989_v15  ;;  %v8077_v14 = vld [vmem:[#allocation5 + $0xfe8] ss:$16 sps:$4 sm:$0xff]   ;;  %v8085_v15 = vld [vmem:[#allocation5 + $0x1004] ss:$16 sps:$4 sm:$0xff]  }
 0x25f   :  { %4817 = vmatmul.mubr.bf16.vlgmr.msra.gmra.mrb[0].mxu0 %v7981_v13  ;;  %5290 = vmatmul.mubr.bf16.vlgmr.msra.gmra.mrb[0].mxu1 %v7981_v13  ;;  %v8074_v13 = vld [vmem:[#allocation5 + $0xfe0] ss:$16 sps:$4 sm:$0xff]  }
 0x260   :  { %4828 = vmatpush1.bf16.msra.mxu0 %v7984_v16  ;;  %5301 = vmatpush1.bf16.msra.mxu1 %v7987_v17  ;;  %v8088_v16 = vld [vmem:[#allocation5 + $0x100c] ss:$16 sps:$4 sm:$0xff]   ;;  %v8080_v17 = vld [vmem:[%s8975_s1 + $0x38] ss:$88 sps:$4 sm:$0xff]  }
 0x261   :  { %4829 = vmatprep.subr.bf16.mxu0 %v7992_v18  ;;  %5302 = vmatprep.subr.bf16.mxu1 %v7995_v19  ;;  %v8083_v18 = vld [vmem:[#allocation5 + $0x1000] ss:$16 sps:$4 sm:$0xff]   ;;  %v8086_v19 = vld [vmem:[#allocation5 + $0x1008] ss:$16 sps:$4 sm:$0xff]  }
 0x262   :  { %4859 = vmatprep.mubr.bf16.mxu0 %v8082_v20  ;;  %5332 = vmatprep.mubr.bf16.mxu1 %v8082_v20  ;;  %v8091_v20 = vld [vmem:[#allocation5 + $0x1024] ss:$16 sps:$4 sm:$0xff]  }
 0x264   :  { %4830 = vmatpush1.bf16.msra.mxu0 %v7990_v21  ;;  %5303 = vmatpush1.bf16.msra.mxu1 %v7993_v22  ;;  %v8094_v21 = vld [vmem:[#allocation5 + $0x102c] ss:$16 sps:$4 sm:$0xff]  }
 0x265   :  { %4831 = vmatprep.subr.bf16.mxu0 %v7998_v23  ;;  %5304 = vmatprep.subr.bf16.mxu1 %v8001_v24  ;;  %v8181_v22 = vld [vmem:[%s8975_s1 + $0x44] ss:$88 sps:$4 sm:$0xff]   ;;  %v8089_v23 = vld [vmem:[#allocation5 + $0x1020] ss:$16 sps:$4 sm:$0xff]   ;;  %v8092_v24 = vld [vmem:[#allocation5 + $0x1028] ss:$16 sps:$4 sm:$0xff]  }
 0x268   :  { %4832 = vmatpush1.bf16.msra.mxu0 %v7996_v25  ;;  %5305 = vmatpush1.bf16.msra.mxu1 %v7999_v26  ;;  %v8097_v25 = vld [vmem:[#allocation5 + $0x1044] ss:$16 sps:$4 sm:$0xff]   ;;  %v8100_v26 = vld [vmem:[#allocation5 + $0x104c] ss:$16 sps:$4 sm:$0xff]  }
 0x269   :  { %4833 = vmatprep.subr.bf16.mxu0 %v8004_v27  ;;  %5306 = vmatprep.subr.bf16.mxu1 %v8007_v28  ;;  %v8095_v27 = vld [vmem:[#allocation5 + $0x1040] ss:$16 sps:$4 sm:$0xff]   ;;  %v8098_v28 = vld [vmem:[#allocation5 + $0x1048] ss:$16 sps:$4 sm:$0xff]  }
 0x26c   :  { %4834 = vmatpush1.bf16.msra.mxu0 %v8002_v29  ;;  %5307 = vmatpush1.bf16.msra.mxu1 %v8005_v30  ;;  %v8103_v29 = vld [vmem:[#allocation5 + $0x1064] ss:$16 sps:$4 sm:$0xff]   ;;  %v8106_v30 = vld [vmem:[#allocation5 + $0x106c] ss:$16 sps:$4 sm:$0xff]  }
 0x26d   :  { %4835 = vmatprep.subr.bf16.mxu0 %v8010_v31  ;;  %5308 = vmatprep.subr.bf16.mxu1 %v8013_v32  ;;  %v8101_v31 = vld [vmem:[#allocation5 + $0x1060] ss:$16 sps:$4 sm:$0xff]   ;;  %v8104_v32 = vld [vmem:[#allocation5 + $0x1068] ss:$16 sps:$4 sm:$0xff]  }
 0x270   :  { %4836 = vmatpush1.bf16.msra.mxu0 %v8008_v33  ;;  %5309 = vmatpush1.bf16.msra.mxu1 %v8011_v34  ;;  %v8109_v33 = vld [vmem:[#allocation5 + $0x1084] ss:$16 sps:$4 sm:$0xff]   ;;  %v8112_v34 = vld [vmem:[#allocation5 + $0x108c] ss:$16 sps:$4 sm:$0xff]  }
 0x271   :  { %4837 = vmatprep.subr.bf16.mxu0 %v8016_v35  ;;  %5310 = vmatprep.subr.bf16.mxu1 %v8019_v36  ;;  %v8107_v35 = vld [vmem:[#allocation5 + $0x1080] ss:$16 sps:$4 sm:$0xff]   ;;  %v8110_v36 = vld [vmem:[#allocation5 + $0x1088] ss:$16 sps:$4 sm:$0xff]  }
 0x274   :  { %4838 = vmatpush1.bf16.msra.mxu0 %v8014_v37  ;;  %5311 = vmatpush1.bf16.msra.mxu1 %v8017_v38  ;;  %v8115_v37 = vld [vmem:[#allocation5 + $0x10a4] ss:$16 sps:$4 sm:$0xff]   ;;  %v8118_v38 = vld [vmem:[#allocation5 + $0x10ac] ss:$16 sps:$4 sm:$0xff]  }
 0x275   :  { %4839 = vmatprep.subr.bf16.mxu0 %v8022_v39  ;;  %5312 = vmatprep.subr.bf16.mxu1 %v8025_v40  ;;  %v8113_v39 = vld [vmem:[#allocation5 + $0x10a0] ss:$16 sps:$4 sm:$0xff]   ;;  %v8116_v40 = vld [vmem:[#allocation5 + $0x10a8] ss:$16 sps:$4 sm:$0xff]  }
 0x278   :  { %4840 = vmatpush1.bf16.msra.mxu0 %v8020_v41  ;;  %5313 = vmatpush1.bf16.msra.mxu1 %v8023_v42  ;;  %v8121_v41 = vld [vmem:[#allocation5 + $0x10c4] ss:$16 sps:$4 sm:$0xff]   ;;  %v8124_v42 = vld [vmem:[#allocation5 + $0x10cc] ss:$16 sps:$4 sm:$0xff]  }
 0x279   :  { %4841 = vmatprep.subr.bf16.mxu0 %v8028_v43  ;;  %5314 = vmatprep.subr.bf16.mxu1 %v8031_v44  ;;  %v8119_v43 = vld [vmem:[#allocation5 + $0x10c0] ss:$16 sps:$4 sm:$0xff]   ;;  %v8122_v44 = vld [vmem:[#allocation5 + $0x10c8] ss:$16 sps:$4 sm:$0xff]  }
 0x27c   :  { %4842 = vmatpush1.bf16.msra.mxu0 %v8026_v45  ;;  %5315 = vmatpush1.bf16.msra.mxu1 %v8029_v46  ;;  %v8127_v45 = vld [vmem:[#allocation5 + $0x10e4] ss:$16 sps:$4 sm:$0xff]   ;;  %v8130_v46 = vld [vmem:[#allocation5 + $0x10ec] ss:$16 sps:$4 sm:$0xff]  }
 0x27d   :  { %4843 = vmatprep.subr.bf16.mxu0 %v8034_v47  ;;  %5316 = vmatprep.subr.bf16.mxu1 %v8037_v48  ;;  %v8125_v47 = vld [vmem:[#allocation5 + $0x10e0] ss:$16 sps:$4 sm:$0xff]   ;;  %v8128_v48 = vld [vmem:[#allocation5 + $0x10e8] ss:$16 sps:$4 sm:$0xff]  }
 0x280   :  { %4844 = vmatpush1.bf16.msra.mxu0 %v8032_v49  ;;  %5317 = vmatpush1.bf16.msra.mxu1 %v8035_v50  ;;  %v8133_v49 = vld [vmem:[#allocation5 + $0x1104] ss:$16 sps:$4 sm:$0xff]   ;;  %v8136_v50 = vld [vmem:[#allocation5 + $0x110c] ss:$16 sps:$4 sm:$0xff]  }
 0x281   :  { %4845 = vmatprep.subr.bf16.mxu0 %v8040_v51  ;;  %5318 = vmatprep.subr.bf16.mxu1 %v8043_v52  ;;  %v8131_v51 = vld [vmem:[#allocation5 + $0x1100] ss:$16 sps:$4 sm:$0xff]   ;;  %v8134_v52 = vld [vmem:[#allocation5 + $0x1108] ss:$16 sps:$4 sm:$0xff]  }
 0x284   :  { %4846 = vmatpush1.bf16.msra.mxu0 %v8038_v53  ;;  %5319 = vmatpush1.bf16.msra.mxu1 %v8041_v54  ;;  %v8139_v53 = vld [vmem:[#allocation5 + $0x1124] ss:$16 sps:$4 sm:$0xff]   ;;  %v8142_v54 = vld [vmem:[#allocation5 + $0x112c] ss:$16 sps:$4 sm:$0xff]  }
 0x285   :  { %4847 = vmatprep.subr.bf16.mxu0 %v8046_v55  ;;  %5320 = vmatprep.subr.bf16.mxu1 %v8049_v56  ;;  %v8137_v55 = vld [vmem:[#allocation5 + $0x1120] ss:$16 sps:$4 sm:$0xff]   ;;  %v8140_v56 = vld [vmem:[#allocation5 + $0x1128] ss:$16 sps:$4 sm:$0xff]  }
 0x288   :  { %4848 = vmatpush1.bf16.msra.mxu0 %v8044_v57  ;;  %5321 = vmatpush1.bf16.msra.mxu1 %v8047_v58  ;;  %v8145_v57 = vld [vmem:[#allocation5 + $0x1144] ss:$16 sps:$4 sm:$0xff]   ;;  %v8148_v58 = vld [vmem:[#allocation5 + $0x114c] ss:$16 sps:$4 sm:$0xff]  }
 0x289   :  { %4849 = vmatprep.subr.bf16.mxu0 %v8052_v59  ;;  %5322 = vmatprep.subr.bf16.mxu1 %v8055_v60  ;;  %v8143_v59 = vld [vmem:[#allocation5 + $0x1140] ss:$16 sps:$4 sm:$0xff]   ;;  %v8146_v60 = vld [vmem:[#allocation5 + $0x1148] ss:$16 sps:$4 sm:$0xff]  }
 0x28c   :  { %4850 = vmatpush1.bf16.msra.mxu0 %v8050_v61  ;;  %5323 = vmatpush1.bf16.msra.mxu1 %v8053_v62  ;;  %v8151_v61 = vld [vmem:[#allocation5 + $0x1164] ss:$16 sps:$4 sm:$0xff]   ;;  %v8154_v62 = vld [vmem:[#allocation5 + $0x116c] ss:$16 sps:$4 sm:$0xff]  }
 0x28d   :  { %4851 = vmatprep.subr.bf16.mxu0 %v8058_v63  ;;  %5324 = vmatprep.subr.bf16.mxu1 %v8061_v0  ;;  %v8149_v63 = vld [vmem:[#allocation5 + $0x1160] ss:$16 sps:$4 sm:$0xff]   ;;  %v8152_v0 = vld [vmem:[#allocation5 + $0x1168] ss:$16 sps:$4 sm:$0xff]  }
 0x290   :  { %4852 = vmatpush1.bf16.msra.mxu0 %v8056_v1  ;;  %5325 = vmatpush1.bf16.msra.mxu1 %v8059_v2  ;;  %v8157_v1 = vld [vmem:[#allocation5 + $0x1184] ss:$16 sps:$4 sm:$0xff]   ;;  %v8160_v2 = vld [vmem:[#allocation5 + $0x118c] ss:$16 sps:$4 sm:$0xff]  }
 0x291   :  { %4853 = vmatprep.subr.bf16.mxu0 %v8064_v3  ;;  %5326 = vmatprep.subr.bf16.mxu1 %v8067_v4  ;;  %v8155_v3 = vld [vmem:[#allocation5 + $0x1180] ss:$16 sps:$4 sm:$0xff]   ;;  %v8158_v4 = vld [vmem:[#allocation5 + $0x1188] ss:$16 sps:$4 sm:$0xff]  }
 0x294   :  { %4854 = vmatpush1.bf16.msra.mxu0 %v8062_v5  ;;  %5327 = vmatpush1.bf16.msra.mxu1 %v8065_v6  ;;  %v8163_v5 = vld [vmem:[#allocation5 + $0x11a4] ss:$16 sps:$4 sm:$0xff]   ;;  %v8166_v6 = vld [vmem:[#allocation5 + $0x11ac] ss:$16 sps:$4 sm:$0xff]  }
 0x295   :  { %4855 = vmatprep.subr.bf16.mxu0 %v8070_v7  ;;  %5328 = vmatprep.subr.bf16.mxu1 %v8073_v8  ;;  %v8161_v7 = vld [vmem:[#allocation5 + $0x11a0] ss:$16 sps:$4 sm:$0xff]   ;;  %v8164_v8 = vld [vmem:[#allocation5 + $0x11a8] ss:$16 sps:$4 sm:$0xff]  }
 0x298   :  { %4856 = vmatpush1.bf16.msra.mxu0 %v8068_v9  ;;  %5329 = vmatpush1.bf16.msra.mxu1 %v8071_v10  ;;  %v8169_v9 = vld [vmem:[#allocation5 + $0x11c4] ss:$16 sps:$4 sm:$0xff]   ;;  %v8172_v10 = vld [vmem:[#allocation5 + $0x11cc] ss:$16 sps:$4 sm:$0xff]  }
 0x299   :  { %4857 = vmatprep.subr.bf16.mxu0 %v8076_v11  ;;  %5330 = vmatprep.subr.bf16.mxu1 %v8079_v12  ;;  %v8167_v11 = vld [vmem:[#allocation5 + $0x11c0] ss:$16 sps:$4 sm:$0xff]   ;;  %v8170_v12 = vld [vmem:[#allocation5 + $0x11c8] ss:$16 sps:$4 sm:$0xff]  }
 0x29c   :  { %4858 = vmatpush1.bf16.msra.mxu0 %v8074_v13  ;;  %5331 = vmatpush1.bf16.msra.mxu1 %v8077_v14  ;;  %v8175_v13 = vld [vmem:[#allocation5 + $0x11e4] ss:$16 sps:$4 sm:$0xff]   ;;  %v8178_v14 = vld [vmem:[#allocation5 + $0x11ec] ss:$16 sps:$4 sm:$0xff]  }
 0x29d   :  { %4870 = vmatprep.subr.bf16.mxu0 %v8085_v15  ;;  %5343 = vmatprep.subr.bf16.mxu1 %v8088_v16  ;;  %v8173_v15 = vld [vmem:[#allocation5 + $0x11e0] ss:$16 sps:$4 sm:$0xff]   ;;  %v8176_v16 = vld [vmem:[#allocation5 + $0x11e8] ss:$16 sps:$4 sm:$0xff]  }
 0x29f   :  { %4860 = vmatmul.mubr.bf16.vlgmr.msra.gmra.mrb[0].mxu0 %v8080_v17  ;;  %5333 = vmatmul.mubr.bf16.vlgmr.msra.gmra.mrb[0].mxu1 %v8080_v17  ;;  %v8184_v17 = vld [vmem:[#allocation5 + $0x1204] ss:$16 sps:$4 sm:$0xff]  }
 0x2a0   :  { %4871 = vmatpush1.bf16.msra.mxu0 %v8083_v18  ;;  %5344 = vmatpush1.bf16.msra.mxu1 %v8086_v19  ;;  %v8187_v18 = vld [vmem:[#allocation5 + $0x120c] ss:$16 sps:$4 sm:$0xff]   ;;  %v8179_v19 = vld [vmem:[%s8975_s1 + $0x40] ss:$88 sps:$4 sm:$0xff]  }
 0x2a1   :  { %4872 = vmatprep.subr.bf16.mxu0 %v8091_v20  ;;  %5345 = vmatprep.subr.bf16.mxu1 %v8094_v21  ;;  %v8182_v20 = vld [vmem:[#allocation5 + $0x1200] ss:$16 sps:$4 sm:$0xff]   ;;  %v8185_v21 = vld [vmem:[#allocation5 + $0x1208] ss:$16 sps:$4 sm:$0xff]  }
 0x2a2   :  { %4902 = vmatprep.mubr.bf16.mxu0 %v8181_v22  ;;  %5375 = vmatprep.mubr.bf16.mxu1 %v8181_v22  ;;  %v8190_v22 = vld [vmem:[#allocation5 + $0x1224] ss:$16 sps:$4 sm:$0xff]  }
 0x2a4   :  { %4873 = vmatpush1.bf16.msra.mxu0 %v8089_v23  ;;  %5346 = vmatpush1.bf16.msra.mxu1 %v8092_v24  ;;  %v8193_v23 = vld [vmem:[#allocation5 + $0x122c] ss:$16 sps:$4 sm:$0xff]  }
 0x2a5   :  { %4874 = vmatprep.subr.bf16.mxu0 %v8097_v25  ;;  %5347 = vmatprep.subr.bf16.mxu1 %v8100_v26  ;;  %v8280_v24 = vld [vmem:[%s8975_s1 + $0x4c] ss:$88 sps:$4 sm:$0xff]   ;;  %v8188_v25 = vld [vmem:[#allocation5 + $0x1220] ss:$16 sps:$4 sm:$0xff]   ;;  %v8191_v26 = vld [vmem:[#allocation5 + $0x1228] ss:$16 sps:$4 sm:$0xff]  }
 0x2a8   :  { %4875 = vmatpush1.bf16.msra.mxu0 %v8095_v27  ;;  %5348 = vmatpush1.bf16.msra.mxu1 %v8098_v28  ;;  %v8196_v27 = vld [vmem:[#allocation5 + $0x1244] ss:$16 sps:$4 sm:$0xff]   ;;  %v8199_v28 = vld [vmem:[#allocation5 + $0x124c] ss:$16 sps:$4 sm:$0xff]  }
 0x2a9   :  { %4876 = vmatprep.subr.bf16.mxu0 %v8103_v29  ;;  %5349 = vmatprep.subr.bf16.mxu1 %v8106_v30  ;;  %v8194_v29 = vld [vmem:[#allocation5 + $0x1240] ss:$16 sps:$4 sm:$0xff]   ;;  %v8197_v30 = vld [vmem:[#allocation5 + $0x1248] ss:$16 sps:$4 sm:$0xff]  }
 0x2ac   :  { %4877 = vmatpush1.bf16.msra.mxu0 %v8101_v31  ;;  %5350 = vmatpush1.bf16.msra.mxu1 %v8104_v32  ;;  %v8202_v31 = vld [vmem:[#allocation5 + $0x1264] ss:$16 sps:$4 sm:$0xff]   ;;  %v8205_v32 = vld [vmem:[#allocation5 + $0x126c] ss:$16 sps:$4 sm:$0xff]  }
 0x2ad   :  { %4878 = vmatprep.subr.bf16.mxu0 %v8109_v33  ;;  %5351 = vmatprep.subr.bf16.mxu1 %v8112_v34  ;;  %v8200_v33 = vld [vmem:[#allocation5 + $0x1260] ss:$16 sps:$4 sm:$0xff]   ;;  %v8203_v34 = vld [vmem:[#allocation5 + $0x1268] ss:$16 sps:$4 sm:$0xff]  }
 0x2b0   :  { %4879 = vmatpush1.bf16.msra.mxu0 %v8107_v35  ;;  %5352 = vmatpush1.bf16.msra.mxu1 %v8110_v36  ;;  %v8208_v35 = vld [vmem:[#allocation5 + $0x1284] ss:$16 sps:$4 sm:$0xff]   ;;  %v8211_v36 = vld [vmem:[#allocation5 + $0x128c] ss:$16 sps:$4 sm:$0xff]  }
 0x2b1   :  { %4880 = vmatprep.subr.bf16.mxu0 %v8115_v37  ;;  %5353 = vmatprep.subr.bf16.mxu1 %v8118_v38  ;;  %v8206_v37 = vld [vmem:[#allocation5 + $0x1280] ss:$16 sps:$4 sm:$0xff]   ;;  %v8209_v38 = vld [vmem:[#allocation5 + $0x1288] ss:$16 sps:$4 sm:$0xff]  }
 0x2b4   :  { %4881 = vmatpush1.bf16.msra.mxu0 %v8113_v39  ;;  %5354 = vmatpush1.bf16.msra.mxu1 %v8116_v40  ;;  %v8214_v39 = vld [vmem:[#allocation5 + $0x12a4] ss:$16 sps:$4 sm:$0xff]   ;;  %v8217_v40 = vld [vmem:[#allocation5 + $0x12ac] ss:$16 sps:$4 sm:$0xff]  }
 0x2b5   :  { %4882 = vmatprep.subr.bf16.mxu0 %v8121_v41  ;;  %5355 = vmatprep.subr.bf16.mxu1 %v8124_v42  ;;  %v8212_v41 = vld [vmem:[#allocation5 + $0x12a0] ss:$16 sps:$4 sm:$0xff]   ;;  %v8215_v42 = vld [vmem:[#allocation5 + $0x12a8] ss:$16 sps:$4 sm:$0xff]  }
 0x2b8   :  { %4883 = vmatpush1.bf16.msra.mxu0 %v8119_v43  ;;  %5356 = vmatpush1.bf16.msra.mxu1 %v8122_v44  ;;  %v8220_v43 = vld [vmem:[#allocation5 + $0x12c4] ss:$16 sps:$4 sm:$0xff]   ;;  %v8223_v44 = vld [vmem:[#allocation5 + $0x12cc] ss:$16 sps:$4 sm:$0xff]  }
 0x2b9   :  { %4884 = vmatprep.subr.bf16.mxu0 %v8127_v45  ;;  %5357 = vmatprep.subr.bf16.mxu1 %v8130_v46  ;;  %v8218_v45 = vld [vmem:[#allocation5 + $0x12c0] ss:$16 sps:$4 sm:$0xff]   ;;  %v8221_v46 = vld [vmem:[#allocation5 + $0x12c8] ss:$16 sps:$4 sm:$0xff]  }
 0x2bc   :  { %4885 = vmatpush1.bf16.msra.mxu0 %v8125_v47  ;;  %5358 = vmatpush1.bf16.msra.mxu1 %v8128_v48  ;;  %v8226_v47 = vld [vmem:[#allocation5 + $0x12e4] ss:$16 sps:$4 sm:$0xff]   ;;  %v8229_v48 = vld [vmem:[#allocation5 + $0x12ec] ss:$16 sps:$4 sm:$0xff]  }
 0x2bd   :  { %4886 = vmatprep.subr.bf16.mxu0 %v8133_v49  ;;  %5359 = vmatprep.subr.bf16.mxu1 %v8136_v50  ;;  %v8224_v49 = vld [vmem:[#allocation5 + $0x12e0] ss:$16 sps:$4 sm:$0xff]   ;;  %v8227_v50 = vld [vmem:[#allocation5 + $0x12e8] ss:$16 sps:$4 sm:$0xff]  }
 0x2c0   :  { %4887 = vmatpush1.bf16.msra.mxu0 %v8131_v51  ;;  %5360 = vmatpush1.bf16.msra.mxu1 %v8134_v52  ;;  %v8232_v51 = vld [vmem:[#allocation5 + $0x1304] ss:$16 sps:$4 sm:$0xff]   ;;  %v8235_v52 = vld [vmem:[#allocation5 + $0x130c] ss:$16 sps:$4 sm:$0xff]  }
 0x2c1   :  { %4888 = vmatprep.subr.bf16.mxu0 %v8139_v53  ;;  %5361 = vmatprep.subr.bf16.mxu1 %v8142_v54  ;;  %v8230_v53 = vld [vmem:[#allocation5 + $0x1300] ss:$16 sps:$4 sm:$0xff]   ;;  %v8233_v54 = vld [vmem:[#allocation5 + $0x1308] ss:$16 sps:$4 sm:$0xff]  }
 0x2c4   :  { %4889 = vmatpush1.bf16.msra.mxu0 %v8137_v55  ;;  %5362 = vmatpush1.bf16.msra.mxu1 %v8140_v56  ;;  %v8238_v55 = vld [vmem:[#allocation5 + $0x1324] ss:$16 sps:$4 sm:$0xff]   ;;  %v8241_v56 = vld [vmem:[#allocation5 + $0x132c] ss:$16 sps:$4 sm:$0xff]  }
 0x2c5   :  { %4890 = vmatprep.subr.bf16.mxu0 %v8145_v57  ;;  %5363 = vmatprep.subr.bf16.mxu1 %v8148_v58  ;;  %v8236_v57 = vld [vmem:[#allocation5 + $0x1320] ss:$16 sps:$4 sm:$0xff]   ;;  %v8239_v58 = vld [vmem:[#allocation5 + $0x1328] ss:$16 sps:$4 sm:$0xff]  }
 0x2c8   :  { %4891 = vmatpush1.bf16.msra.mxu0 %v8143_v59  ;;  %5364 = vmatpush1.bf16.msra.mxu1 %v8146_v60  ;;  %v8244_v59 = vld [vmem:[#allocation5 + $0x1344] ss:$16 sps:$4 sm:$0xff]   ;;  %v8247_v60 = vld [vmem:[#allocation5 + $0x134c] ss:$16 sps:$4 sm:$0xff]  }
 0x2c9   :  { %4892 = vmatprep.subr.bf16.mxu0 %v8151_v61  ;;  %5365 = vmatprep.subr.bf16.mxu1 %v8154_v62  ;;  %v8242_v61 = vld [vmem:[#allocation5 + $0x1340] ss:$16 sps:$4 sm:$0xff]   ;;  %v8245_v62 = vld [vmem:[#allocation5 + $0x1348] ss:$16 sps:$4 sm:$0xff]  }
 0x2cc   :  { %4893 = vmatpush1.bf16.msra.mxu0 %v8149_v63  ;;  %5366 = vmatpush1.bf16.msra.mxu1 %v8152_v0  ;;  %v8250_v63 = vld [vmem:[#allocation5 + $0x1364] ss:$16 sps:$4 sm:$0xff]   ;;  %v8253_v0 = vld [vmem:[#allocation5 + $0x136c] ss:$16 sps:$4 sm:$0xff]  }
 0x2cd   :  { %4894 = vmatprep.subr.bf16.mxu0 %v8157_v1  ;;  %5367 = vmatprep.subr.bf16.mxu1 %v8160_v2  ;;  %v8248_v1 = vld [vmem:[#allocation5 + $0x1360] ss:$16 sps:$4 sm:$0xff]   ;;  %v8251_v2 = vld [vmem:[#allocation5 + $0x1368] ss:$16 sps:$4 sm:$0xff]  }
 0x2d0   :  { %4895 = vmatpush1.bf16.msra.mxu0 %v8155_v3  ;;  %5368 = vmatpush1.bf16.msra.mxu1 %v8158_v4  ;;  %v8256_v3 = vld [vmem:[#allocation5 + $0x1384] ss:$16 sps:$4 sm:$0xff]   ;;  %v8259_v4 = vld [vmem:[#allocation5 + $0x138c] ss:$16 sps:$4 sm:$0xff]  }
 0x2d1   :  { %4896 = vmatprep.subr.bf16.mxu0 %v8163_v5  ;;  %5369 = vmatprep.subr.bf16.mxu1 %v8166_v6  ;;  %v8254_v5 = vld [vmem:[#allocation5 + $0x1380] ss:$16 sps:$4 sm:$0xff]   ;;  %v8257_v6 = vld [vmem:[#allocation5 + $0x1388] ss:$16 sps:$4 sm:$0xff]  }
 0x2d4   :  { %4897 = vmatpush1.bf16.msra.mxu0 %v8161_v7  ;;  %5370 = vmatpush1.bf16.msra.mxu1 %v8164_v8  ;;  %v8262_v7 = vld [vmem:[#allocation5 + $0x13a4] ss:$16 sps:$4 sm:$0xff]   ;;  %v8265_v8 = vld [vmem:[#allocation5 + $0x13ac] ss:$16 sps:$4 sm:$0xff]  }
 0x2d5   :  { %4898 = vmatprep.subr.bf16.mxu0 %v8169_v9  ;;  %5371 = vmatprep.subr.bf16.mxu1 %v8172_v10  ;;  %v8260_v9 = vld [vmem:[#allocation5 + $0x13a0] ss:$16 sps:$4 sm:$0xff]   ;;  %v8263_v10 = vld [vmem:[#allocation5 + $0x13a8] ss:$16 sps:$4 sm:$0xff]  }
 0x2d8   :  { %4899 = vmatpush1.bf16.msra.mxu0 %v8167_v11  ;;  %5372 = vmatpush1.bf16.msra.mxu1 %v8170_v12  ;;  %v8268_v11 = vld [vmem:[#allocation5 + $0x13c4] ss:$16 sps:$4 sm:$0xff]   ;;  %v8271_v12 = vld [vmem:[#allocation5 + $0x13cc] ss:$16 sps:$4 sm:$0xff]  }
 0x2d9   :  { %4900 = vmatprep.subr.bf16.mxu0 %v8175_v13  ;;  %5373 = vmatprep.subr.bf16.mxu1 %v8178_v14  ;;  %v8266_v13 = vld [vmem:[#allocation5 + $0x13c0] ss:$16 sps:$4 sm:$0xff]   ;;  %v8269_v14 = vld [vmem:[#allocation5 + $0x13c8] ss:$16 sps:$4 sm:$0xff]  }
 0x2dc   :  { %4901 = vmatpush1.bf16.msra.mxu0 %v8173_v15  ;;  %5374 = vmatpush1.bf16.msra.mxu1 %v8176_v16  ;;  %v8274_v15 = vld [vmem:[#allocation5 + $0x13e4] ss:$16 sps:$4 sm:$0xff]   ;;  %v8277_v16 = vld [vmem:[#allocation5 + $0x13ec] ss:$16 sps:$4 sm:$0xff]  }
 0x2dd   :  { %4913 = vmatprep.subr.bf16.mxu0 %v8184_v17  ;;  %5386 = vmatprep.subr.bf16.mxu1 %v8187_v18  ;;  %v8272_v17 = vld [vmem:[#allocation5 + $0x13e0] ss:$16 sps:$4 sm:$0xff]   ;;  %v8275_v18 = vld [vmem:[#allocation5 + $0x13e8] ss:$16 sps:$4 sm:$0xff]  }
 0x2df   :  { %4903 = vmatmul.mubr.bf16.vlgmr.msra.gmra.mrb[0].mxu0 %v8179_v19  ;;  %5376 = vmatmul.mubr.bf16.vlgmr.msra.gmra.mrb[0].mxu1 %v8179_v19  ;;  %v8283_v19 = vld [vmem:[#allocation5 + $0x1404] ss:$16 sps:$4 sm:$0xff]  }
 0x2e0   :  { %4914 = vmatpush1.bf16.msra.mxu0 %v8182_v20  ;;  %5387 = vmatpush1.bf16.msra.mxu1 %v8185_v21  ;;  %v8286_v20 = vld [vmem:[#allocation5 + $0x140c] ss:$16 sps:$4 sm:$0xff]   ;;  %v8278_v21 = vld [vmem:[%s8975_s1 + $0x48] ss:$88 sps:$4 sm:$0xff]  }
 0x2e1   :  { %4915 = vmatprep.subr.bf16.mxu0 %v8190_v22  ;;  %5388 = vmatprep.subr.bf16.mxu1 %v8193_v23  ;;  %v8281_v22 = vld [vmem:[#allocation5 + $0x1400] ss:$16 sps:$4 sm:$0xff]   ;;  %v8284_v23 = vld [vmem:[#allocation5 + $0x1408] ss:$16 sps:$4 sm:$0xff]  }
 0x2e2   :  { %4945 = vmatprep.mubr.bf16.mxu0 %v8280_v24  ;;  %5418 = vmatprep.mubr.bf16.mxu1 %v8280_v24  ;;  %v8289_v24 = vld [vmem:[#allocation5 + $0x1424] ss:$16 sps:$4 sm:$0xff]  }
 0x2e4   :  { %4916 = vmatpush1.bf16.msra.mxu0 %v8188_v25  ;;  %5389 = vmatpush1.bf16.msra.mxu1 %v8191_v26  ;;  %v8292_v25 = vld [vmem:[#allocation5 + $0x142c] ss:$16 sps:$4 sm:$0xff]  }
 0x2e5   :  { %4917 = vmatprep.subr.bf16.mxu0 %v8196_v27  ;;  %5390 = vmatprep.subr.bf16.mxu1 %v8199_v28  ;;  %v8379_v26 = vld [vmem:[%s8975_s1 + $0x54] ss:$88 sps:$4 sm:$0xff]   ;;  %v8287_v27 = vld [vmem:[#allocation5 + $0x1420] ss:$16 sps:$4 sm:$0xff]   ;;  %v8290_v28 = vld [vmem:[#allocation5 + $0x1428] ss:$16 sps:$4 sm:$0xff]  }
 0x2e8   :  { %4918 = vmatpush1.bf16.msra.mxu0 %v8194_v29  ;;  %5391 = vmatpush1.bf16.msra.mxu1 %v8197_v30  ;;  %v8295_v29 = vld [vmem:[#allocation5 + $0x1444] ss:$16 sps:$4 sm:$0xff]   ;;  %v8298_v30 = vld [vmem:[#allocation5 + $0x144c] ss:$16 sps:$4 sm:$0xff]  }
 0x2e9   :  { %4919 = vmatprep.subr.bf16.mxu0 %v8202_v31  ;;  %5392 = vmatprep.subr.bf16.mxu1 %v8205_v32  ;;  %v8293_v31 = vld [vmem:[#allocation5 + $0x1440] ss:$16 sps:$4 sm:$0xff]   ;;  %v8296_v32 = vld [vmem:[#allocation5 + $0x1448] ss:$16 sps:$4 sm:$0xff]  }
 0x2ec   :  { %4920 = vmatpush1.bf16.msra.mxu0 %v8200_v33  ;;  %5393 = vmatpush1.bf16.msra.mxu1 %v8203_v34  ;;  %v8301_v33 = vld [vmem:[#allocation5 + $0x1464] ss:$16 sps:$4 sm:$0xff]   ;;  %v8304_v34 = vld [vmem:[#allocation5 + $0x146c] ss:$16 sps:$4 sm:$0xff]  }
 0x2ed   :  { %4921 = vmatprep.subr.bf16.mxu0 %v8208_v35  ;;  %5394 = vmatprep.subr.bf16.mxu1 %v8211_v36  ;;  %v8299_v35 = vld [vmem:[#allocation5 + $0x1460] ss:$16 sps:$4 sm:$0xff]   ;;  %v8302_v36 = vld [vmem:[#allocation5 + $0x1468] ss:$16 sps:$4 sm:$0xff]  }
 0x2f0   :  { %4922 = vmatpush1.bf16.msra.mxu0 %v8206_v37  ;;  %5395 = vmatpush1.bf16.msra.mxu1 %v8209_v38  ;;  %v8307_v37 = vld [vmem:[#allocation5 + $0x1484] ss:$16 sps:$4 sm:$0xff]   ;;  %v8310_v38 = vld [vmem:[#allocation5 + $0x148c] ss:$16 sps:$4 sm:$0xff]  }
 0x2f1   :  { %4923 = vmatprep.subr.bf16.mxu0 %v8214_v39  ;;  %5396 = vmatprep.subr.bf16.mxu1 %v8217_v40  ;;  %v8305_v39 = vld [vmem:[#allocation5 + $0x1480] ss:$16 sps:$4 sm:$0xff]   ;;  %v8308_v40 = vld [vmem:[#allocation5 + $0x1488] ss:$16 sps:$4 sm:$0xff]  }
 0x2f4   :  { %4924 = vmatpush1.bf16.msra.mxu0 %v8212_v41  ;;  %5397 = vmatpush1.bf16.msra.mxu1 %v8215_v42  ;;  %v8313_v41 = vld [vmem:[#allocation5 + $0x14a4] ss:$16 sps:$4 sm:$0xff]   ;;  %v8316_v42 = vld [vmem:[#allocation5 + $0x14ac] ss:$16 sps:$4 sm:$0xff]  }
 0x2f5   :  { %4925 = vmatprep.subr.bf16.mxu0 %v8220_v43  ;;  %5398 = vmatprep.subr.bf16.mxu1 %v8223_v44  ;;  %v8311_v43 = vld [vmem:[#allocation5 + $0x14a0] ss:$16 sps:$4 sm:$0xff]   ;;  %v8314_v44 = vld [vmem:[#allocation5 + $0x14a8] ss:$16 sps:$4 sm:$0xff]  }
 0x2f8   :  { %4926 = vmatpush1.bf16.msra.mxu0 %v8218_v45  ;;  %5399 = vmatpush1.bf16.msra.mxu1 %v8221_v46  ;;  %v8319_v45 = vld [vmem:[#allocation5 + $0x14c4] ss:$16 sps:$4 sm:$0xff]   ;;  %v8322_v46 = vld [vmem:[#allocation5 + $0x14cc] ss:$16 sps:$4 sm:$0xff]  }
 0x2f9   :  { %4927 = vmatprep.subr.bf16.mxu0 %v8226_v47  ;;  %5400 = vmatprep.subr.bf16.mxu1 %v8229_v48  ;;  %v8317_v47 = vld [vmem:[#allocation5 + $0x14c0] ss:$16 sps:$4 sm:$0xff]   ;;  %v8320_v48 = vld [vmem:[#allocation5 + $0x14c8] ss:$16 sps:$4 sm:$0xff]  }
 0x2fc   :  { %4928 = vmatpush1.bf16.msra.mxu0 %v8224_v49  ;;  %5401 = vmatpush1.bf16.msra.mxu1 %v8227_v50  ;;  %v8325_v49 = vld [vmem:[#allocation5 + $0x14e4] ss:$16 sps:$4 sm:$0xff]   ;;  %v8328_v50 = vld [vmem:[#allocation5 + $0x14ec] ss:$16 sps:$4 sm:$0xff]  }
 0x2fd   :  { %4929 = vmatprep.subr.bf16.mxu0 %v8232_v51  ;;  %5402 = vmatprep.subr.bf16.mxu1 %v8235_v52  ;;  %v8323_v51 = vld [vmem:[#allocation5 + $0x14e0] ss:$16 sps:$4 sm:$0xff]   ;;  %v8326_v52 = vld [vmem:[#allocation5 + $0x14e8] ss:$16 sps:$4 sm:$0xff]  }
 0x300   :  { %4930 = vmatpush1.bf16.msra.mxu0 %v8230_v53  ;;  %5403 = vmatpush1.bf16.msra.mxu1 %v8233_v54  ;;  %v8331_v53 = vld [vmem:[#allocation5 + $0x1504] ss:$16 sps:$4 sm:$0xff]   ;;  %v8334_v54 = vld [vmem:[#allocation5 + $0x150c] ss:$16 sps:$4 sm:$0xff]  }
 0x301   :  { %4931 = vmatprep.subr.bf16.mxu0 %v8238_v55  ;;  %5404 = vmatprep.subr.bf16.mxu1 %v8241_v56  ;;  %v8329_v55 = vld [vmem:[#allocation5 + $0x1500] ss:$16 sps:$4 sm:$0xff]   ;;  %v8332_v56 = vld [vmem:[#allocation5 + $0x1508] ss:$16 sps:$4 sm:$0xff]  }
 0x304   :  { %4932 = vmatpush1.bf16.msra.mxu0 %v8236_v57  ;;  %5405 = vmatpush1.bf16.msra.mxu1 %v8239_v58  ;;  %v8337_v57 = vld [vmem:[#allocation5 + $0x1524] ss:$16 sps:$4 sm:$0xff]   ;;  %v8340_v58 = vld [vmem:[#allocation5 + $0x152c] ss:$16 sps:$4 sm:$0xff]  }
 0x305   :  { %4933 = vmatprep.subr.bf16.mxu0 %v8244_v59  ;;  %5406 = vmatprep.subr.bf16.mxu1 %v8247_v60  ;;  %v8335_v59 = vld [vmem:[#allocation5 + $0x1520] ss:$16 sps:$4 sm:$0xff]   ;;  %v8338_v60 = vld [vmem:[#allocation5 + $0x1528] ss:$16 sps:$4 sm:$0xff]  }
 0x308   :  { %4934 = vmatpush1.bf16.msra.mxu0 %v8242_v61  ;;  %5407 = vmatpush1.bf16.msra.mxu1 %v8245_v62  ;;  %v8343_v61 = vld [vmem:[#allocation5 + $0x1544] ss:$16 sps:$4 sm:$0xff]   ;;  %v8346_v62 = vld [vmem:[#allocation5 + $0x154c] ss:$16 sps:$4 sm:$0xff]  }
 0x309   :  { %4935 = vmatprep.subr.bf16.mxu0 %v8250_v63  ;;  %5408 = vmatprep.subr.bf16.mxu1 %v8253_v0  ;;  %v8341_v63 = vld [vmem:[#allocation5 + $0x1540] ss:$16 sps:$4 sm:$0xff]   ;;  %v8344_v0 = vld [vmem:[#allocation5 + $0x1548] ss:$16 sps:$4 sm:$0xff]  }
 0x30c   :  { %4936 = vmatpush1.bf16.msra.mxu0 %v8248_v1  ;;  %5409 = vmatpush1.bf16.msra.mxu1 %v8251_v2  ;;  %v8349_v1 = vld [vmem:[#allocation5 + $0x1564] ss:$16 sps:$4 sm:$0xff]   ;;  %v8352_v2 = vld [vmem:[#allocation5 + $0x156c] ss:$16 sps:$4 sm:$0xff]  }
 0x30d   :  { %4937 = vmatprep.subr.bf16.mxu0 %v8256_v3  ;;  %5410 = vmatprep.subr.bf16.mxu1 %v8259_v4  ;;  %v8347_v3 = vld [vmem:[#allocation5 + $0x1560] ss:$16 sps:$4 sm:$0xff]   ;;  %v8350_v4 = vld [vmem:[#allocation5 + $0x1568] ss:$16 sps:$4 sm:$0xff]  }
 0x310   :  { %4938 = vmatpush1.bf16.msra.mxu0 %v8254_v5  ;;  %5411 = vmatpush1.bf16.msra.mxu1 %v8257_v6  ;;  %v8355_v5 = vld [vmem:[#allocation5 + $0x1584] ss:$16 sps:$4 sm:$0xff]   ;;  %v8358_v6 = vld [vmem:[#allocation5 + $0x158c] ss:$16 sps:$4 sm:$0xff]  }
 0x311   :  { %4939 = vmatprep.subr.bf16.mxu0 %v8262_v7  ;;  %5412 = vmatprep.subr.bf16.mxu1 %v8265_v8  ;;  %v8353_v7 = vld [vmem:[#allocation5 + $0x1580] ss:$16 sps:$4 sm:$0xff]   ;;  %v8356_v8 = vld [vmem:[#allocation5 + $0x1588] ss:$16 sps:$4 sm:$0xff]  }
 0x314   :  { %4940 = vmatpush1.bf16.msra.mxu0 %v8260_v9  ;;  %5413 = vmatpush1.bf16.msra.mxu1 %v8263_v10  ;;  %v8361_v9 = vld [vmem:[#allocation5 + $0x15a4] ss:$16 sps:$4 sm:$0xff]   ;;  %v8364_v10 = vld [vmem:[#allocation5 + $0x15ac] ss:$16 sps:$4 sm:$0xff]  }
 0x315   :  { %4941 = vmatprep.subr.bf16.mxu0 %v8268_v11  ;;  %5414 = vmatprep.subr.bf16.mxu1 %v8271_v12  ;;  %v8359_v11 = vld [vmem:[#allocation5 + $0x15a0] ss:$16 sps:$4 sm:$0xff]   ;;  %v8362_v12 = vld [vmem:[#allocation5 + $0x15a8] ss:$16 sps:$4 sm:$0xff]  }
 0x318   :  { %4942 = vmatpush1.bf16.msra.mxu0 %v8266_v13  ;;  %5415 = vmatpush1.bf16.msra.mxu1 %v8269_v14  ;;  %v8367_v13 = vld [vmem:[#allocation5 + $0x15c4] ss:$16 sps:$4 sm:$0xff]   ;;  %v8370_v14 = vld [vmem:[#allocation5 + $0x15cc] ss:$16 sps:$4 sm:$0xff]  }
 0x319   :  { %4943 = vmatprep.subr.bf16.mxu0 %v8274_v15  ;;  %5416 = vmatprep.subr.bf16.mxu1 %v8277_v16  ;;  %v8365_v15 = vld [vmem:[#allocation5 + $0x15c0] ss:$16 sps:$4 sm:$0xff]   ;;  %v8368_v16 = vld [vmem:[#allocation5 + $0x15c8] ss:$16 sps:$4 sm:$0xff]  }
 0x31c   :  { %4944 = vmatpush1.bf16.msra.mxu0 %v8272_v17  ;;  %5417 = vmatpush1.bf16.msra.mxu1 %v8275_v18  ;;  %v8373_v17 = vld [vmem:[#allocation5 + $0x15e4] ss:$16 sps:$4 sm:$0xff]   ;;  %v8376_v18 = vld [vmem:[#allocation5 + $0x15ec] ss:$16 sps:$4 sm:$0xff]  }
 0x31d   :  { %4956 = vmatprep.subr.bf16.mxu0 %v8283_v19  ;;  %5429 = vmatprep.subr.bf16.mxu1 %v8286_v20  ;;  %v8371_v19 = vld [vmem:[#allocation5 + $0x15e0] ss:$16 sps:$4 sm:$0xff]   ;;  %v8374_v20 = vld [vmem:[#allocation5 + $0x15e8] ss:$16 sps:$4 sm:$0xff]  }
 0x31f   :  { %4946 = vmatmul.mubr.bf16.vlgmr.msra.gmra.mrb[0].mxu0 %v8278_v21  ;;  %5419 = vmatmul.mubr.bf16.vlgmr.msra.gmra.mrb[0].mxu1 %v8278_v21  ;;  %v8382_v21 = vld [vmem:[#allocation8 + $0x4] ss:$8 sps:$4 sm:$0xff]  }
 0x320   :  { %4957 = vmatpush1.bf16.msra.mxu0 %v8281_v22  ;;  %5430 = vmatpush1.bf16.msra.mxu1 %v8284_v23  ;;  %v8377_v22 = vld [vmem:[%s8975_s1 + $0x50] ss:$88 sps:$4 sm:$0xff]   ;;  %v8380_v23 = vld [vmem:[#allocation8] ss:$8 sps:$4 sm:$0xff]   ;;  %s5472_s1 = sld [smem:[#allocation2]] }
 0x321   :  { %4958 = vmatprep.subr.bf16.mxu0 %v8289_v24  ;;  %5431 = vmatprep.subr.bf16.mxu1 %v8292_v25  ;;  %v8385_v24 = vld [vmem:[#allocation8 + $0x14] ss:$8 sps:$4 sm:$0xff]   ;;  %v8383_v25 = vld [vmem:[#allocation8 + $0x10] ss:$8 sps:$4 sm:$0xff]  }
 0x322   :  { %4988 = vmatprep.mubr.bf16.mxu0 %v8379_v26  ;;  %5461 = vmatprep.mubr.bf16.mxu1 %v8379_v26  ;;  %v8388_v26 = vld [vmem:[#allocation8 + $0x24] ss:$8 sps:$4 sm:$0xff]  }
 0x324   :  { %4959 = vmatpush1.bf16.msra.mxu0 %v8287_v27  ;;  %5432 = vmatpush1.bf16.msra.mxu1 %v8290_v28  ;;  %v8386_v27 = vld [vmem:[#allocation8 + $0x20] ss:$8 sps:$4 sm:$0xff]   ;;  %v8391_v28 = vld [vmem:[#allocation8 + $0x34] ss:$8 sps:$4 sm:$0xff]  }
 0x325   :  { %4960 = vmatprep.subr.bf16.mxu0 %v8295_v29  ;;  %5433 = vmatprep.subr.bf16.mxu1 %v8298_v30  ;;  %v8389_v29 = vld [vmem:[#allocation8 + $0x30] ss:$8 sps:$4 sm:$0xff]   ;;  %v8394_v30 = vld [vmem:[#allocation8 + $0x44] ss:$8 sps:$4 sm:$0xff]  }
 0x328   :  { %4961 = vmatpush1.bf16.msra.mxu0 %v8293_v31  ;;  %5434 = vmatpush1.bf16.msra.mxu1 %v8296_v32  ;;  %v8392_v31 = vld [vmem:[#allocation8 + $0x40] ss:$8 sps:$4 sm:$0xff]   ;;  %v8397_v32 = vld [vmem:[#allocation8 + $0x54] ss:$8 sps:$4 sm:$0xff]  }
 0x329   :  { %4962 = vmatprep.subr.bf16.mxu0 %v8301_v33  ;;  %5435 = vmatprep.subr.bf16.mxu1 %v8304_v34  ;;  %v8395_v33 = vld [vmem:[#allocation8 + $0x50] ss:$8 sps:$4 sm:$0xff]   ;;  %v8400_v34 = vld [vmem:[#allocation8 + $0x64] ss:$8 sps:$4 sm:$0xff]  }
 0x32c   :  { %4963 = vmatpush1.bf16.msra.mxu0 %v8299_v35  ;;  %5436 = vmatpush1.bf16.msra.mxu1 %v8302_v36  ;;  %v8398_v35 = vld [vmem:[#allocation8 + $0x60] ss:$8 sps:$4 sm:$0xff]   ;;  %v8403_v36 = vld [vmem:[#allocation8 + $0x74] ss:$8 sps:$4 sm:$0xff]  }
 0x32d   :  { %4964 = vmatprep.subr.bf16.mxu0 %v8307_v37  ;;  %5437 = vmatprep.subr.bf16.mxu1 %v8310_v38  ;;  %v8401_v37 = vld [vmem:[#allocation8 + $0x70] ss:$8 sps:$4 sm:$0xff]   ;;  %v8406_v38 = vld [vmem:[#allocation8 + $0x84] ss:$8 sps:$4 sm:$0xff]  }
 0x330   :  { %4965 = vmatpush1.bf16.msra.mxu0 %v8305_v39  ;;  %5438 = vmatpush1.bf16.msra.mxu1 %v8308_v40  ;;  %v8404_v39 = vld [vmem:[#allocation8 + $0x80] ss:$8 sps:$4 sm:$0xff]   ;;  %v8409_v40 = vld [vmem:[#allocation8 + $0x94] ss:$8 sps:$4 sm:$0xff]  }
 0x331   :  { %4966 = vmatprep.subr.bf16.mxu0 %v8313_v41  ;;  %5439 = vmatprep.subr.bf16.mxu1 %v8316_v42  ;;  %v8407_v41 = vld [vmem:[#allocation8 + $0x90] ss:$8 sps:$4 sm:$0xff]   ;;  %v8412_v42 = vld [vmem:[#allocation8 + $0xa4] ss:$8 sps:$4 sm:$0xff]  }
 0x334   :  { %4967 = vmatpush1.bf16.msra.mxu0 %v8311_v43  ;;  %5440 = vmatpush1.bf16.msra.mxu1 %v8314_v44  ;;  %v8410_v43 = vld [vmem:[#allocation8 + $0xa0] ss:$8 sps:$4 sm:$0xff]   ;;  %v8415_v44 = vld [vmem:[#allocation8 + $0xb4] ss:$8 sps:$4 sm:$0xff]  }
 0x335   :  { %4968 = vmatprep.subr.bf16.mxu0 %v8319_v45  ;;  %5441 = vmatprep.subr.bf16.mxu1 %v8322_v46  ;;  %v8413_v45 = vld [vmem:[#allocation8 + $0xb0] ss:$8 sps:$4 sm:$0xff]   ;;  %v8418_v46 = vld [vmem:[#allocation8 + $0xc4] ss:$8 sps:$4 sm:$0xff]  }
 0x338   :  { %4969 = vmatpush1.bf16.msra.mxu0 %v8317_v47  ;;  %5442 = vmatpush1.bf16.msra.mxu1 %v8320_v48  ;;  %v8416_v47 = vld [vmem:[#allocation8 + $0xc0] ss:$8 sps:$4 sm:$0xff]   ;;  %v8421_v48 = vld [vmem:[#allocation8 + $0xd4] ss:$8 sps:$4 sm:$0xff]  }
 0x339   :  { %4970 = vmatprep.subr.bf16.mxu0 %v8325_v49  ;;  %5443 = vmatprep.subr.bf16.mxu1 %v8328_v50  ;;  %v8419_v49 = vld [vmem:[#allocation8 + $0xd0] ss:$8 sps:$4 sm:$0xff]   ;;  %v8424_v50 = vld [vmem:[#allocation8 + $0xe4] ss:$8 sps:$4 sm:$0xff]  }
 0x33c   :  { %4971 = vmatpush1.bf16.msra.mxu0 %v8323_v51  ;;  %5444 = vmatpush1.bf16.msra.mxu1 %v8326_v52  ;;  %v8422_v51 = vld [vmem:[#allocation8 + $0xe0] ss:$8 sps:$4 sm:$0xff]   ;;  %v8427_v52 = vld [vmem:[#allocation8 + $0xf4] ss:$8 sps:$4 sm:$0xff]  }
 0x33d   :  { %4972 = vmatprep.subr.bf16.mxu0 %v8331_v53  ;;  %5445 = vmatprep.subr.bf16.mxu1 %v8334_v54  ;;  %v8425_v53 = vld [vmem:[#allocation8 + $0xf0] ss:$8 sps:$4 sm:$0xff]   ;;  %v8430_v54 = vld [vmem:[#allocation8 + $0x104] ss:$8 sps:$4 sm:$0xff]  }
 0x340   :  { %4973 = vmatpush1.bf16.msra.mxu0 %v8329_v55  ;;  %5446 = vmatpush1.bf16.msra.mxu1 %v8332_v56  ;;  %v8476_v55 = vld [vmem:[#allocation11 + $0x40] sm:$0xff]  }
 0x341   :  { %4974 = vmatprep.subr.bf16.mxu0 %v8337_v57  ;;  %5447 = vmatprep.subr.bf16.mxu1 %v8340_v58  ;;  %v8477_v56 = vld [vmem:[#allocation11] sm:$0xff]   ;;  %v8478_v57 = vld [vmem:[#allocation11 + $0x48] sm:$0xff]  }
 0x342   :  { %v8479_v58 = vld [vmem:[#allocation11 + $0x8] sm:$0xff]  }
 0x344   :  { %4975 = vmatpush1.bf16.msra.mxu0 %v8335_v59  ;;  %5448 = vmatpush1.bf16.msra.mxu1 %v8338_v60  ;;  %v8480_v59 = vld [vmem:[#allocation11 + $0x50] sm:$0xff]  }
 0x345   :  { %4976 = vmatprep.subr.bf16.mxu0 %v8343_v61  ;;  %5449 = vmatprep.subr.bf16.mxu1 %v8346_v62  ;;  %v8481_v60 = vld [vmem:[#allocation11 + $0x10] sm:$0xff]   ;;  %v8482_v61 = vld [vmem:[#allocation11 + $0x58] sm:$0xff]  }
 0x346   :  { %v8483_v62 = vld [vmem:[#allocation11 + $0x18] sm:$0xff]  }
 0x348   :  { %4977 = vmatpush1.bf16.msra.mxu0 %v8341_v63  ;;  %5450 = vmatpush1.bf16.msra.mxu1 %v8344_v0  ;;  %v8484_v63 = vld [vmem:[#allocation11 + $0x60] sm:$0xff]  }
 0x349   :  { %4978 = vmatprep.subr.bf16.mxu0 %v8349_v1  ;;  %5451 = vmatprep.subr.bf16.mxu1 %v8352_v2  ;;  %v8485_v0 = vld [vmem:[#allocation11 + $0x20] sm:$0xff]   ;;  %v876_v1 = vlaneseq }
 0x34b   :  { %v8944_v2 = vshrl.u32 %v876_v1, 7  ;;  %v8452_v1 = vld [vmem:[#allocation8 + $0x180] ss:$8 sps:$4 sm:$0xff]  }
 0x34c   :  { %4979 = vmatpush1.bf16.msra.mxu0 %v8347_v3  ;;  %5452 = vmatpush1.bf16.msra.mxu1 %v8350_v4 }
 0x34d   :  { %4980 = vmatprep.subr.bf16.mxu0 %v8355_v5  ;;  %5453 = vmatprep.subr.bf16.mxu1 %v8358_v6  ;;  %v878_v3 = vsub.s32 0, %v8944_v2  ;;  %v886_v4 = vsub.s32 2, %v8944_v2  ;;  %v874_v5 = vld [vmem:[#allocation6] sm:$0xf]  ;;  %v882_v6 = vsub.s32 1, %v8944_v2 }
 0x350   :  { %4981 = vmatpush1.bf16.msra.mxu0 %v8353_v7  ;;  %5454 = vmatpush1.bf16.msra.mxu1 %v8356_v8  ;;  %v890_v7 = vsub.s32 3, %v8944_v2  ;;  %v879_v8 = vrot.slane %v874_v5, %v878_v3 }
 0x351   :  { %4982 = vmatprep.subr.bf16.mxu0 %v8361_v9  ;;  %5455 = vmatprep.subr.bf16.mxu1 %v8364_v10  ;;  %v887_v9 = vrot.slane %v874_v5, %v886_v4  ;;  %v883_v10 = vrot.slane %v874_v5, %v882_v6  ;;  %v8457_v4 = vld [vmem:[#allocation8 + $0x194] ss:$8 sps:$4 sm:$0xff]  }
 0x354   :  { %4983 = vmatpush1.bf16.msra.mxu0 %v8359_v11  ;;  %5456 = vmatpush1.bf16.msra.mxu1 %v8362_v12  ;;  %v891_v11 = vrot.slane %v874_v5, %v890_v7  ;;  %v8455_v5 = vld [vmem:[#allocation8 + $0x190] ss:$8 sps:$4 sm:$0xff]   ;;  %v8460_v7 = vld [vmem:[#allocation8 + $0x1a4] ss:$8 sps:$4 sm:$0xff]  }
 0x355   :  { %4984 = vmatprep.subr.bf16.mxu0 %v8367_v13  ;;  %5457 = vmatprep.subr.bf16.mxu1 %v8370_v14  ;;  %v5481_v13 = vstv %s5472_s1 }
 0x358   :  { %4985 = vmatpush1.bf16.msra.mxu0 %v8365_v15  ;;  %5458 = vmatpush1.bf16.msra.mxu1 %v8368_v16 }
 0x359   :  { %4986 = vmatprep.subr.bf16.mxu0 %v8373_v17  ;;  %5459 = vmatprep.subr.bf16.mxu1 %v8376_v18 }
 0x35c   :  { %4987 = vmatpush1.bf16.msra.mxu0 %v8371_v19  ;;  %5460 = vmatpush1.bf16.msra.mxu1 %v8374_v20 }
 0x35d   :  { %5898 = vmatprep.subr.bf16.mxu0 %v8382_v21  ;;  %7127 = vmatprep.subr.bf16.mxu1 %v8476_v55  ;;  %v8437_v55 = vld [vmem:[#allocation8 + $0x130] ss:$8 sps:$4 sm:$0xff]  }
 0x35f   :  { %4989 = vmatmul.mubr.bf16.vlgmr.msra.gmra.mrb[0].mxu0 %v8377_v22  ;;  %5462 = vmatmul.mubr.bf16.vlgmr.msra.gmra.mrb[0].mxu1 %v8377_v22 }
 0x360   :  { %5899 = vmatpush1.bf16.msra.mxu0 %v8380_v23  ;;  %7128 = vmatpush3.bf16.msra.mxu1 %v8477_v56  ;;  %v8442_v56 = vld [vmem:[#allocation8 + $0x144] ss:$8 sps:$4 sm:$0xff]  }
 0x361   :  { %5900 = vmatprep.subr.bf16.mxu0 %v8385_v24  ;;  %7129 = vmatprep.subr.bf16.mxu1 %v8478_v57  ;;  %v8440_v57 = vld [vmem:[#allocation8 + $0x140] ss:$8 sps:$4 sm:$0xff]  }
 0x364   :  { %5901 = vmatpush1.bf16.msra.mxu0 %v8383_v25  ;;  %7130 = vmatpush3.bf16.msra.mxu1 %v8479_v58  ;;  %v8445_v58 = vld [vmem:[#allocation8 + $0x154] ss:$8 sps:$4 sm:$0xff]  }
 0x365   :  { %5902 = vmatprep.subr.bf16.mxu0 %v8388_v26  ;;  %7131 = vmatprep.subr.bf16.mxu1 %v8480_v59  ;;  %v8443_v59 = vld [vmem:[#allocation8 + $0x150] ss:$8 sps:$4 sm:$0xff]  }
 0x368   :  { %5903 = vmatpush1.bf16.msra.mxu0 %v8386_v27  ;;  %7132 = vmatpush3.bf16.msra.mxu1 %v8481_v60  ;;  %v8448_v60 = vld [vmem:[#allocation8 + $0x164] ss:$8 sps:$4 sm:$0xff]  }
 0x369   :  { %5904 = vmatprep.subr.bf16.mxu0 %v8391_v28  ;;  %7133 = vmatprep.subr.bf16.mxu1 %v8482_v61  ;;  %v8446_v61 = vld [vmem:[#allocation8 + $0x160] ss:$8 sps:$4 sm:$0xff]  }
 0x36c   :  { %5905 = vmatpush1.bf16.msra.mxu0 %v8389_v29  ;;  %7134 = vmatpush3.bf16.msra.mxu1 %v8483_v62  ;;  %v8451_v62 = vld [vmem:[#allocation8 + $0x174] ss:$8 sps:$4 sm:$0xff]  }
 0x36d   :  { %5906 = vmatprep.subr.bf16.mxu0 %v8394_v30  ;;  %7135 = vmatprep.subr.bf16.mxu1 %v8484_v63  ;;  %v8449_v63 = vld [vmem:[#allocation8 + $0x170] ss:$8 sps:$4 sm:$0xff]  }
 0x370   :  { %5907 = vmatpush1.bf16.msra.mxu0 %v8392_v31  ;;  %7136 = vmatpush3.bf16.msra.mxu1 %v8485_v0  ;;  %v8454_v0 = vld [vmem:[#allocation8 + $0x184] ss:$8 sps:$4 sm:$0xff]  }
 0x371   :  { %5908 = vmatprep.subr.bf16.mxu0 %v8397_v32 }
 0x374   :  { %5909 = vmatpush1.bf16.msra.mxu0 %v8395_v33 }
 0x375   :  { %5910 = vmatprep.subr.bf16.mxu0 %v8400_v34 }
 0x378   :  { %5911 = vmatpush1.bf16.msra.mxu0 %v8398_v35 }
 0x379   :  { %5912 = vmatprep.subr.bf16.mxu0 %v8403_v36 }
 0x37c   :  { %5913 = vmatpush1.bf16.msra.mxu0 %v8401_v37 }
 0x37d   :  { %5914 = vmatprep.subr.bf16.mxu0 %v8406_v38 }
 0x380   :  { %5915 = vmatpush1.bf16.msra.mxu0 %v8404_v39 }
 0x381   :  { %5916 = vmatprep.subr.bf16.mxu0 %v8409_v40 }
 0x384   :  { %5917 = vmatpush1.bf16.msra.mxu0 %v8407_v41 }
 0x385   :  { %5918 = vmatprep.subr.bf16.mxu0 %v8412_v42 }
 0x388   :  { %5919 = vmatpush1.bf16.msra.mxu0 %v8410_v43 }
 0x389   :  { %5920 = vmatprep.subr.bf16.mxu0 %v8415_v44 }
 0x38c   :  { %5921 = vmatpush1.bf16.msra.mxu0 %v8413_v45 }
 0x38d   :  { %5922 = vmatprep.subr.bf16.mxu0 %v8418_v46 }
 0x390   :  { %5923 = vmatpush1.bf16.msra.mxu0 %v8416_v47 }
 0x391   :  { %5924 = vmatprep.subr.bf16.mxu0 %v8421_v48  ;;  %v8428_v48 = vld [vmem:[#allocation8 + $0x100] ss:$8 sps:$4 sm:$0xff]  }
 0x394   :  { %5925 = vmatpush1.bf16.msra.mxu0 %v8419_v49 }
 0x395   :  { %5926 = vmatprep.subr.bf16.mxu0 %v8424_v50  ;;  %v8433_v50 = vld [vmem:[#allocation8 + $0x114] ss:$8 sps:$4 sm:$0xff]  }
 0x398   :  { %5927 = vmatpush1.bf16.msra.mxu0 %v8422_v51  ;;  %v8431_v51 = vld [vmem:[#allocation8 + $0x110] ss:$8 sps:$4 sm:$0xff]  }
 0x399   :  { %5928 = vmatprep.subr.bf16.mxu0 %v8427_v52  ;;  %v8436_v52 = vld [vmem:[#allocation8 + $0x124] ss:$8 sps:$4 sm:$0xff]  }
 0x39c   :  { %5929 = vmatpush1.bf16.msra.mxu0 %v8425_v53  ;;  %v8434_v53 = vld [vmem:[#allocation8 + $0x120] ss:$8 sps:$4 sm:$0xff]  }
 0x39d   :  { %5941 = vmatprep.subr.bf16.mxu0 %v8430_v54  ;;  %v8439_v54 = vld [vmem:[#allocation8 + $0x134] ss:$8 sps:$4 sm:$0xff]  }
 0x432   :  { %v4990_v12 = vpop.f32.mrb[0].mxu0  ;;  %v5463_v14 = vpop.f32.mrb[0].mxu1 }
 0x433   :  { %v7178_v15 = vadd.f32 %v4990_v12, %v879_v8  ;;  %v7182_v16 = vadd.f32 %v5463_v14, %v887_v9  ;;  %v4992_v17 = vpop.f32.mrb[1].mxu0  ;;  %v5465_v18 = vpop.f32.mrb[1].mxu1  ;;  %v8464_v12 = vld [vmem:[#allocation8 + $0x1c0] ss:$8 sps:$4 sm:$0xff]   ;;  %v8467_v14 = vld [vmem:[#allocation8 + $0x1d0] ss:$8 sps:$4 sm:$0xff]  }
 0x434   :  { %v7179_v19 = vadd.f32 %v4992_v17, %v883_v10  ;;  %v7183_v20 = vadd.f32 %v5465_v18, %v891_v11  ;;  %v4994_v21 = vpop.f32.mrb[2].mxu0  ;;  %v5467_v22 = vpop.f32.mrb[2].mxu1  ;;  %v8475_v17 = vld [vmem:[#allocation8 + $0x1f4] ss:$8 sps:$4 sm:$0xff]   ;;  %v8473_v18 = vld [vmem:[#allocation8 + $0x1f0] ss:$8 sps:$4 sm:$0xff]  }
 0x435   :  { %vm5473_vm0 = vcmp.ge.f32.partialorder %v7178_v15, 0.0  ;;  %v5482_v23 = vmul.f32 %v7178_v15, %v5481_v13  ;;  %vm5475_vm1 = vcmp.ge.f32.partialorder %v7182_v16, 0.0  ;;  %v5484_v24 = vmul.f32 %v7182_v16, %v5481_v13  ;;  %v4996_v25 = vpop.f32.mrb[3].mxu0  ;;  %v5469_v26 = vpop.f32.mrb[3].mxu1 }
 0x436   :  { %vm5474_vm2 = vcmp.ge.f32.partialorder %v7179_v19, 0.0  ;;  %v5483_v27 = vmul.f32 %v7179_v19, %v5481_v13  ;;  %v5485_v29 = vmul.f32 %v7183_v20, %v5481_v13  ;;  %v7180_v30 = vadd.f32 %v4994_v21, %v879_v8  ;;  %v8458_v8 = vld [vmem:[#allocation8 + $0x1a0] ss:$8 sps:$4 sm:$0xff]   ;;  %v8488_v21 = vld [vmem:[#allocation11 + $0x70] sm:$0xff]  }
 0x437   :  { %v8954_v28 = vsel %vm5475_vm1, %v7182_v16, %v5484_v24  ;;  %v7184_v31 = vadd.f32 %v5467_v22, %v887_v9  ;;  %v5490_v32 = vsel %vm5473_vm0, %v7178_v15, %v5482_v23  ;;  %vm5476_vm3 = vcmp.ge.f32.partialorder %v7183_v20, 0.0  ;;  %v8463_v9 = vld [vmem:[#allocation8 + $0x1b4] ss:$8 sps:$4 sm:$0xff]   ;;  %v8472_v15 = vld [vmem:[#allocation8 + $0x1e4] ss:$8 sps:$4 sm:$0xff]  }
 0x438   :  { %v7181_v33 = vadd.f32 %v4996_v25, %v883_v10  ;;  %v7185_v34 = vadd.f32 %v5469_v26, %v891_v11  ;;  %vm5477_vm4 = vcmp.ge.f32.partialorder %v7180_v30, 0.0  ;;  %v5486_v35 = vmul.f32 %v7180_v30, %v5481_v13  ;;  %v8461_v10 = vld [vmem:[#allocation8 + $0x1b0] ss:$8 sps:$4 sm:$0xff]   ;;  %v8466_v11 = vld [vmem:[#allocation8 + $0x1c4] ss:$8 sps:$4 sm:$0xff]  }
 0x439   :  { %vm5479_vm5 = vcmp.ge.f32.partialorder %v7184_v31, 0.0  ;;  %v5488_v36 = vmul.f32 %v7184_v31, %v5481_v13  ;;  %v5491_v41 = vsel %vm5474_vm2, %v7179_v19, %v5483_v27  ;;  %v5493_v42 = vsel %vm5476_vm3, %v7183_v20, %v5485_v29  ;;  %v8470_v16 = vld [vmem:[#allocation8 + $0x1e0] ss:$8 sps:$4 sm:$0xff]   ;;  %v8489_v22 = vld [vmem:[#allocation11 + $0x30] sm:$0xff]  }
 0x43a   :  { %vm5478_vm6 = vcmp.ge.f32.partialorder %v7181_v33, 0.0  ;;  %v5487_v37 = vmul.f32 %v7181_v33, %v5481_v13  ;;  %vm5480_vm7 = vcmp.ge.f32.partialorder %v7185_v34, 0.0  ;;  %v5489_v38 = vmul.f32 %v7185_v34, %v5481_v13  ;;  %v8469_v13 = vld [vmem:[#allocation8 + $0x1d4] ss:$8 sps:$4 sm:$0xff]   ;;  %v8486_v19 = vld [vmem:[#allocation11 + $0x68] sm:$0xff]  }
 0x43b   :  { %v5494_v39 = vsel %vm5477_vm4, %v7180_v30, %v5486_v35  ;;  %v8956_v40 = vsel %vm5479_vm5, %v7184_v31, %v5488_v36  ;;  %v8487_v20 = vld [vmem:[#allocation11 + $0x28] sm:$0xff]   ;;  %7137 = vmatprep.subr.bf16.mxu1 %v8486_v19  ;;  %v8490_v23 = vld [vmem:[#allocation11 + $0x78] sm:$0xff]   ;;  %v8713_v25 = vmov 0.0   ;;  %v5989_v30 = vstv %s7099_s6 }
 0x43c   :  { %v5498_v43 = vpack.c.bf16 %v5494_v39, %v5490_v32  ;;  %v5500_v44 = vpack.c.bf16 %v8956_v40, %v8954_v28  ;;  %v5495_v45 = vsel %vm5478_vm6, %v7181_v33, %v5487_v37  ;;  %v5497_v46 = vsel %vm5480_vm7, %v7185_v34, %v5489_v38  ;;  %7138 = vmatpush3.bf16.msra.mxu1 %v8487_v20  ;;  %v8491_v24 = vld [vmem:[#allocation11 + $0x38] sm:$0xff]  }
 0x43d   :  { %v5499_v47 = vpack.c.bf16 %v5495_v45, %v5491_v41  ;;  %v5501_v49 = vpack.c.bf16 %v5497_v46, %v5493_v42  ;;  %7139 = vmatprep.subr.bf16.mxu1 %v8488_v21  ;;  %v5566_v26 = vld [vmem:[#allocation9] sm:$0x3]  ;;  %v8492_v45 = vld [vmem:[#allocation14] sm:$0xff]   ;;  %v8493_v46 = vld [vmem:[#allocation14 + $0x8] sm:$0xff]  }
 0x43e   :  { %v5571_v27 = vrot.slane %v5566_v26, %v878_v3  ;;  %v5575_v28 = vrot.slane %v5566_v26, %v882_v6 }
 0x43f   :  { %5930 = vmatprep.mubr.bf16.mxu0 %v5499_v47  ;;  %v8494_v47 = vld [vmem:[#allocation14 + $0x10] sm:$0xff]  }
 0x440   :  { %5931 = vmatmul.mubr.bf16.vlgmr.msra.gmra.mrb[4].mxu0 %v5498_v43  ;;  %7140 = vmatpush3.bf16.msra.mxu1 %v8489_v22 }
 0x441   :  { %5942 = vmatpush1.bf16.msra.mxu0 %v8428_v48  ;;  %5973 = vmatprep.mubr.bf16.mxu0 %v5501_v49  ;;  %v8495_v48 = vld [vmem:[#allocation14 + $0x18] sm:$0xff]   ;;  %v8496_v49 = vld [vmem:[#allocation14 + $0x20] sm:$0xff]  }
 0x442   :  { %5943 = vmatprep.subr.bf16.mxu0 %v8433_v50  ;;  %7141 = vmatprep.subr.bf16.mxu1 %v8490_v23  ;;  %v8497_v50 = vld [vmem:[#allocation14 + $0x28] sm:$0xff]  }
 0x444   :  { %7142 = vmatpush3.bf16.msra.mxu1 %v8491_v24 }
 0x445   :  { %5944 = vmatpush1.bf16.msra.mxu0 %v8431_v51  ;;  %7158 = vmatprep.subr.bf16.mxu1 %v8713_v25  ;;  %v8498_v51 = vld [vmem:[#allocation14 + $0x30] sm:$0xff]  }
 0x446   :  { %5945 = vmatprep.subr.bf16.mxu0 %v8436_v52  ;;  %v8499_v52 = vld [vmem:[#allocation14 + $0x38] sm:$0xff]  }
 0x449   :  { %5946 = vmatpush1.bf16.msra.mxu0 %v8434_v53 }
 0x44a   :  { %5947 = vmatprep.subr.bf16.mxu0 %v8439_v54  ;;  %v7100_v54 = vld [vmem:[#allocation12] ss:$0 sm:$0xff] }
 0x44d   :  { %5948 = vmatpush1.bf16.msra.mxu0 %v8437_v55 }
 0x44e   :  { %5949 = vmatprep.subr.bf16.mxu0 %v8442_v56 }
 0x451   :  { %5950 = vmatpush1.bf16.msra.mxu0 %v8440_v57 }
 0x452   :  { %5951 = vmatprep.subr.bf16.mxu0 %v8445_v58  ;;  %v6179_v58 = vstv %s7117_s7 }
 0x455   :  { %5952 = vmatpush1.bf16.msra.mxu0 %v8443_v59 }
 0x456   :  { %5953 = vmatprep.subr.bf16.mxu0 %v8448_v60 }
 0x459   :  { %5954 = vmatpush1.bf16.msra.mxu0 %v8446_v61 }
 0x45a   :  { %5955 = vmatprep.subr.bf16.mxu0 %v8451_v62 }
 0x45d   :  { %5956 = vmatpush1.bf16.msra.mxu0 %v8449_v63 }
 0x45e   :  { %5957 = vmatprep.subr.bf16.mxu0 %v8454_v0 }
 0x461   :  { %5958 = vmatpush1.bf16.msra.mxu0 %v8452_v1 }
 0x462   :  { %5959 = vmatprep.subr.bf16.mxu0 %v8457_v4 }
 0x465   :  { %5960 = vmatpush1.bf16.msra.mxu0 %v8455_v5 }
 0x466   :  { %5961 = vmatprep.subr.bf16.mxu0 %v8460_v7  ;;  %v7118_v7 = vld [vmem:[#allocation15] ss:$0 sm:$0xff] }
 0x469   :  { %5962 = vmatpush1.bf16.msra.mxu0 %v8458_v8 }
 0x46a   :  { %5963 = vmatprep.subr.bf16.mxu0 %v8463_v9 }
 0x46d   :  { %5964 = vmatpush1.bf16.msra.mxu0 %v8461_v10 }
 0x46e   :  { %5965 = vmatprep.subr.bf16.mxu0 %v8466_v11 }
 0x471   :  { %5966 = vmatpush1.bf16.msra.mxu0 %v8464_v12 }
 0x472   :  { %5967 = vmatprep.subr.bf16.mxu0 %v8469_v13 }
 0x475   :  { %5968 = vmatpush1.bf16.msra.mxu0 %v8467_v14 }
 0x476   :  { %5969 = vmatprep.subr.bf16.mxu0 %v8472_v15 }
 0x479   :  { %5970 = vmatpush1.bf16.msra.mxu0 %v8470_v16 }
 0x47a   :  { %5971 = vmatprep.subr.bf16.mxu0 %v8475_v17 }
 0x47d   :  { %5972 = vmatpush1.bf16.msra.mxu0 %v8473_v18 }
 0x480   :  { %5974 = vmatmul.mubr.bf16.vlgmr.msra.gmra.mrb[4].mxu0 %v5500_v44 }
 0x553   :  { %v5975_v29 = vpop.f32.mrb[4].mxu0 }
 0x554   :  { %v7186_v31 = vadd.f32 %v5975_v29, %v5571_v27  ;;  %v5977_v32 = vpop.f32.mrb[5].mxu0 }
 0x555   :  { %v7187_v33 = vadd.f32 %v5977_v32, %v5575_v28  ;;  %v5979_v34 = vpop.f32.mrb[6].mxu0 }
 0x556   :  { %v5990_v35 = vmul.f32 %v7186_v31, %v5989_v30  ;;  %v7188_v36 = vadd.f32 %v5979_v34, %v5571_v27  ;;  %v5981_v37 = vpop.f32.mrb[7].mxu0  ;;  %vm5985_vm8 = vcmp.ge.f32.partialorder %v7186_v31, 0.0 }
 0x557   :  { %v5991_v38 = vmul.f32 %v7187_v33, %v5989_v30  ;;  %v7189_v39 = vadd.f32 %v5981_v37, %v5575_v28  ;;  %vm5986_vm9 = vcmp.ge.f32.partialorder %v7187_v33, 0.0 }
 0x558   :  { %vm5987_vm10 = vcmp.ge.f32.partialorder %v7188_v36, 0.0  ;;  %v5992_v40 = vmul.f32 %v7188_v36, %v5989_v30  ;;  %v5994_v41 = vsel %vm5985_vm8, %v7186_v31, %v5990_v35 }
 0x559   :  { %vm5988_vm11 = vcmp.ge.f32.partialorder %v7189_v39, 0.0  ;;  %v5993_v3 = vmul.f32 %v7189_v39, %v5989_v30  ;;  %v5995_v42 = vsel %vm5986_vm9, %v7187_v33, %v5991_v38 }
 0x55a   :  { %v5996_v2 = vsel %vm5987_vm10, %v7188_v36, %v5992_v40 }
 0x55b   :  { %v5998_v6 = vpack.c.bf16 %v5996_v2, %v5994_v41  ;;  %v5997_v43 = vsel %vm5988_vm11, %v7189_v39, %v5993_v3 }
 0x55c   :  { %v5999_v44 = vpack.c.bf16 %v5997_v43, %v5995_v42 }
 0x55e   :  { %6167 = vmatprep.mubr.bf16.mxu1 %v5999_v44 }
 0x55f   :  { %6168 = vmatmul.mubr.bf16.vlgmr.msra.gmra.mrb[4].mxu1 %v5998_v6 }
 0x560   :  { %7159 = vmatpush3.bf16.msra.mxu1 %v8492_v45  ;;  %7174 = vmatprep.mubr.msk.bf16.mxu1 %vm8714_vm12, %v8713_v25 }
 0x561   :  { %7160 = vmatprep.subr.bf16.mxu1 %v8713_v25 }
 0x564   :  { %7161 = vmatpush3.bf16.msra.mxu1 %v8493_v46 }
 0x565   :  { %7162 = vmatprep.subr.bf16.mxu1 %v8713_v25 }
 0x568   :  { %7163 = vmatpush3.bf16.msra.mxu1 %v8494_v47 }
 0x569   :  { %7164 = vmatprep.subr.bf16.mxu1 %v8713_v25 }
 0x56c   :  { %7165 = vmatpush3.bf16.msra.mxu1 %v8495_v48 }
 0x56d   :  { %7166 = vmatprep.subr.bf16.mxu1 %v8713_v25 }
 0x570   :  { %7167 = vmatpush3.bf16.msra.mxu1 %v8496_v49 }
 0x571   :  { %7168 = vmatprep.subr.bf16.mxu1 %v8713_v25 }
 0x574   :  { %7169 = vmatpush3.bf16.msra.mxu1 %v8497_v50 }
 0x575   :  { %7170 = vmatprep.subr.bf16.mxu1 %v8713_v25 }
 0x578   :  { %7171 = vmatpush3.bf16.msra.mxu1 %v8498_v51 }
 0x579   :  { %7172 = vmatprep.subr.bf16.mxu1 %v8713_v25 }
 0x57c   :  { %7173 = vmatpush3.bf16.msra.mxu1 %v8499_v52 }
 0x632   :  { %v7143_v53 = vpop.f32.mrb[4].mxu1 }
 0x633   :  { %v7144_v55 = vpop.f32.mrb[5].mxu1 }
 0x634   :  { %v7145_v56 = vadd.f32 %v7144_v55, %v7143_v53  ;;  %v7146_v57 = vpop.f32.mrb[6].mxu1 }
 0x635   :  { %v7147_v59 = vpop.f32.mrb[7].mxu1 }
 0x636   :  { %v6170_v60 = vadd.f32 %v7145_v56, %v7100_v54  ;;  %v7148_v61 = vadd.f32 %v7147_v59, %v7146_v57 }
 0x638   :  { %v6180_v62 = vmul.f32 %v6179_v58, %v6170_v60  ;;  %v6173_v63 = vadd.f32 %v7148_v61, %v7100_v54  ;;  %vm6177_vm13 = vcmp.ge.f32.partialorder %v6170_v60, 0.0 }
 0x63a   :  { %vm6178_vm14 = vcmp.ge.f32.partialorder %v6173_v63, 0.0  ;;  %v6181_v0 = vmul.f32 %v6179_v58, %v6173_v63  ;;  %v6182_v1 = vsel %vm6177_vm13, %v6170_v60, %v6180_v62 }
 0x63c   :  { %v6183_v4 = vsel %vm6178_vm14, %v6173_v63, %v6181_v0 }
 0x63d   :  { %v6184_v5 = vpack.c.bf16 %v6183_v4, %v6182_v1 }
 0x63f   :  { %7175 = vmatmul.mubr.bf16.vlgmr.msra.gmra.mrb[8].mxu1 %v6184_v5 }
 0x712   :  { %v6290_v8 = vpop.f32.mrb[8].mxu1 }
 0x713   :  { %v6291_v9 = vadd.f32 %v7118_v7, %v6290_v8  ;;  %v7176_v10 = vpop.f32.mrb[9].mxu1 }
 0x714   :  { %v6293_v11 = vpop.f32.mrb[10].mxu1 }
 0x715   :  { %6297 = vst [vmem:[%s8984_s10] sm:$0xff] %v6291_v9  ;;  %v6294_v12 = vadd.f32 %v7118_v7, %v6293_v11  ;;  %v7177_v13 = vpop.f32.mrb[11].mxu1 }
 0x717   :  { %6298 = vst [vmem:[%s8984_s10 + $0x8] sm:$0xff] %v6294_v12 }
 0x718   :  { %6303 = vsyncpa [#allocation3], 1 }
 0x719   :  { %6304 = vsyncpa [#allocation7], 1 }
 0x71a   :  { %6305 = vsyncpa [#allocation10], 1 }
 0x71b   :  { %6306 = vsyncpa [#allocation13], 1 }
 0x71c   :  { %6307 = vsyncpa [#allocation16], 1 }
 0x71d   :  { %6308 = vsyncpa [#allocation4], 1 }

</bundles_post_ra>
